<compile_context>
chip_gen: v6e
topology: v6e:2x2x1
jax: 0.10.0
libtpu: 0.0.40
codegen_flags: <defaults>
</compile_context>

<pallas_src>
import functools

import numpy as np

import jax
import jax.numpy as jnp
from jax.experimental import pallas as pl
from jax.experimental.pallas import tpu as pltpu

BN_EPS = 1e-5
VMEM_SPEC = pl.BlockSpec(memory_space=pltpu.MemorySpace.VMEM)
_TAPS = [(dh, dw) for dh in (-1, 0, 1) for dw in (-1, 0, 1)]   # kh*3+kw order
_PREC = jax.lax.Precision.HIGHEST


# ----------------------------------------------------------------------------
# Pallas kernels
# ----------------------------------------------------------------------------
def _trunk_kernel(x_ref, masks_ref, w1_ref, s1_ref, b1_ref,
                  blkw_ref, blks_ref, blkb_ref,
                  w2_ref, cb2_ref, s2_ref, b2_ref,
                  out_ref, shift_ref, pat_ref, *, n_blocks, H, W):
    """Fused: conv1+BN+ReLU -> n_blocks BasicBlocks -> 1x1 conv+bias+BN+ReLU.

    x_ref:     (P, Cin)           NHWC-flat input pixels (P = N*H*W)
    masks_ref: (P, 9)             per-tap validity masks (0/1)
    w1_ref:    (9*Cin, Cmid)      conv1 weight in im2col layout
    s1/b1:     (1, Cmid)          folded BN scale / bias
    blkw_ref:  (B, 2, 9*Cmid, Cmid)
    blks/blkb: (B, 2, 1, Cmid)
    w2_ref:    (Cmid, Cout)       1x1 conv
    cb2_ref:   (1, Cout)          1x1 conv bias
    s2/b2:     (1, Cout)          folded BN scale / bias
    out_ref:   (P, Cout)
    shift_ref: (P + 2*(W+1), Cmax) VMEM scratch, zero halo rows
    pat_ref:   (P, 9*Cmax)        VMEM scratch for im2col patches
    """
    P = x_ref.shape[0]
    PAD = W + 1

    # Zero the halo rows of the shift buffer once; interior rows are fully
    # overwritten by every conv.
    shift_ref[...] = jnp.zeros_like(shift_ref)

    def conv3x3_bn_relu(y, w, scale, bias, residual=None):
        C = y.shape[1]
        # Stage the activation into the row-padded shift buffer.
        shift_ref[PAD:PAD + P, :C] = y
        # Build the (P, 9*C) im2col slab with static row-shifted slices;
        # the masks zero out taps that fall outside the image.
        for t, (dh, dw) in enumerate(_TAPS):
            off = dh * W + dw
            pat_ref[:, t * C:(t + 1) * C] = (
                shift_ref[PAD + off:PAD + off + P, :C] * masks_ref[:, t:t + 1])
        # One MXU matmul with K = 9*C (instead of 9 skinny K=C matmuls).
        z = jnp.dot(pat_ref[:, :9 * C], w, preferred_element_type=jnp.float32)
        z = z * scale + bias                      # folded BatchNorm (inference)
        if residual is not None:
            z = z + residual
        return jnp.maximum(z, 0.0)

    y = conv3x3_bn_relu(x_ref[...], w1_ref[...], s1_ref[...], b1_ref[...])
    for i in range(n_blocks):                     # static unroll over blocks
        res = y
        y = conv3x3_bn_relu(y, blkw_ref[i, 0], blks_ref[i, 0], blkb_ref[i, 0])
        y = conv3x3_bn_relu(y, blkw_ref[i, 1], blks_ref[i, 1], blkb_ref[i, 1],
                            residual=res)

    # 1x1 conv (with bias) + folded BN + ReLU.
    z = jnp.dot(y, w2_ref[...], preferred_element_type=jnp.float32) + cb2_ref[...]
    z = z * s2_ref[...] + b2_ref[...]
    out_ref[...] = jnp.maximum(z, 0.0)


def _head_kernel(xs_ref, xg_ref, lgw_ref, lgb_ref, fcs_ref, fcg_ref, fcb_ref,
                 out_ref, *, outplanes, outdense):
    """Fused linear_g + concat + all fc heads + per-head softmax.

    xs_ref:  (N, outplanes*outdense)   torch-ordered flattened trunk output
    xg_ref:  (N, in_vector)            states_G
    lgw/lgb: (in_vector, out_vector), (1, out_vector)
    fcs_ref: (outplanes*outdense, outplanes*outdense)  fc rows for x_s
    fcg_ref: (out_vector, outplanes*outdense)          fc rows for x_g
    fcb_ref: (1, outplanes*outdense)
    out_ref: (N, outplanes*outdense)
    """
    xg = jnp.dot(xg_ref[...], lgw_ref[...], preferred_element_type=jnp.float32)
    xg = jnp.maximum(xg + lgb_ref[...], 0.0)

    # torch.cat((x_s, x_g), 1) @ fc_w  ==  x_s @ fc_w[:S] + x_g @ fc_w[S:]
    z = (jnp.dot(xs_ref[...], fcs_ref[...], preferred_element_type=jnp.float32)
         + jnp.dot(xg, fcg_ref[...], preferred_element_type=jnp.float32)
         + fcb_ref[...])
    z = jnp.maximum(z, 0.0)

    # per-head softmax (== logsoftmax(dim=2).exp()).  With only
    # outplanes*outdense = 48 output lanes the store is sub-vreg either way,
    # so the static per-head loop costs nothing here; at realistic head counts
    # reshape to (N*outplanes, outdense) and store once, lane-dense.
    for o in range(outplanes):
        zo = z[:, o * outdense:(o + 1) * outdense]
        zo = zo - jnp.max(zo, axis=-1, keepdims=True)
        e = jnp.exp(zo)
        inv = pl.reciprocal(jnp.sum(e, axis=-1, keepdims=True), approx=False)
        out_ref[:, o * outdense:(o + 1) * outdense] = e * inv


# ----------------------------------------------------------------------------
# Parameter construction (deterministic, synthetic, PyTorch-native layout)
# ----------------------------------------------------------------------------
def init_params(key, inplanes, midplanes, outplanes, blocks_num, in_vector,
                out_vector, outdense):
    keys = iter(jax.random.split(key, 128))

    def nrm(shape, s=0.1):
        return (s * jax.random.normal(next(keys), shape)).astype(jnp.float32)

    def bn(c):
        return dict(
            gamma=(1.0 + 0.1 * jax.random.normal(next(keys), (c,))).astype(jnp.float32),
            beta=nrm((c,)),
            mean=nrm((c,)),
            var=(1.0 + 0.1 * jnp.abs(jax.random.normal(next(keys), (c,)))).astype(jnp.float32),
        )

    p = {}
    p['conv1_w'] = nrm((midplanes, inplanes, 3, 3))          # OIHW
    p['bn1'] = bn(midplanes)
    p['blocks'] = []
    for _ in range(blocks_num):
        p['blocks'].append(dict(conv1_w=nrm((midplanes, midplanes, 3, 3)),
                                bn1=bn(midplanes),
                                conv2_w=nrm((midplanes, midplanes, 3, 3)),
                                bn2=bn(midplanes)))
    p['conv2_w'] = nrm((outplanes, midplanes, 1, 1))         # 1x1, bias=True
    p['conv2_b'] = nrm((outplanes,))
    p['bn2'] = bn(outplanes)
    p['lg_w'] = nrm((out_vector, in_vector))                 # torch Linear (out, in)
    p['lg_b'] = nrm((out_vector,))
    fin = outplanes * outdense + out_vector
    p['fc_w'] = nrm((outplanes, outdense, fin))              # per-head Linear
    p['fc_b'] = nrm((outplanes, outdense))
    return p


def _fold_bn(bnp):
    scale = bnp['gamma'] / jnp.sqrt(bnp['var'] + BN_EPS)
    bias = bnp['beta'] - bnp['mean'] * scale
    return scale.reshape(1, -1), bias.reshape(1, -1)


def _conv_w_matmul(w_oihw):
    """OIHW (Co,Ci,3,3) -> (9*Ci, Co) matching the in-kernel patch layout."""
    co, ci = w_oihw.shape[0], w_oihw.shape[1]
    return jnp.transpose(w_oihw, (2, 3, 1, 0)).reshape(9 * ci, co)


# ----------------------------------------------------------------------------
# Forward (Pallas)
# ----------------------------------------------------------------------------
def resnet_double_forward(params, states_G, states_S, require_init=None,
                          *, outplanes, outdense):
    del require_init                              # unused in the reference too
    G = states_G[0].astype(jnp.float32)           # .squeeze(0) -> (N, in_vector)
    S = states_S[0].astype(jnp.float32)           # .squeeze(0) -> (N, Cin, H, W)
    N, Cin, H, W = S.shape
    P = N * H * W
    Cmid = params['conv1_w'].shape[0]
    Cout = params['conv2_w'].shape[0]
    assert Cout == outplanes and outdense == H * W
    Cmax = max(Cin, Cmid)

    # NCHW -> NHWC-flat pixel slab (one cheap XLA transpose of the raw input).
    x2 = jnp.transpose(S, (0, 2, 3, 1)).reshape(P, Cin)

    # Constant per-tap validity masks (P, 9).
    hh = (np.arange(P) // W) % H
    ww = np.arange(P) % W
    masks = jnp.asarray(np.stack(
        [((hh + dh >= 0) & (hh + dh < H) & (ww + dw >= 0) & (ww + dw < W))
         .astype(np.float32) for (dh, dw) in _TAPS], axis=1))

    # --- weight prep (tiny, constant per call) ---
    w1 = _conv_w_matmul(params['conv1_w'])                 # (9*Cin, Cmid)
    s1, b1 = _fold_bn(params['bn1'])
    n_blocks = len(params['blocks'])
    blk_w = jnp.stack([jnp.stack([_conv_w_matmul(blk['conv1_w']),
                                  _conv_w_matmul(blk['conv2_w'])], axis=0)
                       for blk in params['blocks']], axis=0)   # (B,2,9*Cmid,Cmid)
    blk_s, blk_b = [], []
    for blk in params['blocks']:
        sa, ba = _fold_bn(blk['bn1'])
        sb, bb = _fold_bn(blk['bn2'])
        blk_s.append(jnp.stack([sa, sb], axis=0))
        blk_b.append(jnp.stack([ba, bb], axis=0))
    blk_s = jnp.stack(blk_s, axis=0)                       # (B,2,1,Cmid)
    blk_b = jnp.stack(blk_b, axis=0)
    w2 = params['conv2_w'].reshape(Cout, Cmid).T           # (Cmid, Cout)
    cb2 = params['conv2_b'].reshape(1, Cout)
    s2, b2 = _fold_bn(params['bn2'])

    # --- fused trunk: 1 pallas_call for conv1 + all blocks + 1x1 conv ---
    y = pl.pallas_call(
        functools.partial(_trunk_kernel, n_blocks=n_blocks, H=H, W=W),
        out_shape=jax.ShapeDtypeStruct((P, Cout), jnp.float32),
        in_specs=[VMEM_SPEC] * 12,
        out_specs=VMEM_SPEC,
        scratch_shapes=[pltpu.VMEM((P + 2 * (W + 1), Cmax), jnp.float32),
                        pltpu.VMEM((P, 9 * Cmax), jnp.float32)],
    )(x2, masks, w1, s1, b1, blk_w, blk_s, blk_b, w2, cb2, s2, b2)

    # Match torch's NCHW .view(-1, outplanes*outdense) ordering (tiny XLA op).
    x_s = jnp.transpose(y.reshape(N, H * W, Cout), (0, 2, 1)).reshape(
        N, Cout * H * W)

    # --- fused heads: linear_g + concat + fc heads + softmax ---
    S_dim = outplanes * outdense
    lg_w = params['lg_w'].T                                # (in_vector, out_vector)
    lg_b = params['lg_b'].reshape(1, -1)
    fc_w_packed = jnp.concatenate([params['fc_w'][o].T for o in range(outplanes)],
                                  axis=1)                  # (Fin, outplanes*outdense)
    fc_b_packed = params['fc_b'].reshape(1, outplanes * outdense)
    fc_ws = fc_w_packed[:S_dim]                            # rows for x_s
    fc_wg = fc_w_packed[S_dim:]                            # rows for x_g

    probs = pl.pallas_call(
        functools.partial(_head_kernel, outplanes=outplanes, outdense=outdense),
        out_shape=jax.ShapeDtypeStruct((N, outplanes * outdense), jnp.float32),
        in_specs=[VMEM_SPEC] * 7,
        out_specs=VMEM_SPEC,
    )(x_s, G, lg_w, lg_b, fc_ws, fc_wg, fc_b_packed)

    return probs.reshape(N, outplanes, outdense)[None]     # .unsqueeze(0)


# ----------------------------------------------------------------------------
# Pure-JAX reference (mirrors the PyTorch module, inference-mode BN)
# ----------------------------------------------------------------------------
def _bn_inference(x_nchw, bnp):
    scale = bnp['gamma'] / jnp.sqrt(bnp['var'] + BN_EPS)
    bias = bnp['beta'] - bnp['mean'] * scale
    return x_nchw * scale[None, :, None, None] + bias[None, :, None, None]


def resnet_double_forward_ref(params, states_G, states_S, require_init=None,
                              *, outplanes, outdense):
    del require_init
    G = states_G[0].astype(jnp.float32)
    x = states_S[0].astype(jnp.float32)

    def conv(a, w):
        return jax.lax.conv_general_dilated(
            a, w, (1, 1), 'SAME',
            dimension_numbers=('NCHW', 'OIHW', 'NCHW'), precision=_PREC)

    x = jax.nn.relu(_bn_inference(conv(x, params['conv1_w']), params['bn1']))
    for blk in params['blocks']:
        r = x
        out = jax.nn.relu(_bn_inference(conv(x, blk['conv1_w']), blk['bn1']))
        out = _bn_inference(conv(out, blk['conv2_w']), blk['bn2'])
        x = jax.nn.relu(out + r)
    x = conv(x, params['conv2_w']) + params['conv2_b'][None, :, None, None]
    x = jax.nn.relu(_bn_inference(x, params['bn2']))

    n = x.shape[0]
    x_s = x.reshape(n, outplanes * outdense)
    x_g = jax.nn.relu(jnp.dot(G, params['lg_w'].T, precision=_PREC)
                      + params['lg_b'])
    xcat = jnp.concatenate([x_s, x_g], axis=1)
    heads = [jax.nn.relu(jnp.dot(xcat, params['fc_w'][o].T, precision=_PREC)
                         + params['fc_b'][o]) for o in range(outplanes)]
    z = jnp.stack(heads, axis=1)
    return jax.nn.softmax(z, axis=2)[None]


# ----------------------------------------------------------------------------
if __name__ == "__main__":
    # Small, self-consistent config:
    N = 2            # batch (after squeeze(0))
    inplanes = 4
    midplanes = 8
    outplanes = 3
    BLOCKS_num = 2
    H = W = 4
    outdense = H * W          # 16, required by the .view() in forward
    in_vector = 8
    out_vector = 8

    key = jax.random.PRNGKey(0)
    kp, kg, ks = jax.random.split(key, 3)
    params = init_params(kp, inplanes, midplanes, outplanes, BLOCKS_num,
                         in_vector, out_vector, outdense)

    states_G = jax.random.normal(kg, (1, N, in_vector), dtype=jnp.float32)
    states_S = jax.random.normal(ks, (1, N, inplanes, H, W), dtype=jnp.float32)

    fwd = jax.jit(functools.partial(resnet_double_forward,
                                    outplanes=outplanes, outdense=outdense))
    probas = jax.block_until_ready(fwd(params, states_G, states_S))

    assert probas.shape == (1, N, outplanes, outdense)
    # softmax rows must sum to 1
    assert jnp.allclose(jnp.sum(probas, axis=-1), 1.0, atol=1e-5)

    # correctness check against a pure-JAX/XLA reference of the same math
    ref_fwd = jax.jit(functools.partial(resnet_double_forward_ref,
                                        outplanes=outplanes, outdense=outdense))
    ref = jax.block_until_ready(ref_fwd(params, states_G, states_S))
    max_err = float(jnp.max(jnp.abs(probas - ref)))
    assert max_err < 1e-3, f"mismatch vs reference, max abs err = {max_err}"

    print("KERNEL_OK")
</pallas_src>

<mosaic_0001>
module attributes {stable_mosaic.version = 11 : i64} {
  func.func @_trunk_kernel(%arg0: memref<32x4xf32, #tpu.memory_space<vmem>>, %arg1: memref<32x9xf32, #tpu.memory_space<vmem>>, %arg2: memref<36x8xf32, #tpu.memory_space<vmem>>, %arg3: memref<1x8xf32, #tpu.memory_space<vmem>>, %arg4: memref<1x8xf32, #tpu.memory_space<vmem>>, %arg5: memref<2x2x72x8xf32, #tpu.memory_space<vmem>>, %arg6: memref<2x2x1x8xf32, #tpu.memory_space<vmem>>, %arg7: memref<2x2x1x8xf32, #tpu.memory_space<vmem>>, %arg8: memref<8x3xf32, #tpu.memory_space<vmem>>, %arg9: memref<1x3xf32, #tpu.memory_space<vmem>>, %arg10: memref<1x3xf32, #tpu.memory_space<vmem>>, %arg11: memref<1x3xf32, #tpu.memory_space<vmem>>, %arg12: memref<32x3xf32, #tpu.memory_space<vmem>>, %arg13: memref<42x8xf32, #tpu.memory_space<vmem>>, %arg14: memref<32x72xf32, #tpu.memory_space<vmem>>) attributes {dimension_semantics = [], scalar_prefetch = 0 : i64, scratch_operands = 2 : i64, tpu.core_type = #tpu.core_type<tc>} {
    %cst = arith.constant 0.000000e+00 : f32
    %0 = vector.broadcast %cst : f32 to vector<42x8xf32>
    %c0 = arith.constant 0 : index
    %c0_0 = arith.constant 0 : index
    %1 = vector.load %arg13[%c0, %c0_0] : memref<42x8xf32, #tpu.memory_space<vmem>>, vector<42x8xf32>
    tpu.vector_store %arg13[%c0, %c0_0], %0 {strides = array<i32>} : memref<42x8xf32, #tpu.memory_space<vmem>>, vector<42x8xf32>,
    %c0_1 = arith.constant 0 : index
    %c0_2 = arith.constant 0 : index
    %2 = vector.load %arg0[%c0_1, %c0_2] : memref<32x4xf32, #tpu.memory_space<vmem>>, vector<32x4xf32>
    %c0_3 = arith.constant 0 : index
    %c0_4 = arith.constant 0 : index
    %3 = vector.load %arg2[%c0_3, %c0_4] : memref<36x8xf32, #tpu.memory_space<vmem>>, vector<36x8xf32>
    %c0_5 = arith.constant 0 : index
    %c0_6 = arith.constant 0 : index
    %4 = vector.load %arg3[%c0_5, %c0_6] : memref<1x8xf32, #tpu.memory_space<vmem>>, vector<1x8xf32>
    %c0_7 = arith.constant 0 : index
    %c0_8 = arith.constant 0 : index
    %5 = vector.load %arg4[%c0_7, %c0_8] : memref<1x8xf32, #tpu.memory_space<vmem>>, vector<1x8xf32>
    %c5 = arith.constant 5 : index
    %c0_9 = arith.constant 0 : index
    %6 = vector.load %arg13[%c5, %c0_9] : memref<42x8xf32, #tpu.memory_space<vmem>>, vector<32x4xf32>
    tpu.vector_store %arg13[%c5, %c0_9], %2 {strides = array<i32>} : memref<42x8xf32, #tpu.memory_space<vmem>>, vector<32x4xf32>,
    %c0_10 = arith.constant 0 : index
    %c0_11 = arith.constant 0 : index
    %7 = vector.load %arg13[%c0_10, %c0_11] : memref<42x8xf32, #tpu.memory_space<vmem>>, vector<32x4xf32>
    %c0_12 = arith.constant 0 : index
    %c0_13 = arith.constant 0 : index
    %8 = vector.load %arg1[%c0_12, %c0_13] : memref<32x9xf32, #tpu.memory_space<vmem>>, vector<32x1xf32>
    %9 = vector.broadcast %8 : vector<32x1xf32> to vector<32x4xf32>
    %10 = arith.mulf %7, %9 : vector<32x4xf32>
    %c0_14 = arith.constant 0 : index
    %c0_15 = arith.constant 0 : index
    %11 = vector.load %arg14[%c0_14, %c0_15] : memref<32x72xf32, #tpu.memory_space<vmem>>, vector<32x4xf32>
    tpu.vector_store %arg14[%c0_14, %c0_15], %10 {strides = array<i32>} : memref<32x72xf32, #tpu.memory_space<vmem>>, vector<32x4xf32>,
    %c1 = arith.constant 1 : index
    %c0_16 = arith.constant 0 : index
    %12 = vector.load %arg13[%c1, %c0_16] : memref<42x8xf32, #tpu.memory_space<vmem>>, vector<32x4xf32>
    %c0_17 = arith.constant 0 : index
    %c1_18 = arith.constant 1 : index
    %13 = vector.load %arg1[%c0_17, %c1_18] : memref<32x9xf32, #tpu.memory_space<vmem>>, vector<32x1xf32>
    %14 = vector.broadcast %13 : vector<32x1xf32> to vector<32x4xf32>
    %15 = arith.mulf %12, %14 : vector<32x4xf32>
    %c0_19 = arith.constant 0 : index
    %c4 = arith.constant 4 : index
    %16 = vector.load %arg14[%c0_19, %c4] : memref<32x72xf32, #tpu.memory_space<vmem>>, vector<32x4xf32>
    tpu.vector_store %arg14[%c0_19, %c4], %15 {strides = array<i32>} : memref<32x72xf32, #tpu.memory_space<vmem>>, vector<32x4xf32>,
    %c2 = arith.constant 2 : index
    %c0_20 = arith.constant 0 : index
    %17 = vector.load %arg13[%c2, %c0_20] : memref<42x8xf32, #tpu.memory_space<vmem>>, vector<32x4xf32>
    %c0_21 = arith.constant 0 : index
    %c2_22 = arith.constant 2 : index
    %18 = vector.load %arg1[%c0_21, %c2_22] : memref<32x9xf32, #tpu.memory_space<vmem>>, vector<32x1xf32>
    %19 = vector.broadcast %18 : vector<32x1xf32> to vector<32x4xf32>
    %20 = arith.mulf %17, %19 : vector<32x4xf32>
    %c0_23 = arith.constant 0 : index
    %c8 = arith.constant 8 : index
    %21 = vector.load %arg14[%c0_23, %c8] : memref<32x72xf32, #tpu.memory_space<vmem>>, vector<32x4xf32>
    tpu.vector_store %arg14[%c0_23, %c8], %20 {strides = array<i32>} : memref<32x72xf32, #tpu.memory_space<vmem>>, vector<32x4xf32>,
    %c4_24 = arith.constant 4 : index
    %c0_25 = arith.constant 0 : index
    %22 = vector.load %arg13[%c4_24, %c0_25] : memref<42x8xf32, #tpu.memory_space<vmem>>, vector<32x4xf32>
    %c0_26 = arith.constant 0 : index
    %c3 = arith.constant 3 : index
    %23 = vector.load %arg1[%c0_26, %c3] : memref<32x9xf32, #tpu.memory_space<vmem>>, vector<32x1xf32>
    %24 = vector.broadcast %23 : vector<32x1xf32> to vector<32x4xf32>
    %25 = arith.mulf %22, %24 : vector<32x4xf32>
    %c0_27 = arith.constant 0 : index
    %c12 = arith.constant 12 : index
    %26 = vector.load %arg14[%c0_27, %c12] : memref<32x72xf32, #tpu.memory_space<vmem>>, vector<32x4xf32>
    tpu.vector_store %arg14[%c0_27, %c12], %25 {strides = array<i32>} : memref<32x72xf32, #tpu.memory_space<vmem>>, vector<32x4xf32>,
    %c5_28 = arith.constant 5 : index
    %c0_29 = arith.constant 0 : index
    %27 = vector.load %arg13[%c5_28, %c0_29] : memref<42x8xf32, #tpu.memory_space<vmem>>, vector<32x4xf32>
    %c0_30 = arith.constant 0 : index
    %c4_31 = arith.constant 4 : index
    %28 = vector.load %arg1[%c0_30, %c4_31] : memref<32x9xf32, #tpu.memory_space<vmem>>, vector<32x1xf32>
    %29 = vector.broadcast %28 : vector<32x1xf32> to vector<32x4xf32>
    %30 = arith.mulf %27, %29 : vector<32x4xf32>
    %c0_32 = arith.constant 0 : index
    %c16 = arith.constant 16 : index
    %31 = vector.load %arg14[%c0_32, %c16] : memref<32x72xf32, #tpu.memory_space<vmem>>, vector<32x4xf32>
    tpu.vector_store %arg14[%c0_32, %c16], %30 {strides = array<i32>} : memref<32x72xf32, #tpu.memory_space<vmem>>, vector<32x4xf32>,
    %c6 = arith.constant 6 : index
    %c0_33 = arith.constant 0 : index
    %32 = vector.load %arg13[%c6, %c0_33] : memref<42x8xf32, #tpu.memory_space<vmem>>, vector<32x4xf32>
    %c0_34 = arith.constant 0 : index
    %c5_35 = arith.constant 5 : index
    %33 = vector.load %arg1[%c0_34, %c5_35] : memref<32x9xf32, #tpu.memory_space<vmem>>, vector<32x1xf32>
    %34 = vector.broadcast %33 : vector<32x1xf32> to vector<32x4xf32>
    %35 = arith.mulf %32, %34 : vector<32x4xf32>
    %c0_36 = arith.constant 0 : index
    %c20 = arith.constant 20 : index
    %36 = vector.load %arg14[%c0_36, %c20] : memref<32x72xf32, #tpu.memory_space<vmem>>, vector<32x4xf32>
    tpu.vector_store %arg14[%c0_36, %c20], %35 {strides = array<i32>} : memref<32x72xf32, #tpu.memory_space<vmem>>, vector<32x4xf32>,
    %c8_37 = arith.constant 8 : index
    %c0_38 = arith.constant 0 : index
    %37 = vector.load %arg13[%c8_37, %c0_38] : memref<42x8xf32, #tpu.memory_space<vmem>>, vector<32x4xf32>
    %c0_39 = arith.constant 0 : index
    %c6_40 = arith.constant 6 : index
    %38 = vector.load %arg1[%c0_39, %c6_40] : memref<32x9xf32, #tpu.memory_space<vmem>>, vector<32x1xf32>
    %39 = vector.broadcast %38 : vector<32x1xf32> to vector<32x4xf32>
    %40 = arith.mulf %37, %39 : vector<32x4xf32>
    %c0_41 = arith.constant 0 : index
    %c24 = arith.constant 24 : index
    %41 = vector.load %arg14[%c0_41, %c24] : memref<32x72xf32, #tpu.memory_space<vmem>>, vector<32x4xf32>
    tpu.vector_store %arg14[%c0_41, %c24], %40 {strides = array<i32>} : memref<32x72xf32, #tpu.memory_space<vmem>>, vector<32x4xf32>,
    %c9 = arith.constant 9 : index
    %c0_42 = arith.constant 0 : index
    %42 = vector.load %arg13[%c9, %c0_42] : memref<42x8xf32, #tpu.memory_space<vmem>>, vector<32x4xf32>
    %c0_43 = arith.constant 0 : index
    %c7 = arith.constant 7 : index
    %43 = vector.load %arg1[%c0_43, %c7] : memref<32x9xf32, #tpu.memory_space<vmem>>, vector<32x1xf32>
    %44 = vector.broadcast %43 : vector<32x1xf32> to vector<32x4xf32>
    %45 = arith.mulf %42, %44 : vector<32x4xf32>
    %c0_44 = arith.constant 0 : index
    %c28 = arith.constant 28 : index
    %46 = vector.load %arg14[%c0_44, %c28] : memref<32x72xf32, #tpu.memory_space<vmem>>, vector<32x4xf32>
    tpu.vector_store %arg14[%c0_44, %c28], %45 {strides = array<i32>} : memref<32x72xf32, #tpu.memory_space<vmem>>, vector<32x4xf32>,
    %c10 = arith.constant 10 : index
    %c0_45 = arith.constant 0 : index
    %47 = vector.load %arg13[%c10, %c0_45] : memref<42x8xf32, #tpu.memory_space<vmem>>, vector<32x4xf32>
    %c0_46 = arith.constant 0 : index
    %c8_47 = arith.constant 8 : index
    %48 = vector.load %arg1[%c0_46, %c8_47] : memref<32x9xf32, #tpu.memory_space<vmem>>, vector<32x1xf32>
    %49 = vector.broadcast %48 : vector<32x1xf32> to vector<32x4xf32>
    %50 = arith.mulf %47, %49 : vector<32x4xf32>
    %c0_48 = arith.constant 0 : index
    %c32 = arith.constant 32 : index
    %51 = vector.load %arg14[%c0_48, %c32] : memref<32x72xf32, #tpu.memory_space<vmem>>, vector<32x4xf32>
    tpu.vector_store %arg14[%c0_48, %c32], %50 {strides = array<i32>} : memref<32x72xf32, #tpu.memory_space<vmem>>, vector<32x4xf32>,
    %c0_49 = arith.constant 0 : index
    %c0_50 = arith.constant 0 : index
    %52 = vector.load %arg14[%c0_49, %c0_50] : memref<32x72xf32, #tpu.memory_space<vmem>>, vector<32x36xf32>
    %cst_51 = arith.constant dense<0.000000e+00> : vector<32x8xf32>
    %53 = tpu.matmul %52, %3, %cst_51 {dimension_numbers = #tpu.dot_dimension_numbers<[1], [0], [0], [1], [0, 0, 1, 1], [], []>} : vector<32x36xf32>, vector<36x8xf32>, vector<32x8xf32> -> vector<32x8xf32>
    %54 = vector.broadcast %4 : vector<1x8xf32> to vector<32x8xf32>
    %55 = arith.mulf %53, %54 : vector<32x8xf32>
    %56 = vector.broadcast %5 : vector<1x8xf32> to vector<32x8xf32>
    %57 = arith.addf %55, %56 : vector<32x8xf32>
    %cst_52 = arith.constant 0.000000e+00 : f32
    %58 = vector.broadcast %cst_52 : f32 to vector<32x8xf32>
    %59 = arith.maximumf %57, %58 : vector<32x8xf32>
    %c0_53 = arith.constant 0 : index
    %c0_54 = arith.constant 0 : index
    %c0_55 = arith.constant 0 : index
    %c0_56 = arith.constant 0 : index
    %60 = vector.load %arg5[%c0_53, %c0_54, %c0_55, %c0_56] : memref<2x2x72x8xf32, #tpu.memory_space<vmem>>, vector<1x1x72x8xf32>
    %61 = vector.shape_cast %60 : vector<1x1x72x8xf32> to vector<72x8xf32>
    %c0_57 = arith.constant 0 : index
    %c0_58 = arith.constant 0 : index
    %c0_59 = arith.constant 0 : index
    %c0_60 = arith.constant 0 : index
    %62 = vector.load %arg6[%c0_57, %c0_58, %c0_59, %c0_60] : memref<2x2x1x8xf32, #tpu.memory_space<vmem>>, vector<1x1x1x8xf32>
    %63 = vector.shape_cast %62 : vector<1x1x1x8xf32> to vector<1x8xf32>
    %c0_61 = arith.constant 0 : index
    %c0_62 = arith.constant 0 : index
    %c0_63 = arith.constant 0 : index
    %c0_64 = arith.constant 0 : index
    %64 = vector.load %arg7[%c0_61, %c0_62, %c0_63, %c0_64] : memref<2x2x1x8xf32, #tpu.memory_space<vmem>>, vector<1x1x1x8xf32>
    %65 = vector.shape_cast %64 : vector<1x1x1x8xf32> to vector<1x8xf32>
    %c5_65 = arith.constant 5 : index
    %c0_66 = arith.constant 0 : index
    %66 = vector.load %arg13[%c5_65, %c0_66] : memref<42x8xf32, #tpu.memory_space<vmem>>, vector<32x8xf32>
    tpu.vector_store %arg13[%c5_65, %c0_66], %59 {strides = array<i32>} : memref<42x8xf32, #tpu.memory_space<vmem>>, vector<32x8xf32>,
    %c0_67 = arith.constant 0 : index
    %c0_68 = arith.constant 0 : index
    %67 = vector.load %arg13[%c0_67, %c0_68] : memref<42x8xf32, #tpu.memory_space<vmem>>, vector<32x8xf32>
    %c0_69 = arith.constant 0 : index
    %c0_70 = arith.constant 0 : index
    %68 = vector.load %arg1[%c0_69, %c0_70] : memref<32x9xf32, #tpu.memory_space<vmem>>, vector<32x1xf32>
    %69 = vector.broadcast %68 : vector<32x1xf32> to vector<32x8xf32>
    %70 = arith.mulf %67, %69 : vector<32x8xf32>
    %c0_71 = arith.constant 0 : index
    %c0_72 = arith.constant 0 : index
    %71 = vector.load %arg14[%c0_71, %c0_72] : memref<32x72xf32, #tpu.memory_space<vmem>>, vector<32x8xf32>
    tpu.vector_store %arg14[%c0_71, %c0_72], %70 {strides = array<i32>} : memref<32x72xf32, #tpu.memory_space<vmem>>, vector<32x8xf32>,
    %c1_73 = arith.constant 1 : index
    %c0_74 = arith.constant 0 : index
    %72 = vector.load %arg13[%c1_73, %c0_74] : memref<42x8xf32, #tpu.memory_space<vmem>>, vector<32x8xf32>
    %c0_75 = arith.constant 0 : index
    %c1_76 = arith.constant 1 : index
    %73 = vector.load %arg1[%c0_75, %c1_76] : memref<32x9xf32, #tpu.memory_space<vmem>>, vector<32x1xf32>
    %74 = vector.broadcast %73 : vector<32x1xf32> to vector<32x8xf32>
    %75 = arith.mulf %72, %74 : vector<32x8xf32>
    %c0_77 = arith.constant 0 : index
    %c8_78 = arith.constant 8 : index
    %76 = vector.load %arg14[%c0_77, %c8_78] : memref<32x72xf32, #tpu.memory_space<vmem>>, vector<32x8xf32>
    tpu.vector_store %arg14[%c0_77, %c8_78], %75 {strides = array<i32>} : memref<32x72xf32, #tpu.memory_space<vmem>>, vector<32x8xf32>,
    %c2_79 = arith.constant 2 : index
    %c0_80 = arith.constant 0 : index
    %77 = vector.load %arg13[%c2_79, %c0_80] : memref<42x8xf32, #tpu.memory_space<vmem>>, vector<32x8xf32>
    %c0_81 = arith.constant 0 : index
    %c2_82 = arith.constant 2 : index
    %78 = vector.load %arg1[%c0_81, %c2_82] : memref<32x9xf32, #tpu.memory_space<vmem>>, vector<32x1xf32>
    %79 = vector.broadcast %78 : vector<32x1xf32> to vector<32x8xf32>
    %80 = arith.mulf %77, %79 : vector<32x8xf32>
    %c0_83 = arith.constant 0 : index
    %c16_84 = arith.constant 16 : index
    %81 = vector.load %arg14[%c0_83, %c16_84] : memref<32x72xf32, #tpu.memory_space<vmem>>, vector<32x8xf32>
    tpu.vector_store %arg14[%c0_83, %c16_84], %80 {strides = array<i32>} : memref<32x72xf32, #tpu.memory_space<vmem>>, vector<32x8xf32>,
    %c4_85 = arith.constant 4 : index
    %c0_86 = arith.constant 0 : index
    %82 = vector.load %arg13[%c4_85, %c0_86] : memref<42x8xf32, #tpu.memory_space<vmem>>, vector<32x8xf32>
    %c0_87 = arith.constant 0 : index
    %c3_88 = arith.constant 3 : index
    %83 = vector.load %arg1[%c0_87, %c3_88] : memref<32x9xf32, #tpu.memory_space<vmem>>, vector<32x1xf32>
    %84 = vector.broadcast %83 : vector<32x1xf32> to vector<32x8xf32>
    %85 = arith.mulf %82, %84 : vector<32x8xf32>
    %c0_89 = arith.constant 0 : index
    %c24_90 = arith.constant 24 : index
    %86 = vector.load %arg14[%c0_89, %c24_90] : memref<32x72xf32, #tpu.memory_space<vmem>>, vector<32x8xf32>
    tpu.vector_store %arg14[%c0_89, %c24_90], %85 {strides = array<i32>} : memref<32x72xf32, #tpu.memory_space<vmem>>, vector<32x8xf32>,
    %c5_91 = arith.constant 5 : index
    %c0_92 = arith.constant 0 : index
    %87 = vector.load %arg13[%c5_91, %c0_92] : memref<42x8xf32, #tpu.memory_space<vmem>>, vector<32x8xf32>
    %c0_93 = arith.constant 0 : index
    %c4_94 = arith.constant 4 : index
    %88 = vector.load %arg1[%c0_93, %c4_94] : memref<32x9xf32, #tpu.memory_space<vmem>>, vector<32x1xf32>
    %89 = vector.broadcast %88 : vector<32x1xf32> to vector<32x8xf32>
    %90 = arith.mulf %87, %89 : vector<32x8xf32>
    %c0_95 = arith.constant 0 : index
    %c32_96 = arith.constant 32 : index
    %91 = vector.load %arg14[%c0_95, %c32_96] : memref<32x72xf32, #tpu.memory_space<vmem>>, vector<32x8xf32>
    tpu.vector_store %arg14[%c0_95, %c32_96], %90 {strides = array<i32>} : memref<32x72xf32, #tpu.memory_space<vmem>>, vector<32x8xf32>,
    %c6_97 = arith.constant 6 : index
    %c0_98 = arith.constant 0 : index
    %92 = vector.load %arg13[%c6_97, %c0_98] : memref<42x8xf32, #tpu.memory_space<vmem>>, vector<32x8xf32>
    %c0_99 = arith.constant 0 : index
    %c5_100 = arith.constant 5 : index
    %93 = vector.load %arg1[%c0_99, %c5_100] : memref<32x9xf32, #tpu.memory_space<vmem>>, vector<32x1xf32>
    %94 = vector.broadcast %93 : vector<32x1xf32> to vector<32x8xf32>
    %95 = arith.mulf %92, %94 : vector<32x8xf32>
    %c0_101 = arith.constant 0 : index
    %c40 = arith.constant 40 : index
    %96 = vector.load %arg14[%c0_101, %c40] : memref<32x72xf32, #tpu.memory_space<vmem>>, vector<32x8xf32>
    tpu.vector_store %arg14[%c0_101, %c40], %95 {strides = array<i32>} : memref<32x72xf32, #tpu.memory_space<vmem>>, vector<32x8xf32>,
    %c8_102 = arith.constant 8 : index
    %c0_103 = arith.constant 0 : index
    %97 = vector.load %arg13[%c8_102, %c0_103] : memref<42x8xf32, #tpu.memory_space<vmem>>, vector<32x8xf32>
    %c0_104 = arith.constant 0 : index
    %c6_105 = arith.constant 6 : index
    %98 = vector.load %arg1[%c0_104, %c6_105] : memref<32x9xf32, #tpu.memory_space<vmem>>, vector<32x1xf32>
    %99 = vector.broadcast %98 : vector<32x1xf32> to vector<32x8xf32>
    %100 = arith.mulf %97, %99 : vector<32x8xf32>
    %c0_106 = arith.constant 0 : index
    %c48 = arith.constant 48 : index
    %101 = vector.load %arg14[%c0_106, %c48] : memref<32x72xf32, #tpu.memory_space<vmem>>, vector<32x8xf32>
    tpu.vector_store %arg14[%c0_106, %c48], %100 {strides = array<i32>} : memref<32x72xf32, #tpu.memory_space<vmem>>, vector<32x8xf32>,
    %c9_107 = arith.constant 9 : index
    %c0_108 = arith.constant 0 : index
    %102 = vector.load %arg13[%c9_107, %c0_108] : memref<42x8xf32, #tpu.memory_space<vmem>>, vector<32x8xf32>
    %c0_109 = arith.constant 0 : index
    %c7_110 = arith.constant 7 : index
    %103 = vector.load %arg1[%c0_109, %c7_110] : memref<32x9xf32, #tpu.memory_space<vmem>>, vector<32x1xf32>
    %104 = vector.broadcast %103 : vector<32x1xf32> to vector<32x8xf32>
    %105 = arith.mulf %102, %104 : vector<32x8xf32>
    %c0_111 = arith.constant 0 : index
    %c56 = arith.constant 56 : index
    %106 = vector.load %arg14[%c0_111, %c56] : memref<32x72xf32, #tpu.memory_space<vmem>>, vector<32x8xf32>
    tpu.vector_store %arg14[%c0_111, %c56], %105 {strides = array<i32>} : memref<32x72xf32, #tpu.memory_space<vmem>>, vector<32x8xf32>,
    %c10_112 = arith.constant 10 : index
    %c0_113 = arith.constant 0 : index
    %107 = vector.load %arg13[%c10_112, %c0_113] : memref<42x8xf32, #tpu.memory_space<vmem>>, vector<32x8xf32>
    %c0_114 = arith.constant 0 : index
    %c8_115 = arith.constant 8 : index
    %108 = vector.load %arg1[%c0_114, %c8_115] : memref<32x9xf32, #tpu.memory_space<vmem>>, vector<32x1xf32>
    %109 = vector.broadcast %108 : vector<32x1xf32> to vector<32x8xf32>
    %110 = arith.mulf %107, %109 : vector<32x8xf32>
    %c0_116 = arith.constant 0 : index
    %c64 = arith.constant 64 : index
    %111 = vector.load %arg14[%c0_116, %c64] : memref<32x72xf32, #tpu.memory_space<vmem>>, vector<32x8xf32>
    tpu.vector_store %arg14[%c0_116, %c64], %110 {strides = array<i32>} : memref<32x72xf32, #tpu.memory_space<vmem>>, vector<32x8xf32>,
    %c0_117 = arith.constant 0 : index
    %c0_118 = arith.constant 0 : index
    %112 = vector.load %arg14[%c0_117, %c0_118] : memref<32x72xf32, #tpu.memory_space<vmem>>, vector<32x72xf32>
    %cst_119 = arith.constant dense<0.000000e+00> : vector<32x8xf32>
    %113 = tpu.matmul %112, %61, %cst_119 {dimension_numbers = #tpu.dot_dimension_numbers<[1], [0], [0], [1], [0, 0, 1, 1], [], []>} : vector<32x72xf32>, vector<72x8xf32>, vector<32x8xf32> -> vector<32x8xf32>
    %114 = vector.broadcast %63 : vector<1x8xf32> to vector<32x8xf32>
    %115 = arith.mulf %113, %114 : vector<32x8xf32>
    %116 = vector.broadcast %65 : vector<1x8xf32> to vector<32x8xf32>
    %117 = arith.addf %115, %116 : vector<32x8xf32>
    %cst_120 = arith.constant 0.000000e+00 : f32
    %118 = vector.broadcast %cst_120 : f32 to vector<32x8xf32>
    %119 = arith.maximumf %117, %118 : vector<32x8xf32>
    %c0_121 = arith.constant 0 : index
    %c1_122 = arith.constant 1 : index
    %c0_123 = arith.constant 0 : index
    %c0_124 = arith.constant 0 : index
    %120 = vector.load %arg5[%c0_121, %c1_122, %c0_123, %c0_124] : memref<2x2x72x8xf32, #tpu.memory_space<vmem>>, vector<1x1x72x8xf32>
    %121 = vector.shape_cast %120 : vector<1x1x72x8xf32> to vector<72x8xf32>
    %c0_125 = arith.constant 0 : index
    %c1_126 = arith.constant 1 : index
    %c0_127 = arith.constant 0 : index
    %c0_128 = arith.constant 0 : index
    %122 = vector.load %arg6[%c0_125, %c1_126, %c0_127, %c0_128] : memref<2x2x1x8xf32, #tpu.memory_space<vmem>>, vector<1x1x1x8xf32>
    %123 = vector.shape_cast %122 : vector<1x1x1x8xf32> to vector<1x8xf32>
    %c0_129 = arith.constant 0 : index
    %c1_130 = arith.constant 1 : index
    %c0_131 = arith.constant 0 : index
    %c0_132 = arith.constant 0 : index
    %124 = vector.load %arg7[%c0_129, %c1_130, %c0_131, %c0_132] : memref<2x2x1x8xf32, #tpu.memory_space<vmem>>, vector<1x1x1x8xf32>
    %125 = vector.shape_cast %124 : vector<1x1x1x8xf32> to vector<1x8xf32>
    %c5_133 = arith.constant 5 : index
    %c0_134 = arith.constant 0 : index
    %126 = vector.load %arg13[%c5_133, %c0_134] : memref<42x8xf32, #tpu.memory_space<vmem>>, vector<32x8xf32>
    tpu.vector_store %arg13[%c5_133, %c0_134], %119 {strides = array<i32>} : memref<42x8xf32, #tpu.memory_space<vmem>>, vector<32x8xf32>,
    %c0_135 = arith.constant 0 : index
    %c0_136 = arith.constant 0 : index
    %127 = vector.load %arg13[%c0_135, %c0_136] : memref<42x8xf32, #tpu.memory_space<vmem>>, vector<32x8xf32>
    %c0_137 = arith.constant 0 : index
    %c0_138 = arith.constant 0 : index
    %128 = vector.load %arg1[%c0_137, %c0_138] : memref<32x9xf32, #tpu.memory_space<vmem>>, vector<32x1xf32>
    %129 = vector.broadcast %128 : vector<32x1xf32> to vector<32x8xf32>
    %130 = arith.mulf %127, %129 : vector<32x8xf32>
    %c0_139 = arith.constant 0 : index
    %c0_140 = arith.constant 0 : index
    %131 = vector.load %arg14[%c0_139, %c0_140] : memref<32x72xf32, #tpu.memory_space<vmem>>, vector<32x8xf32>
    tpu.vector_store %arg14[%c0_139, %c0_140], %130 {strides = array<i32>} : memref<32x72xf32, #tpu.memory_space<vmem>>, vector<32x8xf32>,
    %c1_141 = arith.constant 1 : index
    %c0_142 = arith.constant 0 : index
    %132 = vector.load %arg13[%c1_141, %c0_142] : memref<42x8xf32, #tpu.memory_space<vmem>>, vector<32x8xf32>
    %c0_143 = arith.constant 0 : index
    %c1_144 = arith.constant 1 : index
    %133 = vector.load %arg1[%c0_143, %c1_144] : memref<32x9xf32, #tpu.memory_space<vmem>>, vector<32x1xf32>
    %134 = vector.broadcast %133 : vector<32x1xf32> to vector<32x8xf32>
    %135 = arith.mulf %132, %134 : vector<32x8xf32>
    %c0_145 = arith.constant 0 : index
    %c8_146 = arith.constant 8 : index
    %136 = vector.load %arg14[%c0_145, %c8_146] : memref<32x72xf32, #tpu.memory_space<vmem>>, vector<32x8xf32>
    tpu.vector_store %arg14[%c0_145, %c8_146], %135 {strides = array<i32>} : memref<32x72xf32, #tpu.memory_space<vmem>>, vector<32x8xf32>,
    %c2_147 = arith.constant 2 : index
    %c0_148 = arith.constant 0 : index
    %137 = vector.load %arg13[%c2_147, %c0_148] : memref<42x8xf32, #tpu.memory_space<vmem>>, vector<32x8xf32>
    %c0_149 = arith.constant 0 : index
    %c2_150 = arith.constant 2 : index
    %138 = vector.load %arg1[%c0_149, %c2_150] : memref<32x9xf32, #tpu.memory_space<vmem>>, vector<32x1xf32>
    %139 = vector.broadcast %138 : vector<32x1xf32> to vector<32x8xf32>
    %140 = arith.mulf %137, %139 : vector<32x8xf32>
    %c0_151 = arith.constant 0 : index
    %c16_152 = arith.constant 16 : index
    %141 = vector.load %arg14[%c0_151, %c16_152] : memref<32x72xf32, #tpu.memory_space<vmem>>, vector<32x8xf32>
    tpu.vector_store %arg14[%c0_151, %c16_152], %140 {strides = array<i32>} : memref<32x72xf32, #tpu.memory_space<vmem>>, vector<32x8xf32>,
    %c4_153 = arith.constant 4 : index
    %c0_154 = arith.constant 0 : index
    %142 = vector.load %arg13[%c4_153, %c0_154] : memref<42x8xf32, #tpu.memory_space<vmem>>, vector<32x8xf32>
    %c0_155 = arith.constant 0 : index
    %c3_156 = arith.constant 3 : index
    %143 = vector.load %arg1[%c0_155, %c3_156] : memref<32x9xf32, #tpu.memory_space<vmem>>, vector<32x1xf32>
    %144 = vector.broadcast %143 : vector<32x1xf32> to vector<32x8xf32>
    %145 = arith.mulf %142, %144 : vector<32x8xf32>
    %c0_157 = arith.constant 0 : index
    %c24_158 = arith.constant 24 : index
    %146 = vector.load %arg14[%c0_157, %c24_158] : memref<32x72xf32, #tpu.memory_space<vmem>>, vector<32x8xf32>
    tpu.vector_store %arg14[%c0_157, %c24_158], %145 {strides = array<i32>} : memref<32x72xf32, #tpu.memory_space<vmem>>, vector<32x8xf32>,
    %c5_159 = arith.constant 5 : index
    %c0_160 = arith.constant 0 : index
    %147 = vector.load %arg13[%c5_159, %c0_160] : memref<42x8xf32, #tpu.memory_space<vmem>>, vector<32x8xf32>
    %c0_161 = arith.constant 0 : index
    %c4_162 = arith.constant 4 : index
    %148 = vector.load %arg1[%c0_161, %c4_162] : memref<32x9xf32, #tpu.memory_space<vmem>>, vector<32x1xf32>
    %149 = vector.broadcast %148 : vector<32x1xf32> to vector<32x8xf32>
    %150 = arith.mulf %147, %149 : vector<32x8xf32>
    %c0_163 = arith.constant 0 : index
    %c32_164 = arith.constant 32 : index
    %151 = vector.load %arg14[%c0_163, %c32_164] : memref<32x72xf32, #tpu.memory_space<vmem>>, vector<32x8xf32>
    tpu.vector_store %arg14[%c0_163, %c32_164], %150 {strides = array<i32>} : memref<32x72xf32, #tpu.memory_space<vmem>>, vector<32x8xf32>,
    %c6_165 = arith.constant 6 : index
    %c0_166 = arith.constant 0 : index
    %152 = vector.load %arg13[%c6_165, %c0_166] : memref<42x8xf32, #tpu.memory_space<vmem>>, vector<32x8xf32>
    %c0_167 = arith.constant 0 : index
    %c5_168 = arith.constant 5 : index
    %153 = vector.load %arg1[%c0_167, %c5_168] : memref<32x9xf32, #tpu.memory_space<vmem>>, vector<32x1xf32>
    %154 = vector.broadcast %153 : vector<32x1xf32> to vector<32x8xf32>
    %155 = arith.mulf %152, %154 : vector<32x8xf32>
    %c0_169 = arith.constant 0 : index
    %c40_170 = arith.constant 40 : index
    %156 = vector.load %arg14[%c0_169, %c40_170] : memref<32x72xf32, #tpu.memory_space<vmem>>, vector<32x8xf32>
    tpu.vector_store %arg14[%c0_169, %c40_170], %155 {strides = array<i32>} : memref<32x72xf32, #tpu.memory_space<vmem>>, vector<32x8xf32>,
    %c8_171 = arith.constant 8 : index
    %c0_172 = arith.constant 0 : index
    %157 = vector.load %arg13[%c8_171, %c0_172] : memref<42x8xf32, #tpu.memory_space<vmem>>, vector<32x8xf32>
    %c0_173 = arith.constant 0 : index
    %c6_174 = arith.constant 6 : index
    %158 = vector.load %arg1[%c0_173, %c6_174] : memref<32x9xf32, #tpu.memory_space<vmem>>, vector<32x1xf32>
    %159 = vector.broadcast %158 : vector<32x1xf32> to vector<32x8xf32>
    %160 = arith.mulf %157, %159 : vector<32x8xf32>
    %c0_175 = arith.constant 0 : index
    %c48_176 = arith.constant 48 : index
    %161 = vector.load %arg14[%c0_175, %c48_176] : memref<32x72xf32, #tpu.memory_space<vmem>>, vector<32x8xf32>
    tpu.vector_store %arg14[%c0_175, %c48_176], %160 {strides = array<i32>} : memref<32x72xf32, #tpu.memory_space<vmem>>, vector<32x8xf32>,
    %c9_177 = arith.constant 9 : index
    %c0_178 = arith.constant 0 : index
    %162 = vector.load %arg13[%c9_177, %c0_178] : memref<42x8xf32, #tpu.memory_space<vmem>>, vector<32x8xf32>
    %c0_179 = arith.constant 0 : index
    %c7_180 = arith.constant 7 : index
    %163 = vector.load %arg1[%c0_179, %c7_180] : memref<32x9xf32, #tpu.memory_space<vmem>>, vector<32x1xf32>
    %164 = vector.broadcast %163 : vector<32x1xf32> to vector<32x8xf32>
    %165 = arith.mulf %162, %164 : vector<32x8xf32>
    %c0_181 = arith.constant 0 : index
    %c56_182 = arith.constant 56 : index
    %166 = vector.load %arg14[%c0_181, %c56_182] : memref<32x72xf32, #tpu.memory_space<vmem>>, vector<32x8xf32>
    tpu.vector_store %arg14[%c0_181, %c56_182], %165 {strides = array<i32>} : memref<32x72xf32, #tpu.memory_space<vmem>>, vector<32x8xf32>,
    %c10_183 = arith.constant 10 : index
    %c0_184 = arith.constant 0 : index
    %167 = vector.load %arg13[%c10_183, %c0_184] : memref<42x8xf32, #tpu.memory_space<vmem>>, vector<32x8xf32>
    %c0_185 = arith.constant 0 : index
    %c8_186 = arith.constant 8 : index
    %168 = vector.load %arg1[%c0_185, %c8_186] : memref<32x9xf32, #tpu.memory_space<vmem>>, vector<32x1xf32>
    %169 = vector.broadcast %168 : vector<32x1xf32> to vector<32x8xf32>
    %170 = arith.mulf %167, %169 : vector<32x8xf32>
    %c0_187 = arith.constant 0 : index
    %c64_188 = arith.constant 64 : index
    %171 = vector.load %arg14[%c0_187, %c64_188] : memref<32x72xf32, #tpu.memory_space<vmem>>, vector<32x8xf32>
    tpu.vector_store %arg14[%c0_187, %c64_188], %170 {strides = array<i32>} : memref<32x72xf32, #tpu.memory_space<vmem>>, vector<32x8xf32>,
    %c0_189 = arith.constant 0 : index
    %c0_190 = arith.constant 0 : index
    %172 = vector.load %arg14[%c0_189, %c0_190] : memref<32x72xf32, #tpu.memory_space<vmem>>, vector<32x72xf32>
    %cst_191 = arith.constant dense<0.000000e+00> : vector<32x8xf32>
    %173 = tpu.matmul %172, %121, %cst_191 {dimension_numbers = #tpu.dot_dimension_numbers<[1], [0], [0], [1], [0, 0, 1, 1], [], []>} : vector<32x72xf32>, vector<72x8xf32>, vector<32x8xf32> -> vector<32x8xf32>
    %174 = vector.broadcast %123 : vector<1x8xf32> to vector<32x8xf32>
    %175 = arith.mulf %173, %174 : vector<32x8xf32>
    %176 = vector.broadcast %125 : vector<1x8xf32> to vector<32x8xf32>
    %177 = arith.addf %175, %176 : vector<32x8xf32>
    %178 = arith.addf %177, %59 : vector<32x8xf32>
    %cst_192 = arith.constant 0.000000e+00 : f32
    %179 = vector.broadcast %cst_192 : f32 to vector<32x8xf32>
    %180 = arith.maximumf %178, %179 : vector<32x8xf32>
    %c1_193 = arith.constant 1 : index
    %c0_194 = arith.constant 0 : index
    %c0_195 = arith.constant 0 : index
    %c0_196 = arith.constant 0 : index
    %181 = vector.load %arg5[%c1_193, %c0_194, %c0_195, %c0_196] : memref<2x2x72x8xf32, #tpu.memory_space<vmem>>, vector<1x1x72x8xf32>
    %182 = vector.shape_cast %181 : vector<1x1x72x8xf32> to vector<72x8xf32>
    %c1_197 = arith.constant 1 : index
    %c0_198 = arith.constant 0 : index
    %c0_199 = arith.constant 0 : index
    %c0_200 = arith.constant 0 : index
    %183 = vector.load %arg6[%c1_197, %c0_198, %c0_199, %c0_200] : memref<2x2x1x8xf32, #tpu.memory_space<vmem>>, vector<1x1x1x8xf32>
    %184 = vector.shape_cast %183 : vector<1x1x1x8xf32> to vector<1x8xf32>
    %c1_201 = arith.constant 1 : index
    %c0_202 = arith.constant 0 : index
    %c0_203 = arith.constant 0 : index
    %c0_204 = arith.constant 0 : index
    %185 = vector.load %arg7[%c1_201, %c0_202, %c0_203, %c0_204] : memref<2x2x1x8xf32, #tpu.memory_space<vmem>>, vector<1x1x1x8xf32>
    %186 = vector.shape_cast %185 : vector<1x1x1x8xf32> to vector<1x8xf32>
    %c5_205 = arith.constant 5 : index
    %c0_206 = arith.constant 0 : index
    %187 = vector.load %arg13[%c5_205, %c0_206] : memref<42x8xf32, #tpu.memory_space<vmem>>, vector<32x8xf32>
    tpu.vector_store %arg13[%c5_205, %c0_206], %180 {strides = array<i32>} : memref<42x8xf32, #tpu.memory_space<vmem>>, vector<32x8xf32>,
    %c0_207 = arith.constant 0 : index
    %c0_208 = arith.constant 0 : index
    %188 = vector.load %arg13[%c0_207, %c0_208] : memref<42x8xf32, #tpu.memory_space<vmem>>, vector<32x8xf32>
    %c0_209 = arith.constant 0 : index
    %c0_210 = arith.constant 0 : index
    %189 = vector.load %arg1[%c0_209, %c0_210] : memref<32x9xf32, #tpu.memory_space<vmem>>, vector<32x1xf32>
    %190 = vector.broadcast %189 : vector<32x1xf32> to vector<32x8xf32>
    %191 = arith.mulf %188, %190 : vector<32x8xf32>
    %c0_211 = arith.constant 0 : index
    %c0_212 = arith.constant 0 : index
    %192 = vector.load %arg14[%c0_211, %c0_212] : memref<32x72xf32, #tpu.memory_space<vmem>>, vector<32x8xf32>
    tpu.vector_store %arg14[%c0_211, %c0_212], %191 {strides = array<i32>} : memref<32x72xf32, #tpu.memory_space<vmem>>, vector<32x8xf32>,
    %c1_213 = arith.constant 1 : index
    %c0_214 = arith.constant 0 : index
    %193 = vector.load %arg13[%c1_213, %c0_214] : memref<42x8xf32, #tpu.memory_space<vmem>>, vector<32x8xf32>
    %c0_215 = arith.constant 0 : index
    %c1_216 = arith.constant 1 : index
    %194 = vector.load %arg1[%c0_215, %c1_216] : memref<32x9xf32, #tpu.memory_space<vmem>>, vector<32x1xf32>
    %195 = vector.broadcast %194 : vector<32x1xf32> to vector<32x8xf32>
    %196 = arith.mulf %193, %195 : vector<32x8xf32>
    %c0_217 = arith.constant 0 : index
    %c8_218 = arith.constant 8 : index
    %197 = vector.load %arg14[%c0_217, %c8_218] : memref<32x72xf32, #tpu.memory_space<vmem>>, vector<32x8xf32>
    tpu.vector_store %arg14[%c0_217, %c8_218], %196 {strides = array<i32>} : memref<32x72xf32, #tpu.memory_space<vmem>>, vector<32x8xf32>,
    %c2_219 = arith.constant 2 : index
    %c0_220 = arith.constant 0 : index
    %198 = vector.load %arg13[%c2_219, %c0_220] : memref<42x8xf32, #tpu.memory_space<vmem>>, vector<32x8xf32>
    %c0_221 = arith.constant 0 : index
    %c2_222 = arith.constant 2 : index
    %199 = vector.load %arg1[%c0_221, %c2_222] : memref<32x9xf32, #tpu.memory_space<vmem>>, vector<32x1xf32>
    %200 = vector.broadcast %199 : vector<32x1xf32> to vector<32x8xf32>
    %201 = arith.mulf %198, %200 : vector<32x8xf32>
    %c0_223 = arith.constant 0 : index
    %c16_224 = arith.constant 16 : index
    %202 = vector.load %arg14[%c0_223, %c16_224] : memref<32x72xf32, #tpu.memory_space<vmem>>, vector<32x8xf32>
    tpu.vector_store %arg14[%c0_223, %c16_224], %201 {strides = array<i32>} : memref<32x72xf32, #tpu.memory_space<vmem>>, vector<32x8xf32>,
    %c4_225 = arith.constant 4 : index
    %c0_226 = arith.constant 0 : index
    %203 = vector.load %arg13[%c4_225, %c0_226] : memref<42x8xf32, #tpu.memory_space<vmem>>, vector<32x8xf32>
    %c0_227 = arith.constant 0 : index
    %c3_228 = arith.constant 3 : index
    %204 = vector.load %arg1[%c0_227, %c3_228] : memref<32x9xf32, #tpu.memory_space<vmem>>, vector<32x1xf32>
    %205 = vector.broadcast %204 : vector<32x1xf32> to vector<32x8xf32>
    %206 = arith.mulf %203, %205 : vector<32x8xf32>
    %c0_229 = arith.constant 0 : index
    %c24_230 = arith.constant 24 : index
    %207 = vector.load %arg14[%c0_229, %c24_230] : memref<32x72xf32, #tpu.memory_space<vmem>>, vector<32x8xf32>
    tpu.vector_store %arg14[%c0_229, %c24_230], %206 {strides = array<i32>} : memref<32x72xf32, #tpu.memory_space<vmem>>, vector<32x8xf32>,
    %c5_231 = arith.constant 5 : index
    %c0_232 = arith.constant 0 : index
    %208 = vector.load %arg13[%c5_231, %c0_232] : memref<42x8xf32, #tpu.memory_space<vmem>>, vector<32x8xf32>
    %c0_233 = arith.constant 0 : index
    %c4_234 = arith.constant 4 : index
    %209 = vector.load %arg1[%c0_233, %c4_234] : memref<32x9xf32, #tpu.memory_space<vmem>>, vector<32x1xf32>
    %210 = vector.broadcast %209 : vector<32x1xf32> to vector<32x8xf32>
    %211 = arith.mulf %208, %210 : vector<32x8xf32>
    %c0_235 = arith.constant 0 : index
    %c32_236 = arith.constant 32 : index
    %212 = vector.load %arg14[%c0_235, %c32_236] : memref<32x72xf32, #tpu.memory_space<vmem>>, vector<32x8xf32>
    tpu.vector_store %arg14[%c0_235, %c32_236], %211 {strides = array<i32>} : memref<32x72xf32, #tpu.memory_space<vmem>>, vector<32x8xf32>,
    %c6_237 = arith.constant 6 : index
    %c0_238 = arith.constant 0 : index
    %213 = vector.load %arg13[%c6_237, %c0_238] : memref<42x8xf32, #tpu.memory_space<vmem>>, vector<32x8xf32>
    %c0_239 = arith.constant 0 : index
    %c5_240 = arith.constant 5 : index
    %214 = vector.load %arg1[%c0_239, %c5_240] : memref<32x9xf32, #tpu.memory_space<vmem>>, vector<32x1xf32>
    %215 = vector.broadcast %214 : vector<32x1xf32> to vector<32x8xf32>
    %216 = arith.mulf %213, %215 : vector<32x8xf32>
    %c0_241 = arith.constant 0 : index
    %c40_242 = arith.constant 40 : index
    %217 = vector.load %arg14[%c0_241, %c40_242] : memref<32x72xf32, #tpu.memory_space<vmem>>, vector<32x8xf32>
    tpu.vector_store %arg14[%c0_241, %c40_242], %216 {strides = array<i32>} : memref<32x72xf32, #tpu.memory_space<vmem>>, vector<32x8xf32>,
    %c8_243 = arith.constant 8 : index
    %c0_244 = arith.constant 0 : index
    %218 = vector.load %arg13[%c8_243, %c0_244] : memref<42x8xf32, #tpu.memory_space<vmem>>, vector<32x8xf32>
    %c0_245 = arith.constant 0 : index
    %c6_246 = arith.constant 6 : index
    %219 = vector.load %arg1[%c0_245, %c6_246] : memref<32x9xf32, #tpu.memory_space<vmem>>, vector<32x1xf32>
    %220 = vector.broadcast %219 : vector<32x1xf32> to vector<32x8xf32>
    %221 = arith.mulf %218, %220 : vector<32x8xf32>
    %c0_247 = arith.constant 0 : index
    %c48_248 = arith.constant 48 : index
    %222 = vector.load %arg14[%c0_247, %c48_248] : memref<32x72xf32, #tpu.memory_space<vmem>>, vector<32x8xf32>
    tpu.vector_store %arg14[%c0_247, %c48_248], %221 {strides = array<i32>} : memref<32x72xf32, #tpu.memory_space<vmem>>, vector<32x8xf32>,
    %c9_249 = arith.constant 9 : index
    %c0_250 = arith.constant 0 : index
    %223 = vector.load %arg13[%c9_249, %c0_250] : memref<42x8xf32, #tpu.memory_space<vmem>>, vector<32x8xf32>
    %c0_251 = arith.constant 0 : index
    %c7_252 = arith.constant 7 : index
    %224 = vector.load %arg1[%c0_251, %c7_252] : memref<32x9xf32, #tpu.memory_space<vmem>>, vector<32x1xf32>
    %225 = vector.broadcast %224 : vector<32x1xf32> to vector<32x8xf32>
    %226 = arith.mulf %223, %225 : vector<32x8xf32>
    %c0_253 = arith.constant 0 : index
    %c56_254 = arith.constant 56 : index
    %227 = vector.load %arg14[%c0_253, %c56_254] : memref<32x72xf32, #tpu.memory_space<vmem>>, vector<32x8xf32>
    tpu.vector_store %arg14[%c0_253, %c56_254], %226 {strides = array<i32>} : memref<32x72xf32, #tpu.memory_space<vmem>>, vector<32x8xf32>,
    %c10_255 = arith.constant 10 : index
    %c0_256 = arith.constant 0 : index
    %228 = vector.load %arg13[%c10_255, %c0_256] : memref<42x8xf32, #tpu.memory_space<vmem>>, vector<32x8xf32>
    %c0_257 = arith.constant 0 : index
    %c8_258 = arith.constant 8 : index
    %229 = vector.load %arg1[%c0_257, %c8_258] : memref<32x9xf32, #tpu.memory_space<vmem>>, vector<32x1xf32>
    %230 = vector.broadcast %229 : vector<32x1xf32> to vector<32x8xf32>
    %231 = arith.mulf %228, %230 : vector<32x8xf32>
    %c0_259 = arith.constant 0 : index
    %c64_260 = arith.constant 64 : index
    %232 = vector.load %arg14[%c0_259, %c64_260] : memref<32x72xf32, #tpu.memory_space<vmem>>, vector<32x8xf32>
    tpu.vector_store %arg14[%c0_259, %c64_260], %231 {strides = array<i32>} : memref<32x72xf32, #tpu.memory_space<vmem>>, vector<32x8xf32>,
    %c0_261 = arith.constant 0 : index
    %c0_262 = arith.constant 0 : index
    %233 = vector.load %arg14[%c0_261, %c0_262] : memref<32x72xf32, #tpu.memory_space<vmem>>, vector<32x72xf32>
    %cst_263 = arith.constant dense<0.000000e+00> : vector<32x8xf32>
    %234 = tpu.matmul %233, %182, %cst_263 {dimension_numbers = #tpu.dot_dimension_numbers<[1], [0], [0], [1], [0, 0, 1, 1], [], []>} : vector<32x72xf32>, vector<72x8xf32>, vector<32x8xf32> -> vector<32x8xf32>
    %235 = vector.broadcast %184 : vector<1x8xf32> to vector<32x8xf32>
    %236 = arith.mulf %234, %235 : vector<32x8xf32>
    %237 = vector.broadcast %186 : vector<1x8xf32> to vector<32x8xf32>
    %238 = arith.addf %236, %237 : vector<32x8xf32>
    %cst_264 = arith.constant 0.000000e+00 : f32
    %239 = vector.broadcast %cst_264 : f32 to vector<32x8xf32>
    %240 = arith.maximumf %238, %239 : vector<32x8xf32>
    %c1_265 = arith.constant 1 : index
    %c1_266 = arith.constant 1 : index
    %c0_267 = arith.constant 0 : index
    %c0_268 = arith.constant 0 : index
    %241 = vector.load %arg5[%c1_265, %c1_266, %c0_267, %c0_268] : memref<2x2x72x8xf32, #tpu.memory_space<vmem>>, vector<1x1x72x8xf32>
    %242 = vector.shape_cast %241 : vector<1x1x72x8xf32> to vector<72x8xf32>
    %c1_269 = arith.constant 1 : index
    %c1_270 = arith.constant 1 : index
    %c0_271 = arith.constant 0 : index
    %c0_272 = arith.constant 0 : index
    %243 = vector.load %arg6[%c1_269, %c1_270, %c0_271, %c0_272] : memref<2x2x1x8xf32, #tpu.memory_space<vmem>>, vector<1x1x1x8xf32>
    %244 = vector.shape_cast %243 : vector<1x1x1x8xf32> to vector<1x8xf32>
    %c1_273 = arith.constant 1 : index
    %c1_274 = arith.constant 1 : index
    %c0_275 = arith.constant 0 : index
    %c0_276 = arith.constant 0 : index
    %245 = vector.load %arg7[%c1_273, %c1_274, %c0_275, %c0_276] : memref<2x2x1x8xf32, #tpu.memory_space<vmem>>, vector<1x1x1x8xf32>
    %246 = vector.shape_cast %245 : vector<1x1x1x8xf32> to vector<1x8xf32>
    %c5_277 = arith.constant 5 : index
    %c0_278 = arith.constant 0 : index
    %247 = vector.load %arg13[%c5_277, %c0_278] : memref<42x8xf32, #tpu.memory_space<vmem>>, vector<32x8xf32>
    tpu.vector_store %arg13[%c5_277, %c0_278], %240 {strides = array<i32>} : memref<42x8xf32, #tpu.memory_space<vmem>>, vector<32x8xf32>,
    %c0_279 = arith.constant 0 : index
    %c0_280 = arith.constant 0 : index
    %248 = vector.load %arg13[%c0_279, %c0_280] : memref<42x8xf32, #tpu.memory_space<vmem>>, vector<32x8xf32>
    %c0_281 = arith.constant 0 : index
    %c0_282 = arith.constant 0 : index
    %249 = vector.load %arg1[%c0_281, %c0_282] : memref<32x9xf32, #tpu.memory_space<vmem>>, vector<32x1xf32>
    %250 = vector.broadcast %249 : vector<32x1xf32> to vector<32x8xf32>
    %251 = arith.mulf %248, %250 : vector<32x8xf32>
    %c0_283 = arith.constant 0 : index
    %c0_284 = arith.constant 0 : index
    %252 = vector.load %arg14[%c0_283, %c0_284] : memref<32x72xf32, #tpu.memory_space<vmem>>, vector<32x8xf32>
    tpu.vector_store %arg14[%c0_283, %c0_284], %251 {strides = array<i32>} : memref<32x72xf32, #tpu.memory_space<vmem>>, vector<32x8xf32>,
    %c1_285 = arith.constant 1 : index
    %c0_286 = arith.constant 0 : index
    %253 = vector.load %arg13[%c1_285, %c0_286] : memref<42x8xf32, #tpu.memory_space<vmem>>, vector<32x8xf32>
    %c0_287 = arith.constant 0 : index
    %c1_288 = arith.constant 1 : index
    %254 = vector.load %arg1[%c0_287, %c1_288] : memref<32x9xf32, #tpu.memory_space<vmem>>, vector<32x1xf32>
    %255 = vector.broadcast %254 : vector<32x1xf32> to vector<32x8xf32>
    %256 = arith.mulf %253, %255 : vector<32x8xf32>
    %c0_289 = arith.constant 0 : index
    %c8_290 = arith.constant 8 : index
    %257 = vector.load %arg14[%c0_289, %c8_290] : memref<32x72xf32, #tpu.memory_space<vmem>>, vector<32x8xf32>
    tpu.vector_store %arg14[%c0_289, %c8_290], %256 {strides = array<i32>} : memref<32x72xf32, #tpu.memory_space<vmem>>, vector<32x8xf32>,
    %c2_291 = arith.constant 2 : index
    %c0_292 = arith.constant 0 : index
    %258 = vector.load %arg13[%c2_291, %c0_292] : memref<42x8xf32, #tpu.memory_space<vmem>>, vector<32x8xf32>
    %c0_293 = arith.constant 0 : index
    %c2_294 = arith.constant 2 : index
    %259 = vector.load %arg1[%c0_293, %c2_294] : memref<32x9xf32, #tpu.memory_space<vmem>>, vector<32x1xf32>
    %260 = vector.broadcast %259 : vector<32x1xf32> to vector<32x8xf32>
    %261 = arith.mulf %258, %260 : vector<32x8xf32>
    %c0_295 = arith.constant 0 : index
    %c16_296 = arith.constant 16 : index
    %262 = vector.load %arg14[%c0_295, %c16_296] : memref<32x72xf32, #tpu.memory_space<vmem>>, vector<32x8xf32>
    tpu.vector_store %arg14[%c0_295, %c16_296], %261 {strides = array<i32>} : memref<32x72xf32, #tpu.memory_space<vmem>>, vector<32x8xf32>,
    %c4_297 = arith.constant 4 : index
    %c0_298 = arith.constant 0 : index
    %263 = vector.load %arg13[%c4_297, %c0_298] : memref<42x8xf32, #tpu.memory_space<vmem>>, vector<32x8xf32>
    %c0_299 = arith.constant 0 : index
    %c3_300 = arith.constant 3 : index
    %264 = vector.load %arg1[%c0_299, %c3_300] : memref<32x9xf32, #tpu.memory_space<vmem>>, vector<32x1xf32>
    %265 = vector.broadcast %264 : vector<32x1xf32> to vector<32x8xf32>
    %266 = arith.mulf %263, %265 : vector<32x8xf32>
    %c0_301 = arith.constant 0 : index
    %c24_302 = arith.constant 24 : index
    %267 = vector.load %arg14[%c0_301, %c24_302] : memref<32x72xf32, #tpu.memory_space<vmem>>, vector<32x8xf32>
    tpu.vector_store %arg14[%c0_301, %c24_302], %266 {strides = array<i32>} : memref<32x72xf32, #tpu.memory_space<vmem>>, vector<32x8xf32>,
    %c5_303 = arith.constant 5 : index
    %c0_304 = arith.constant 0 : index
    %268 = vector.load %arg13[%c5_303, %c0_304] : memref<42x8xf32, #tpu.memory_space<vmem>>, vector<32x8xf32>
    %c0_305 = arith.constant 0 : index
    %c4_306 = arith.constant 4 : index
    %269 = vector.load %arg1[%c0_305, %c4_306] : memref<32x9xf32, #tpu.memory_space<vmem>>, vector<32x1xf32>
    %270 = vector.broadcast %269 : vector<32x1xf32> to vector<32x8xf32>
    %271 = arith.mulf %268, %270 : vector<32x8xf32>
    %c0_307 = arith.constant 0 : index
    %c32_308 = arith.constant 32 : index
    %272 = vector.load %arg14[%c0_307, %c32_308] : memref<32x72xf32, #tpu.memory_space<vmem>>, vector<32x8xf32>
    tpu.vector_store %arg14[%c0_307, %c32_308], %271 {strides = array<i32>} : memref<32x72xf32, #tpu.memory_space<vmem>>, vector<32x8xf32>,
    %c6_309 = arith.constant 6 : index
    %c0_310 = arith.constant 0 : index
    %273 = vector.load %arg13[%c6_309, %c0_310] : memref<42x8xf32, #tpu.memory_space<vmem>>, vector<32x8xf32>
    %c0_311 = arith.constant 0 : index
    %c5_312 = arith.constant 5 : index
    %274 = vector.load %arg1[%c0_311, %c5_312] : memref<32x9xf32, #tpu.memory_space<vmem>>, vector<32x1xf32>
    %275 = vector.broadcast %274 : vector<32x1xf32> to vector<32x8xf32>
    %276 = arith.mulf %273, %275 : vector<32x8xf32>
    %c0_313 = arith.constant 0 : index
    %c40_314 = arith.constant 40 : index
    %277 = vector.load %arg14[%c0_313, %c40_314] : memref<32x72xf32, #tpu.memory_space<vmem>>, vector<32x8xf32>
    tpu.vector_store %arg14[%c0_313, %c40_314], %276 {strides = array<i32>} : memref<32x72xf32, #tpu.memory_space<vmem>>, vector<32x8xf32>,
    %c8_315 = arith.constant 8 : index
    %c0_316 = arith.constant 0 : index
    %278 = vector.load %arg13[%c8_315, %c0_316] : memref<42x8xf32, #tpu.memory_space<vmem>>, vector<32x8xf32>
    %c0_317 = arith.constant 0 : index
    %c6_318 = arith.constant 6 : index
    %279 = vector.load %arg1[%c0_317, %c6_318] : memref<32x9xf32, #tpu.memory_space<vmem>>, vector<32x1xf32>
    %280 = vector.broadcast %279 : vector<32x1xf32> to vector<32x8xf32>
    %281 = arith.mulf %278, %280 : vector<32x8xf32>
    %c0_319 = arith.constant 0 : index
    %c48_320 = arith.constant 48 : index
    %282 = vector.load %arg14[%c0_319, %c48_320] : memref<32x72xf32, #tpu.memory_space<vmem>>, vector<32x8xf32>
    tpu.vector_store %arg14[%c0_319, %c48_320], %281 {strides = array<i32>} : memref<32x72xf32, #tpu.memory_space<vmem>>, vector<32x8xf32>,
    %c9_321 = arith.constant 9 : index
    %c0_322 = arith.constant 0 : index
    %283 = vector.load %arg13[%c9_321, %c0_322] : memref<42x8xf32, #tpu.memory_space<vmem>>, vector<32x8xf32>
    %c0_323 = arith.constant 0 : index
    %c7_324 = arith.constant 7 : index
    %284 = vector.load %arg1[%c0_323, %c7_324] : memref<32x9xf32, #tpu.memory_space<vmem>>, vector<32x1xf32>
    %285 = vector.broadcast %284 : vector<32x1xf32> to vector<32x8xf32>
    %286 = arith.mulf %283, %285 : vector<32x8xf32>
    %c0_325 = arith.constant 0 : index
    %c56_326 = arith.constant 56 : index
    %287 = vector.load %arg14[%c0_325, %c56_326] : memref<32x72xf32, #tpu.memory_space<vmem>>, vector<32x8xf32>
    tpu.vector_store %arg14[%c0_325, %c56_326], %286 {strides = array<i32>} : memref<32x72xf32, #tpu.memory_space<vmem>>, vector<32x8xf32>,
    %c10_327 = arith.constant 10 : index
    %c0_328 = arith.constant 0 : index
    %288 = vector.load %arg13[%c10_327, %c0_328] : memref<42x8xf32, #tpu.memory_space<vmem>>, vector<32x8xf32>
    %c0_329 = arith.constant 0 : index
    %c8_330 = arith.constant 8 : index
    %289 = vector.load %arg1[%c0_329, %c8_330] : memref<32x9xf32, #tpu.memory_space<vmem>>, vector<32x1xf32>
    %290 = vector.broadcast %289 : vector<32x1xf32> to vector<32x8xf32>
    %291 = arith.mulf %288, %290 : vector<32x8xf32>
    %c0_331 = arith.constant 0 : index
    %c64_332 = arith.constant 64 : index
    %292 = vector.load %arg14[%c0_331, %c64_332] : memref<32x72xf32, #tpu.memory_space<vmem>>, vector<32x8xf32>
    tpu.vector_store %arg14[%c0_331, %c64_332], %291 {strides = array<i32>} : memref<32x72xf32, #tpu.memory_space<vmem>>, vector<32x8xf32>,
    %c0_333 = arith.constant 0 : index
    %c0_334 = arith.constant 0 : index
    %293 = vector.load %arg14[%c0_333, %c0_334] : memref<32x72xf32, #tpu.memory_space<vmem>>, vector<32x72xf32>
    %cst_335 = arith.constant dense<0.000000e+00> : vector<32x8xf32>
    %294 = tpu.matmul %293, %242, %cst_335 {dimension_numbers = #tpu.dot_dimension_numbers<[1], [0], [0], [1], [0, 0, 1, 1], [], []>} : vector<32x72xf32>, vector<72x8xf32>, vector<32x8xf32> -> vector<32x8xf32>
    %295 = vector.broadcast %244 : vector<1x8xf32> to vector<32x8xf32>
    %296 = arith.mulf %294, %295 : vector<32x8xf32>
    %297 = vector.broadcast %246 : vector<1x8xf32> to vector<32x8xf32>
    %298 = arith.addf %296, %297 : vector<32x8xf32>
    %299 = arith.addf %298, %180 : vector<32x8xf32>
    %cst_336 = arith.constant 0.000000e+00 : f32
    %300 = vector.broadcast %cst_336 : f32 to vector<32x8xf32>
    %301 = arith.maximumf %299, %300 : vector<32x8xf32>
    %c0_337 = arith.constant 0 : index
    %c0_338 = arith.constant 0 : index
    %302 = vector.load %arg8[%c0_337, %c0_338] : memref<8x3xf32, #tpu.memory_space<vmem>>, vector<8x3xf32>
    %cst_339 = arith.constant dense<0.000000e+00> : vector<32x3xf32>
    %303 = tpu.matmul %301, %302, %cst_339 {dimension_numbers = #tpu.dot_dimension_numbers<[1], [0], [0], [1], [0, 0, 1, 1], [], []>} : vector<32x8xf32>, vector<8x3xf32>, vector<32x3xf32> -> vector<32x3xf32>
    %c0_340 = arith.constant 0 : index
    %c0_341 = arith.constant 0 : index
    %304 = vector.load %arg9[%c0_340, %c0_341] : memref<1x3xf32, #tpu.memory_space<vmem>>, vector<1x3xf32>
    %305 = vector.broadcast %304 : vector<1x3xf32> to vector<32x3xf32>
    %306 = arith.addf %303, %305 : vector<32x3xf32>
    %c0_342 = arith.constant 0 : index
    %c0_343 = arith.constant 0 : index
    %307 = vector.load %arg10[%c0_342, %c0_343] : memref<1x3xf32, #tpu.memory_space<vmem>>, vector<1x3xf32>
    %308 = vector.broadcast %307 : vector<1x3xf32> to vector<32x3xf32>
    %309 = arith.mulf %306, %308 : vector<32x3xf32>
    %c0_344 = arith.constant 0 : index
    %c0_345 = arith.constant 0 : index
    %310 = vector.load %arg11[%c0_344, %c0_345] : memref<1x3xf32, #tpu.memory_space<vmem>>, vector<1x3xf32>
    %311 = vector.broadcast %310 : vector<1x3xf32> to vector<32x3xf32>
    %312 = arith.addf %309, %311 : vector<32x3xf32>
    %cst_346 = arith.constant 0.000000e+00 : f32
    %313 = vector.broadcast %cst_346 : f32 to vector<32x3xf32>
    %314 = arith.maximumf %312, %313 : vector<32x3xf32>
    %c0_347 = arith.constant 0 : index
    %c0_348 = arith.constant 0 : index
    %315 = vector.load %arg12[%c0_347, %c0_348] : memref<32x3xf32, #tpu.memory_space<vmem>>, vector<32x3xf32>
    tpu.vector_store %arg12[%c0_347, %c0_348], %314 {strides = array<i32>} : memref<32x3xf32, #tpu.memory_space<vmem>>, vector<32x3xf32>,
    return
  }
}

module attributes {stable_mosaic.version = 11 : i64} {
  func.func @_head_kernel(%arg0: memref<2x48xf32, #tpu.memory_space<vmem>>, %arg1: memref<2x8xf32, #tpu.memory_space<vmem>>, %arg2: memref<8x8xf32, #tpu.memory_space<vmem>>, %arg3: memref<1x8xf32, #tpu.memory_space<vmem>>, %arg4: memref<48x48xf32, #tpu.memory_space<vmem>>, %arg5: memref<8x48xf32, #tpu.memory_space<vmem>>, %arg6: memref<1x48xf32, #tpu.memory_space<vmem>>, %arg7: memref<2x48xf32, #tpu.memory_space<vmem>>) attributes {dimension_semantics = [], scalar_prefetch = 0 : i64, scratch_operands = 0 : i64, tpu.core_type = #tpu.core_type<tc>} {
    %c0 = arith.constant 0 : index
    %c0_0 = arith.constant 0 : index
    %0 = vector.load %arg1[%c0, %c0_0] : memref<2x8xf32, #tpu.memory_space<vmem>>, vector<2x8xf32>
    %c0_1 = arith.constant 0 : index
    %c0_2 = arith.constant 0 : index
    %1 = vector.load %arg2[%c0_1, %c0_2] : memref<8x8xf32, #tpu.memory_space<vmem>>, vector<8x8xf32>
    %cst = arith.constant dense<0.000000e+00> : vector<2x8xf32>
    %2 = tpu.matmul %0, %1, %cst {dimension_numbers = #tpu.dot_dimension_numbers<[1], [0], [0], [1], [0, 0, 1, 1], [], []>} : vector<2x8xf32>, vector<8x8xf32>, vector<2x8xf32> -> vector<2x8xf32>
    %c0_3 = arith.constant 0 : index
    %c0_4 = arith.constant 0 : index
    %3 = vector.load %arg3[%c0_3, %c0_4] : memref<1x8xf32, #tpu.memory_space<vmem>>, vector<1x8xf32>
    %4 = vector.broadcast %3 : vector<1x8xf32> to vector<2x8xf32>
    %5 = arith.addf %2, %4 : vector<2x8xf32>
    %cst_5 = arith.constant 0.000000e+00 : f32
    %6 = vector.broadcast %cst_5 : f32 to vector<2x8xf32>
    %7 = arith.maximumf %5, %6 : vector<2x8xf32>
    %c0_6 = arith.constant 0 : index
    %c0_7 = arith.constant 0 : index
    %8 = vector.load %arg0[%c0_6, %c0_7] : memref<2x48xf32, #tpu.memory_space<vmem>>, vector<2x48xf32>
    %c0_8 = arith.constant 0 : index
    %c0_9 = arith.constant 0 : index
    %9 = vector.load %arg4[%c0_8, %c0_9] : memref<48x48xf32, #tpu.memory_space<vmem>>, vector<48x48xf32>
    %cst_10 = arith.constant dense<0.000000e+00> : vector<2x48xf32>
    %10 = tpu.matmul %8, %9, %cst_10 {dimension_numbers = #tpu.dot_dimension_numbers<[1], [0], [0], [1], [0, 0, 1, 1], [], []>} : vector<2x48xf32>, vector<48x48xf32>, vector<2x48xf32> -> vector<2x48xf32>
    %c0_11 = arith.constant 0 : index
    %c0_12 = arith.constant 0 : index
    %11 = vector.load %arg5[%c0_11, %c0_12] : memref<8x48xf32, #tpu.memory_space<vmem>>, vector<8x48xf32>
    %cst_13 = arith.constant dense<0.000000e+00> : vector<2x48xf32>
    %12 = tpu.matmul %7, %11, %cst_13 {dimension_numbers = #tpu.dot_dimension_numbers<[1], [0], [0], [1], [0, 0, 1, 1], [], []>} : vector<2x8xf32>, vector<8x48xf32>, vector<2x48xf32> -> vector<2x48xf32>
    %13 = arith.addf %10, %12 : vector<2x48xf32>
    %c0_14 = arith.constant 0 : index
    %c0_15 = arith.constant 0 : index
    %14 = vector.load %arg6[%c0_14, %c0_15] : memref<1x48xf32, #tpu.memory_space<vmem>>, vector<1x48xf32>
    %15 = vector.broadcast %14 : vector<1x48xf32> to vector<2x48xf32>
    %16 = arith.addf %13, %15 : vector<2x48xf32>
    %cst_16 = arith.constant 0.000000e+00 : f32
    %17 = vector.broadcast %cst_16 : f32 to vector<2x48xf32>
    %18 = arith.maximumf %16, %17 : vector<2x48xf32>
    %19 = vector.extract_strided_slice %18 {offsets = [0, 0], sizes = [2, 16], strides = [1, 1]} : vector<2x48xf32> to vector<2x16xf32>
    %cst_17 = arith.constant dense<0xFF800000> : vector<2xf32>
    %20 = vector.multi_reduction <maximumf>, %19, %cst_17 [1] : vector<2x16xf32> to vector<2xf32>
    %21 = vector.shape_cast %20 : vector<2xf32> to vector<2x1xf32>
    %22 = vector.broadcast %21 : vector<2x1xf32> to vector<2x16xf32>
    %23 = arith.subf %19, %22 : vector<2x16xf32>
    %24 = math.exp %23 : vector<2x16xf32>
    %cst_18 = arith.constant dense<0.000000e+00> : vector<2xf32>
    %25 = vector.multi_reduction <add>, %24, %cst_18 [1] : vector<2x16xf32> to vector<2xf32>
    %26 = vector.shape_cast %25 : vector<2xf32> to vector<2x1xf32>
    %27 = tpu.reciprocal %26 : vector<2x1xf32> -> vector<2x1xf32>
    %28 = vector.broadcast %27 : vector<2x1xf32> to vector<2x16xf32>
    %29 = arith.mulf %24, %28 : vector<2x16xf32>
    %c0_19 = arith.constant 0 : index
    %c0_20 = arith.constant 0 : index
    %30 = vector.load %arg7[%c0_19, %c0_20] : memref<2x48xf32, #tpu.memory_space<vmem>>, vector<2x16xf32>
    tpu.vector_store %arg7[%c0_19, %c0_20], %29 {strides = array<i32>} : memref<2x48xf32, #tpu.memory_space<vmem>>, vector<2x16xf32>,
    %31 = vector.extract_strided_slice %18 {offsets = [0, 16], sizes = [2, 16], strides = [1, 1]} : vector<2x48xf32> to vector<2x16xf32>
    %cst_21 = arith.constant dense<0xFF800000> : vector<2xf32>
    %32 = vector.multi_reduction <maximumf>, %31, %cst_21 [1] : vector<2x16xf32> to vector<2xf32>
    %33 = vector.shape_cast %32 : vector<2xf32> to vector<2x1xf32>
    %34 = vector.broadcast %33 : vector<2x1xf32> to vector<2x16xf32>
    %35 = arith.subf %31, %34 : vector<2x16xf32>
    %36 = math.exp %35 : vector<2x16xf32>
    %cst_22 = arith.constant dense<0.000000e+00> : vector<2xf32>
    %37 = vector.multi_reduction <add>, %36, %cst_22 [1] : vector<2x16xf32> to vector<2xf32>
    %38 = vector.shape_cast %37 : vector<2xf32> to vector<2x1xf32>
    %39 = tpu.reciprocal %38 : vector<2x1xf32> -> vector<2x1xf32>
    %40 = vector.broadcast %39 : vector<2x1xf32> to vector<2x16xf32>
    %41 = arith.mulf %36, %40 : vector<2x16xf32>
    %c0_23 = arith.constant 0 : index
    %c16 = arith.constant 16 : index
    %42 = vector.load %arg7[%c0_23, %c16] : memref<2x48xf32, #tpu.memory_space<vmem>>, vector<2x16xf32>
    tpu.vector_store %arg7[%c0_23, %c16], %41 {strides = array<i32>} : memref<2x48xf32, #tpu.memory_space<vmem>>, vector<2x16xf32>,
    %43 = vector.extract_strided_slice %18 {offsets = [0, 32], sizes = [2, 16], strides = [1, 1]} : vector<2x48xf32> to vector<2x16xf32>
    %cst_24 = arith.constant dense<0xFF800000> : vector<2xf32>
    %44 = vector.multi_reduction <maximumf>, %43, %cst_24 [1] : vector<2x16xf32> to vector<2xf32>
    %45 = vector.shape_cast %44 : vector<2xf32> to vector<2x1xf32>
    %46 = vector.broadcast %45 : vector<2x1xf32> to vector<2x16xf32>
    %47 = arith.subf %43, %46 : vector<2x16xf32>
    %48 = math.exp %47 : vector<2x16xf32>
    %cst_25 = arith.constant dense<0.000000e+00> : vector<2xf32>
    %49 = vector.multi_reduction <add>, %48, %cst_25 [1] : vector<2x16xf32> to vector<2xf32>
    %50 = vector.shape_cast %49 : vector<2xf32> to vector<2x1xf32>
    %51 = tpu.reciprocal %50 : vector<2x1xf32> -> vector<2x1xf32>
    %52 = vector.broadcast %51 : vector<2x1xf32> to vector<2x16xf32>
    %53 = arith.mulf %48, %52 : vector<2x16xf32>
    %c0_26 = arith.constant 0 : index
    %c32 = arith.constant 32 : index
    %54 = vector.load %arg7[%c0_26, %c32] : memref<2x48xf32, #tpu.memory_space<vmem>>, vector<2x16xf32>
    tpu.vector_store %arg7[%c0_26, %c32], %53 {strides = array<i32>} : memref<2x48xf32, #tpu.memory_space<vmem>>, vector<2x16xf32>,
    return
  }
}

</mosaic_0001>

<bundles_post_ra>
// kernel: resnet_double_forward.3
= control target key start
LH: loop header
LB: loop body
LE: loop exit
PB: predicated region body
PF: predicated region fallthrough
CT: control target
= control target key end

     0   :  { %vm35_vm0 = vcmask 64512   ;;  %v382_v0 = vmov 0.0   ;;  %vm383_vm1 = vmmov 0   ;;  %vm191_vm2 = vcmask 392192   ;;  %s485_s2 = inlined_call_operand.vmem [shape: f32[8,8], index: 2, kind: input, shape index: {}]   ;;  %s486_s1 = inlined_call_operand.vmem [shape: f32[2,8], index: 1, kind: input, shape index: {}]   ;;  %s487_s4 = inlined_call_operand.vmem [shape: f32[48,48], index: 4, kind: input, shape index: {}]   ;;  %s488_s0 = inlined_call_operand.vmem [shape: f32[2,48], index: 0, kind: input, shape index: {}]   ;;  %s489_s5 = inlined_call_operand.vmem [shape: f32[8,48], index: 5, kind: input, shape index: {}]   ;;  %s490_s3 = inlined_call_operand.vmem [shape: f32[1,8], index: 3, kind: input, shape index: {}]   ;;  %s491_s6 = inlined_call_operand.vmem [shape: f32[1,48], index: 6, kind: input, shape index: {}]   ;;  %s492_s7 = inlined_call_operand.vmem [shape: f32[2,48], index: 7, kind: output, shape index: {}]  }
   0x1   :  { %341 = vmatprep.subr.mxu1 %v382_v0  ;;  %v27_v1 = vld [vmem:[%s485_s2] sm:$0xff]  ;;  %343 = vmatprep.mubr.msk.f32.mxu1 %vm383_vm1, %v382_v0  ;;  %v116_v3 = vld [vmem:[%s487_s4 + $0x28] sm:$0xff]  ;;  %v114_v5 = vld [vmem:[%s487_s4 + $0x18] sm:$0xff]  ;;  %vm287_vm3 = vcmask 255104   ;;  %vm274_vm4 = vcmask 123904   ;;  %vm304_vm5 = vcmask 386304  }
   0x2   :  { %v26_v2 = vld [vmem:[%s486_s1] sm:$0x3]  ;;  %342 = vmatpush3.msra.mxu1 %v27_v1  ;;  %351 = vmatprep.subr.mxu0 %v382_v0  ;;  %v113_v6 = vld [vmem:[%s487_s4 + $0x10] sm:$0xff]  ;;  %v112_v7 = vld [vmem:[%s487_s4 + $0x8] sm:$0xff] }
   0x3   :  { %v115_v4 = vld [vmem:[%s487_s4 + $0x20] sm:$0xff]  ;;  %344 = vmatmul.mubr.msk.f32.vlgmr.msra.gmra.mxu1 %vm35_vm0, %v26_v2  ;;  %352 = vmatpush3.msra.mxu0 %v116_v3 }
   0x4   :  { %353 = vmatprep.subr.mxu0 %v382_v0  ;;  %346 = vmatprep.subr.mxu1 %v382_v0  ;;  %v111_v8 = vld [vmem:[%s487_s4] sm:$0xff] }
   0x5   :  { %354 = vmatpush3.msra.mxu0 %v115_v4  ;;  %363 = vmatprep.mubr.msk.f32.mxu0 %vm383_vm1, %v382_v0  ;;  %v110_v9 = vld [vmem:[%s488_s0] sm:$0x3] }
   0x6   :  { %355 = vmatprep.subr.mxu0 %v382_v0  ;;  %348 = vmatprep.mubr.msk.f32.mxu1 %vm383_vm1, %v382_v0  ;;  %v117_v10 = vld [vmem:[%s489_s5] sm:$0xff]  ;;  %s385_s5 = smov 96  }
   0x7   :  { %356 = vmatpush3.msra.mxu0 %v114_v5  ;;  %347 = vmatpush3.msra.mxu1 %v117_v10  ;;  %v325_v11 = vld [vmem:[%s490_s3] ss:$0 sm:$0xff]  ;;  %s384_s3 = smov 112  }
   0x8   :  { %357 = vmatprep.subr.mxu0 %v382_v0  ;;  %v329_v19 = vld [vmem:[%s491_s6] ss:$0 sm:$0xff] }
   0x9   :  { %358 = vmatpush3.msra.mxu0 %v113_v6 }
   0xa   :  { %359 = vmatprep.subr.mxu0 %v382_v0 }
   0xb   :  { %360 = vmatpush3.msra.mxu0 %v112_v7 }
   0xc   :  { %361 = vmatprep.subr.mxu0 %v382_v0 }
   0xd   :  { %362 = vmatpush3.msra.mxu0 %v111_v8 }
   0xe   :  { %364 = vmatmul.mubr.msk.f32.vlgmr.msra.gmra.mxu0 %vm191_vm2, %v110_v9 }
  0xc3   :  { %v105_v12 = vpop.f32.mrf.mxu1 }
  0xc4   :  { %v106_v13 = vadd.f32 %v325_v11, %v105_v12 }
  0xc5   :  { %v345_v14 = vpop.f32.mrf.mxu1 }
  0xc6   :  { %v109_v15 = vmax.f32 %v106_v13, 0.0 }
  0xc8   :  { %349 = vmatmul.mubr.msk.f32.vlgmr.msra.gmra.mxu1 %vm35_vm0, %v109_v15 }
  0xce   :  { %v261_v16 = vpop.f32.mrf.mxu0 }
  0xd0   :  { %v365_v17 = vpop.f32.mrf.mxu0 }
 0x188   :  { %v187_v18 = vpop.f32.mrf.mxu1 }
 0x189   :  { %v262_v20 = vadd.f32 %v261_v16, %v187_v18 }
 0x18a   :  { %v350_v21 = vpop.f32.mrf.mxu1 }
 0x18b   :  { %v272_v22 = vadd.f32 %v329_v19, %v262_v20 }
 0x18d   :  { %v273_v23 = vmax.f32 %v272_v22, 0.0 }
 0x18f   :  { %v288_v24 = vsel %vm287_vm3, %v273_v23, -inf  ;;  %v275_v25 = vsel %vm274_vm4, %v273_v23, -inf  ;;  %v305_v26 = vsel %vm304_vm5, %v273_v23, -inf }
 0x190   :  { %289 = vmax.xlane.f32.xlu0 %v288_v24  ;;  %276 = vmax.xlane.f32.xlu1 %v275_v25 }
 0x194   :  { %306 = vmax.xlane.f32.xlu0 %v305_v26 }
 0x219   :  { %v290_v27 = vpop.xlane.xlu0 %289  ;;  %v277_v35 = vpop.xlane.xlu1 %276 }
 0x21a   :  { %v291_v28 = vsub.f32 %v273_v23, %v290_v27  ;;  %v278_v36 = vsub.f32 %v273_v23, %v277_v35 }
 0x21c   :  { %v292_v29 = vmul.f32 1.442695, %v291_v28  ;;  %v279_v37 = vmul.f32 1.442695, %v278_v36 }
 0x21d   :  { %v307_v30 = vpop.xlane.xlu0 %306 }
 0x21e   :  { %370 = vpow2.f32 %v292_v29  ;;  %v308_v31 = vsub.f32 %v273_v23, %v307_v30 }
 0x220   :  { %v309_v32 = vmul.f32 1.442695, %v308_v31 }
 0x222   :  { %372 = vpow2.f32 %v309_v32 }
 0x223   :  { %374 = vpow2.f32 %v279_v37 }
 0x22b   :  { %v371_v33 = vpop.eup %370 }
 0x22c   :  { %295 = vrot.lane.b32.xlu1 %v371_v33, %s384_s3 }
 0x22f   :  { %v373_v34 = vpop.eup %372 }
 0x230   :  { %312 = vrot.lane.b32.xlu0 %v373_v34, %s385_s5  ;;  %v375_v38 = vpop.eup %374 }
 0x231   :  { %v281_v39 = vsel %vm274_vm4, %v375_v38, 0.0 }
 0x250   :  { %282 = vadd.xlane.f32.xlu1 %v281_v39 }
 0x29e   :  { %v296_v40 = vpop.permute.xlu1 %295 }
 0x29f   :  { %v298_v41 = vsel %vm274_vm4, %v296_v40, 0.0 }
 0x2a0   :  { %299 = vadd.xlane.f32.xlu0 %v298_v41 }
 0x2a2   :  { %v313_v42 = vpop.permute.xlu0 %312 }
 0x2a3   :  { %v315_v43 = vsel %vm274_vm4, %v313_v42, 0.0 }
 0x2a4   :  { %316 = vadd.xlane.f32.xlu1 %v315_v43 }
 0x2d9   :  { %v283_v44 = vpop.xlane.xlu1 %282 }
 0x2da   :  { %376 = vrcp.f32 %v283_v44 }
 0x2e7   :  { %v377_v45 = vpop.eup %376 }
 0x2e8   :  { %v285_v46 = vmul.f32 %v377_v45, %v375_v38 }
 0x2ea   :  { %286 = vst.msk [vmem:[%s492_s7] sm:$0x3] %vm274_vm4, %v285_v46 }
 0x329   :  { %v300_v47 = vpop.xlane.xlu0 %299 }
 0x32a   :  { %378 = vrcp.f32 %v300_v47 }
 0x32d   :  { %v317_v48 = vpop.xlane.xlu1 %316 }
 0x32e   :  { %380 = vrcp.f32 %v317_v48 }
 0x337   :  { %v379_v49 = vpop.eup %378 }
 0x338   :  { %v302_v50 = vmul.f32 %v379_v49, %v371_v33 }
 0x33a   :  { %303 = vst.msk [vmem:[%s492_s7] sm:$0x3] %vm287_vm3, %v302_v50 }
 0x33b   :  { %v381_v51 = vpop.eup %380 }
 0x33c   :  { %v319_v52 = vmul.f32 %v381_v51, %v373_v34 }
 0x33e   :  { %320 = vst.msk [vmem:[%s492_s7] sm:$0x3] %vm304_vm5, %v319_v52 }

// kernel: resnet_double_forward.2
= control target key start
LH: loop header
LB: loop body
LE: loop exit
PB: predicated region body
PF: predicated region fallthrough
CT: control target
= control target key end

     0   :  { %v3593_v0 = vmov 2   ;;  %v5128_v1 = vmov 1   ;;  %vm41_vm0 = vcmask 64512   ;;  %v3595_v5 = vmov 0.0   ;;  %s3603_s18 = smov 4   ;;  %s3604_s19 = smov 8   ;;  %s5109_s1 = inlined_call_operand.vmem [shape: f32[32,9], index: 1, kind: input, shape index: {}]   ;;  %s5110_s0 = inlined_call_operand.vmem [shape: f32[32,4], index: 0, kind: input, shape index: {}]   ;;  %s5111_s2 = inlined_call_operand.vmem [shape: f32[36,8], index: 2, kind: input, shape index: {}]   ;;  %s5112_s3 = inlined_call_operand.vmem [shape: f32[1,8], index: 3, kind: input, shape index: {}]   ;;  %s5113_s4 = inlined_call_operand.vmem [shape: f32[1,8], index: 4, kind: input, shape index: {}]   ;;  %s5114_s5 = inlined_call_operand.vmem [shape: f32[2,2,72,8], index: 5, kind: input, shape index: {}]   ;;  %s5115_s6 = inlined_call_operand.vmem [shape: f32[2,2,1,8], index: 6, kind: input, shape index: {}]   ;;  %s5116_s7 = inlined_call_operand.vmem [shape: f32[2,2,1,8], index: 7, kind: input, shape index: {}]   ;;  %s5117_s8 = inlined_call_operand.vmem [shape: f32[8,3], index: 8, kind: input, shape index: {}]   ;;  %s5118_s9 = inlined_call_operand.vmem [shape: f32[1,3], index: 9, kind: input, shape index: {}]   ;;  %s5119_s10 = inlined_call_operand.vmem [shape: f32[1,3], index: 10, kind: input, shape index: {}]   ;;  %s5120_s11 = inlined_call_operand.vmem [shape: f32[1,3], index: 11, kind: input, shape index: {}]   ;;  %s5121_s12 = inlined_call_operand.vmem [shape: f32[32,3], index: 12, kind: output, shape index: {}]  }
   0x1   :  { %3469 = vset.pattern.permute.xlu1 %v3593_v0  ;;  %3468 = vset.pattern.permute.xlu0 %v5128_v1  ;;  %v3685_v2 = vld [vmem:[%s5109_s1] sm:$0xff]  ;;  %v3692_v3 = vld [vmem:[%s5109_s1 + $0x8] sm:$0xff]  ;;  %42 = vst.msk [vmem:[#allocation2] sm:$0xff] %vm41_vm0, %v3595_v5  ;;  %43 = vst.msk [vmem:[#allocation2 + $0x8] sm:$0xff] %vm41_vm0, %v3595_v5  ;;  %vm60_vm1 = vcmask 31744   ;;  %v3596_v10 = vmov 3  }
   0x2   :  { %164 = vperm.xlu1 %3469, %v3685_v2   ;;  %111 = vperm.xlu0 %3468, %v3685_v2   ;;  %v49_v4 = vld [vmem:[%s5110_s0] sm:$0xff]  ;;  %44 = vst.msk [vmem:[#allocation2 + $0x10] sm:$0xff] %vm41_vm0, %v3595_v5  ;;  %45 = vst.msk [vmem:[#allocation2 + $0x18] sm:$0xff] %vm41_vm0, %v3595_v5  ;;  %v50_v6 = vld [vmem:[%s5110_s0 + $0x8] sm:$0xff]  ;;  %v5140_v12 = vmov 4   ;;  %v5136_v13 = vmov 5  }
   0x3   :  { %46 = vst.msk [vmem:[#allocation2 + $0x20] sm:$0xff] %vm41_vm0, %v3595_v5  ;;  %v51_v7 = vld [vmem:[%s5110_s0 + $0x10] sm:$0xff]  ;;  %v52_v8 = vld [vmem:[%s5110_s0 + $0x18] sm:$0xff]  ;;  %v5134_v14 = vmov 6   ;;  %v5132_v15 = vmov 7   ;;  %vm47_vm2 = vcmask 58368  }
   0x4   :  { %61 = vst.msk [vmem:[#allocation2 + $0x5] sm:$0xff] %vm60_vm1, %v49_v4  ;;  %62 = vst.msk [vmem:[#allocation2 + $0xd] sm:$0xff] %vm60_vm1, %v50_v6  ;;  %v3720_v9 = vld [vmem:[%s5109_s1 + $0x10] sm:$0xff]  ;;  %v3728_v11 = vld [vmem:[%s5109_s1 + $0x18] sm:$0xff]  ;;  %v5130_v16 = vmov 0   ;;  %v5126_v17 = vmov 8  }
   0x5   :  { %63 = vst.msk [vmem:[#allocation2 + $0x15] sm:$0xff] %vm60_vm1, %v51_v7  ;;  %64 = vst.msk [vmem:[#allocation2 + $0x1d] sm:$0xff] %vm60_vm1, %v52_v8  ;;  %s3605_s20 = smov 12   ;;  %s3606_s21 = smov 16   ;;  %vm542_vm3 = vcmask 1043456   ;;  %vm149_vm4 = vcmask 64544  }
   0x6   :  { %169 = vperm.xlu1 %3469, %v3692_v3   ;;  %116 = vperm.xlu0 %3468, %v3692_v3   ;;  %48 = vst.msk [vmem:[#allocation2 + $0x28] sm:$0x3] %vm47_vm2, %v3595_v5  ;;  %s3607_s22 = smov 20   ;;  %s3608_s23 = smov 24   ;;  %vm202_vm5 = vcmask 97344   ;;  %vm255_vm6 = vcmask 130144  }
   0x7   :  { %s3609_s24 = smov 28   ;;  %s3610_s13 = smov 32   ;;  %vm308_vm7 = vcmask 162944   ;;  %vm361_vm8 = vcmask 195744   ;;  %vm414_vm9 = vcmask 228544   ;;  %vm467_vm10 = vcmask 261344  }
   0x8   :  { %vm520_vm11 = vcmask 294144   ;;  %vm529_vm12 = vcmask 293888   ;;  %vm754_vm13 = vcmask 130112   ;;  %vm807_vm14 = vcmask 195712  }
   0x9   :  { %vm860_vm15 = vcmask 261312   ;;  %vm966_vm2 = vcmask 392512  }
   0xa   :  { %3470 = vset.pattern.permute.xlu1 %v3596_v10  ;;  %121 = vperm.xlu0 %3468, %v3720_v9  }
   0xb   :  { %222 = vperm.xlu1 %3470, %v3692_v3   ;;  %v101_v18 = vld [vmem:[#allocation2 + $0x1] sm:$0xff]  ;;  %v3783_v23 = vld [vmem:[#allocation2 + $0x9] sm:$0xff] }
   0xc   :  { %v154_v22 = vld [vmem:[#allocation2 + $0x2] sm:$0xff]  ;;  %v3787_v28 = vld [vmem:[#allocation2 + $0xa] sm:$0xff]  ;;  %v3801_v51 = vld [vmem:[#allocation2 + $0x12] sm:$0xff] }
   0xd   :  { %v208_v32 = vld [vmem:[#allocation2 + $0xc] sm:$0xff]  ;;  %v207_v38 = vld [vmem:[#allocation2 + $0x4] sm:$0xff]  ;;  %v3803_v52 = vld [vmem:[#allocation2 + $0x19] sm:$0xff] }
   0xe   :  { %126 = vperm.xlu0 %3468, %v3728_v11   ;;  %v3793_v33 = vld [vmem:[#allocation2 + $0x11] sm:$0xff]  ;;  %v260_v42 = vld [vmem:[#allocation2 + $0x5] sm:$0xff]  ;;  %v3815_v4 = vld [vmem:[#allocation2 + $0x1a] sm:$0xff] }
   0xf   :  { %3471 = vset.pattern.permute.xlu1 %v5140_v12  ;;  %v313_v43 = vld [vmem:[#allocation2 + $0x6] sm:$0xff]  ;;  %v314_v55 = vld [vmem:[#allocation2 + $0xe] sm:$0xff] }
  0x10   :  { %270 = vperm.xlu1 %3471, %v3685_v2   ;;  %v261_v46 = vld [vmem:[#allocation2 + $0xd] sm:$0xff] }
  0x11   :  { %v3809_v58 = vld [vmem:[#allocation2 + $0x8] sm:$0xff]  ;;  %v209_v62 = vld [vmem:[#allocation2 + $0x14] sm:$0xff] }
  0x12   :  { %3473 = vset.pattern.permute.xlu0 %v3596_v10 }
  0x13   :  { %217 = vperm.xlu0 %3473, %v3685_v2  }
  0x14   :  { %275 = vperm.xlu1 %3471, %v3692_v3  }
  0x17   :  { %227 = vperm.xlu0 %3473, %v3720_v9  }
  0x18   :  { %3472 = vset.pattern.permute.xlu1 %v5136_v13 }
  0x19   :  { %323 = vperm.xlu1 %3472, %v3685_v2  }
  0x1b   :  { %232 = vperm.xlu0 %3473, %v3728_v11  }
  0x1d   :  { %3474 = vset.pattern.permute.xlu1 %v3593_v0 }
  0x1e   :  { %174 = vperm.xlu1 %3474, %v3720_v9  }
  0x1f   :  { %3479 = vset.pattern.permute.xlu0 %v5136_v13 }
  0x20   :  { %328 = vperm.xlu0 %3479, %v3692_v3  }
  0x22   :  { %3475 = vset.pattern.permute.xlu1 %v5134_v14 }
  0x23   :  { %376 = vperm.xlu1 %3475, %v3685_v2  }
  0x24   :  { %333 = vperm.xlu0 %3479, %v3720_v9  }
  0x27   :  { %3476 = vset.pattern.permute.xlu1 %v3593_v0 }
  0x28   :  { %179 = vperm.xlu1 %3476, %v3728_v11   ;;  %3485 = vset.pattern.permute.xlu0 %v5134_v14 }
  0x29   :  { %386 = vperm.xlu0 %3485, %v3720_v9  }
  0x2c   :  { %3477 = vset.pattern.permute.xlu1 %v5134_v14 }
  0x2d   :  { %381 = vperm.xlu1 %3477, %v3692_v3   ;;  %3486 = vset.pattern.permute.xlu0 %v5132_v15 }
  0x2e   :  { %434 = vperm.xlu0 %3486, %v3692_v3  }
  0x31   :  { %3478 = vset.pattern.permute.xlu1 %v5132_v15 }
  0x32   :  { %429 = vperm.xlu1 %3478, %v3685_v2   ;;  %444 = vperm.xlu0 %3486, %v3728_v11  }
  0x36   :  { %3480 = vset.pattern.permute.xlu1 %v5140_v12  ;;  %3490 = vset.pattern.permute.xlu0 %v5130_v16 }
  0x37   :  { %280 = vperm.xlu1 %3480, %v3720_v9   ;;  %75 = vperm.xlu0 %3490, %v3685_v2  }
  0x3b   :  { %3481 = vset.pattern.permute.xlu1 %v5126_v17  ;;  %90 = vperm.xlu0 %3490, %v3728_v11  }
  0x3c   :  { %482 = vperm.xlu1 %3481, %v3685_v2  }
  0x3f   :  { %3493 = vset.pattern.permute.xlu0 %v5128_v1 }
  0x40   :  { %3482 = vset.pattern.permute.xlu1 %v5140_v12 }
  0x41   :  { %285 = vperm.xlu1 %3482, %v3728_v11  }
  0x45   :  { %3483 = vset.pattern.permute.xlu1 %v5126_v17 }
  0x46   :  { %487 = vperm.xlu1 %3483, %v3692_v3  }
  0x4a   :  { %3484 = vset.pattern.permute.xlu1 %v5136_v13 }
  0x4b   :  { %338 = vperm.xlu1 %3484, %v3728_v11  }
  0x4f   :  { %3487 = vset.pattern.permute.xlu1 %v5134_v14 }
  0x50   :  { %391 = vperm.xlu1 %3487, %v3728_v11  }
  0x54   :  { %3488 = vset.pattern.permute.xlu1 %v5132_v15 }
  0x55   :  { %439 = vperm.xlu1 %3488, %v3720_v9  }
  0x59   :  { %3489 = vset.pattern.permute.xlu1 %v5126_v17 }
  0x5a   :  { %492 = vperm.xlu1 %3489, %v3720_v9  }
  0x5e   :  { %497 = vperm.xlu1 %3489, %v3728_v11  }
  0x62   :  { %3491 = vset.pattern.permute.xlu1 %v5130_v16 }
  0x63   :  { %80 = vperm.xlu1 %3491, %v3692_v3  }
  0x67   :  { %85 = vperm.xlu1 %3491, %v3720_v9  }
  0x6b   :  { %3492 = vset.pattern.permute.xlu1 %v5128_v1 }
  0x7d   :  { %v165_v19 = vpop.permute.xlu1 %164  ;;  %v112_v20 = vpop.permute.xlu0 %111 }
  0x7e   :  { %v129_v21 = vmul.f32 %v112_v20, %v101_v18  ;;  %v182_v26 = vmul.f32 %v165_v19, %v154_v22  ;;  %v3820_v18 = vld [vmem:[#allocation2 + $0x10] sm:$0xff]  ;;  %v210_v22 = vld [vmem:[#allocation2 + $0x1c] sm:$0xff] }
  0x80   :  { %137 = vrot.lane.b32.xlu1 %v129_v21, %s3603_s18 }
  0x81   :  { %v170_v24 = vpop.permute.xlu1 %169  ;;  %v117_v25 = vpop.permute.xlu0 %116 }
  0x82   :  { %v130_v27 = vmul.f32 %v117_v25, %v3783_v23  ;;  %v183_v30 = vmul.f32 %v170_v24, %v3787_v28 }
  0x84   :  { %139 = vrot.lane.b32.xlu0 %v130_v27, %s3603_s18  ;;  %190 = vrot.lane.b32.xlu1 %v182_v26, %s3604_s19 }
  0x85   :  { %v122_v29 = vpop.permute.xlu0 %121 }
  0x86   :  { %v223_v31 = vpop.permute.xlu1 %222  ;;  %v131_v37 = vmul.f32 %v122_v29, %v3793_v33 }
  0x87   :  { %v236_v35 = vmul.f32 %v223_v31, %v208_v32  ;;  %v65_v31 = vld [vmem:[#allocation2] sm:$0xff] }
  0x88   :  { %192 = vrot.lane.b32.xlu0 %v183_v30, %s3604_s19  ;;  %v262_v30 = vld [vmem:[#allocation2 + $0x15] sm:$0xff] }
  0x89   :  { %v127_v34 = vpop.permute.xlu0 %126 }
  0x8a   :  { %v132_v56 = vmul.f32 %v127_v34, %v3803_v52 }
  0x8b   :  { %v271_v36 = vpop.permute.xlu1 %270 }
  0x8c   :  { %245 = vrot.lane.b32.xlu0 %v236_v35, %s3605_s20  ;;  %v288_v45 = vmul.f32 %v271_v36, %v260_v42 }
  0x8e   :  { %v218_v39 = vpop.permute.xlu0 %217 }
  0x8f   :  { %v235_v40 = vmul.f32 %v218_v39, %v207_v38  ;;  %v276_v41 = vpop.permute.xlu1 %275  ;;  %v56_v38 = vld [vmem:[%s5111_s2 + $0x18] sm:$0xff] }
  0x90   :  { %141 = vrot.lane.b32.xlu0 %v131_v37, %s3603_s18  ;;  %v289_v50 = vmul.f32 %v276_v41, %v261_v46  ;;  %v55_v41 = vld [vmem:[%s5111_s2 + $0x10] sm:$0xff] }
  0x91   :  { %243 = vrot.lane.b32.xlu1 %v235_v40, %s3605_s20 }
  0x92   :  { %v228_v44 = vpop.permute.xlu0 %227 }
  0x93   :  { %v237_v5 = vmul.f32 %v228_v44, %v209_v62  ;;  %v263_v44 = vld [vmem:[#allocation2 + $0x1d] sm:$0xff] }
  0x94   :  { %v324_v47 = vpop.permute.xlu1 %323 }
  0x95   :  { %v341_v48 = vmul.f32 %v324_v47, %v313_v43  ;;  %296 = vrot.lane.b32.xlu1 %v288_v45, %s3606_s21  ;;  %v315_v43 = vld [vmem:[#allocation2 + $0x16] sm:$0xff]  ;;  %v54_v45 = vld [vmem:[%s5111_s2 + $0x8] sm:$0xff] }
  0x96   :  { %v233_v49 = vpop.permute.xlu0 %232 }
  0x97   :  { %349 = vrot.lane.b32.xlu0 %v341_v48, %s3607_s22  ;;  %v238_v24 = vmul.f32 %v233_v49, %v210_v22 }
  0x99   :  { %v175_v53 = vpop.permute.xlu1 %174  ;;  %298 = vrot.lane.b32.xlu1 %v289_v50, %s3606_s21 }
  0x9a   :  { %v184_v54 = vmul.f32 %v175_v53, %v3801_v51  ;;  %v316_v53 = vld [vmem:[#allocation2 + $0x1e] sm:$0xff] }
  0x9b   :  { %v329_v57 = vpop.permute.xlu0 %328 }
  0x9c   :  { %194 = vrot.lane.b32.xlu0 %v184_v54, %s3604_s19  ;;  %v342_v59 = vmul.f32 %v329_v57, %v314_v55  ;;  %v369_v57 = vld [vmem:[#allocation2 + $0x20] sm:$0xff] }
  0x9d   :  { %143 = vrot.lane.b32.xlu1 %v132_v56, %s3603_s18 }
  0x9e   :  { %v377_v60 = vpop.permute.xlu1 %376 }
  0x9f   :  { %v394_v61 = vmul.f32 %v377_v60, %v3809_v58  ;;  %v334_v63 = vpop.permute.xlu0 %333 }
  0xa0   :  { %v343_v46 = vmul.f32 %v334_v63, %v315_v43 }
  0xa1   :  { %402 = vrot.lane.b32.xlu0 %v394_v61, %s3608_s23  ;;  %351 = vrot.lane.b32.xlu1 %v342_v59, %s3607_s22  ;;  %v422_v61 = vld [vmem:[#allocation2 + $0x21] sm:$0xff] }
  0xa3   :  { %v180_v6 = vpop.permute.xlu1 %179 }
  0xa4   :  { %v185_v7 = vmul.f32 %v180_v6, %v3815_v4  ;;  %v387_v8 = vpop.permute.xlu0 %386 }
  0xa5   :  { %247 = vrot.lane.b32.xlu0 %v237_v5, %s3605_s20 }
  0xa6   :  { %196 = vrot.lane.b32.xlu1 %v185_v7, %s3604_s19  ;;  %v475_v7 = vld [vmem:[#allocation2 + $0x22] sm:$0xff] }
  0xa8   :  { %v382_v19 = vpop.permute.xlu1 %381 }
  0xa9   :  { %v395_v20 = vmul.f32 %v382_v19, %v3820_v18  ;;  %v435_v21 = vpop.permute.xlu0 %434 }
  0xaa   :  { %v448_v29 = vmul.f32 %v435_v21, %v3793_v33  ;;  %v368_v33 = vld [vmem:[#allocation2 + $0x18] sm:$0xff] }
  0xab   :  { %404 = vrot.lane.b32.xlu1 %v395_v20, %s3608_s23  ;;  %v396_v54 = vmul.f32 %v387_v8, %v368_v33 }
  0xad   :  { %v430_v25 = vpop.permute.xlu1 %429  ;;  %v445_v27 = vpop.permute.xlu0 %444 }
  0xae   :  { %v447_v26 = vmul.f32 %v430_v25, %v3783_v23  ;;  %v57_v23 = vld [vmem:[%s5111_s2 + $0x20] sm:$0xf]  ;;  %v450_v62 = vmul.f32 %v445_v27, %v422_v61 }
  0xaf   :  { %249 = vrot.lane.b32.xlu1 %v238_v24, %s3605_s20  ;;  %3326 = vmatprep.subr.msk.mxu0 %vm542_vm3, %v57_v23 }
  0xb0   :  { %455 = vrot.lane.b32.xlu0 %v447_v26, %s3609_s24  ;;  %3327 = vmatpush3.msk.msra.mxu0 %vm542_vm3, %v57_v23  ;;  %vm1019_vm3 = vcmask 458112  }
  0xb1   :  { %3328 = vmatprep.subr.mxu0 %v56_v38 }
  0xb2   :  { %v281_v32 = vpop.permute.xlu1 %280  ;;  %v76_v34 = vpop.permute.xlu0 %75  ;;  %3329 = vmatpush3.msra.mxu0 %v56_v38 }
  0xb3   :  { %v290_v35 = vmul.f32 %v281_v32, %v262_v30  ;;  %457 = vrot.lane.b32.xlu1 %v448_v29, %s3609_s24  ;;  %v93_v36 = vmul.f32 %v76_v34, %v65_v31  ;;  %3330 = vmatprep.subr.mxu0 %v55_v41 }
  0xb4   :  { %3331 = vmatpush3.msra.mxu0 %v55_v41 }
  0xb5   :  { %300 = vrot.lane.b32.xlu0 %v290_v35, %s3606_s21  ;;  %97 = vst.msk [vmem:[#allocation3] sm:$0xff] %vm60_vm1, %v93_v36  ;;  %3332 = vmatprep.subr.mxu0 %v54_v45 }
  0xb6   :  { %v91_v37 = vpop.permute.xlu0 %90  ;;  %3333 = vmatpush3.msra.mxu0 %v54_v45 }
  0xb7   :  { %v483_v39 = vpop.permute.xlu1 %482  ;;  %v96_v40 = vmul.f32 %v368_v33, %v91_v37 }
  0xb8   :  { %v500_v42 = vmul.f32 %v483_v39, %v3787_v28  ;;  %v53_v28 = vld [vmem:[%s5111_s2] sm:$0xff] }
  0xb9   :  { %100 = vst.msk [vmem:[#allocation3 + $0x18] sm:$0xff] %vm60_vm1, %v96_v40  ;;  %3334 = vmatprep.subr.mxu0 %v53_v28 }
  0xba   :  { %508 = vrot.lane.b32.xlu0 %v500_v42, %s3610_s13  ;;  %3335 = vmatpush3.msra.mxu0 %v53_v28 }
  0xbc   :  { %v286_v47 = vpop.permute.xlu1 %285 }
  0xbd   :  { %v291_v48 = vmul.f32 %v286_v47, %v263_v44 }
  0xbe   :  { %353 = vrot.lane.b32.xlu0 %v343_v46, %s3607_s22 }
  0xbf   :  { %302 = vrot.lane.b32.xlu1 %v291_v48, %s3606_s21 }
  0xc1   :  { %v488_v49 = vpop.permute.xlu1 %487 }
  0xc2   :  { %v501_v50 = vmul.f32 %v488_v49, %v3801_v51 }
  0xc4   :  { %510 = vrot.lane.b32.xlu1 %v501_v50, %s3610_s13 }
  0xc6   :  { %v339_v55 = vpop.permute.xlu1 %338 }
  0xc7   :  { %v344_v56 = vmul.f32 %v339_v55, %v316_v53 }
  0xc8   :  { %406 = vrot.lane.b32.xlu1 %v396_v54, %s3608_s23 }
  0xc9   :  { %355 = vrot.lane.b32.xlu0 %v344_v56, %s3607_s22  ;;  %s3613_s22 = smov 56  }
  0xcb   :  { %v392_v59 = vpop.permute.xlu1 %391 }
  0xcc   :  { %v397_v60 = vmul.f32 %v392_v59, %v369_v57 }
  0xce   :  { %408 = vrot.lane.b32.xlu0 %v397_v60, %s3608_s23 }
  0xd0   :  { %v440_v63 = vpop.permute.xlu1 %439 }
  0xd1   :  { %v449_v51 = vmul.f32 %v440_v63, %v3803_v52 }
  0xd2   :  { %461 = vrot.lane.b32.xlu0 %v450_v62, %s3609_s24 }
  0xd3   :  { %459 = vrot.lane.b32.xlu1 %v449_v51, %s3609_s24  ;;  %s3614_s24 = smov 64  }
  0xd5   :  { %v493_v5 = vpop.permute.xlu1 %492 }
  0xd6   :  { %v502_v6 = vmul.f32 %v493_v5, %v3815_v4 }
  0xd8   :  { %512 = vrot.lane.b32.xlu1 %v502_v6, %s3610_s13 }
  0xd9   :  { %v498_v8 = vpop.permute.xlu1 %497 }
  0xda   :  { %v503_v19 = vmul.f32 %v498_v8, %v475_v7 }
  0xdc   :  { %514 = vrot.lane.b32.xlu0 %v503_v19, %s3610_s13  ;;  %716 = vperm.xlu1 %3492, %v3685_v2  }
  0xde   :  { %v81_v20 = vpop.permute.xlu1 %80 }
  0xdf   :  { %v94_v21 = vmul.f32 %v3809_v58, %v81_v20 }
  0xe0   :  { %3494 = vset.pattern.permute.xlu1 %v3593_v0  ;;  %721 = vperm.xlu0 %3493, %v3692_v3  }
  0xe1   :  { %98 = vst.msk [vmem:[#allocation3 + $0x8] sm:$0xff] %vm60_vm1, %v94_v21  ;;  %769 = vperm.xlu1 %3494, %v3685_v2  }
  0xe2   :  { %v86_v52 = vpop.permute.xlu1 %85 }
  0xe3   :  { %v95_v4 = vmul.f32 %v3820_v18, %v86_v52 }
  0xe4   :  { %726 = vperm.xlu0 %3493, %v3720_v9  }
  0xe5   :  { %99 = vst.msk [vmem:[#allocation3 + $0x10] sm:$0xff] %vm60_vm1, %v95_v4  ;;  %774 = vperm.xlu1 %3494, %v3692_v3   ;;  %vm913_vm1 = vcmask 326912  }
  0xe8   :  { %731 = vperm.xlu0 %3493, %v3728_v11  }
  0xe9   :  { %3495 = vset.pattern.permute.xlu1 %v3596_v10 }
  0xea   :  { %827 = vperm.xlu1 %3495, %v3692_v3  }
  0xec   :  { %3498 = vset.pattern.permute.xlu0 %v3596_v10 }
  0xed   :  { %822 = vperm.xlu0 %3498, %v3685_v2  }
  0xee   :  { %3496 = vset.pattern.permute.xlu1 %v5140_v12 }
  0xef   :  { %875 = vperm.xlu1 %3496, %v3685_v2  }
  0xf1   :  { %832 = vperm.xlu0 %3498, %v3720_v9  }
  0xf2   :  { %v138_v58 = vpop.permute.xlu1 %137 }
  0xf3   :  { %150 = vst.msk [vmem:[#allocation3] sm:$0xff] %vm149_vm4, %v138_v58  ;;  %880 = vperm.xlu1 %3496, %v3692_v3  }
  0xf5   :  { %837 = vperm.xlu0 %3498, %v3728_v11  }
  0xf6   :  { %v140_v18 = vpop.permute.xlu0 %139  ;;  %v191_v22 = vpop.permute.xlu1 %190 }
  0xf7   :  { %151 = vst.msk [vmem:[#allocation3 + $0x8] sm:$0xff] %vm149_vm4, %v140_v18  ;;  %3497 = vset.pattern.permute.xlu1 %v5136_v13 }
  0xf8   :  { %203 = vst.msk [vmem:[#allocation3] sm:$0xff] %vm202_vm5, %v191_v22  ;;  %928 = vperm.xlu1 %3497, %v3685_v2  }
  0xf9   :  { %3504 = vset.pattern.permute.xlu0 %v5136_v13 }
  0xfa   :  { %v193_v24 = vpop.permute.xlu0 %192  ;;  %933 = vperm.xlu0 %3504, %v3692_v3  }
  0xfb   :  { %204 = vst.msk [vmem:[#allocation3 + $0x8] sm:$0xff] %vm202_vm5, %v193_v24 }
  0xfc   :  { %3499 = vset.pattern.permute.xlu1 %v3593_v0 }
  0xfd   :  { %779 = vperm.xlu1 %3499, %v3720_v9  }
  0xfe   :  { %v246_v25 = vpop.permute.xlu0 %245  ;;  %938 = vperm.xlu0 %3504, %v3720_v9  }
  0xff   :  { %257 = vst.msk [vmem:[#allocation3 + $0x8] sm:$0xff] %vm255_vm6, %v246_v25 }
 0x101   :  { %3500 = vset.pattern.permute.xlu1 %v5134_v14 }
 0x102   :  { %v142_v26 = vpop.permute.xlu0 %141  ;;  %981 = vperm.xlu1 %3500, %v3685_v2   ;;  %3510 = vset.pattern.permute.xlu0 %v5134_v14 }
 0x103   :  { %152 = vst.msk [vmem:[#allocation3 + $0x10] sm:$0xff] %vm149_vm4, %v142_v26  ;;  %v244_v27 = vpop.permute.xlu1 %243  ;;  %991 = vperm.xlu0 %3510, %v3720_v9  }
 0x104   :  { %256 = vst.msk [vmem:[#allocation3] sm:$0xff] %vm255_vm6, %v244_v27 }
 0x106   :  { %3501 = vset.pattern.permute.xlu1 %v3593_v0 }
 0x107   :  { %v297_v29 = vpop.permute.xlu1 %296  ;;  %784 = vperm.xlu1 %3501, %v3728_v11   ;;  %3511 = vset.pattern.permute.xlu0 %v5132_v15 }
 0x108   :  { %309 = vst.msk [vmem:[#allocation3] sm:$0xff] %vm308_vm7, %v297_v29  ;;  %1039 = vperm.xlu0 %3511, %v3692_v3  }
 0x109   :  { %v350_v30 = vpop.permute.xlu0 %349 }
 0x10a   :  { %362 = vst.msk [vmem:[#allocation3] sm:$0xff] %vm361_vm8, %v350_v30 }
 0x10b   :  { %v299_v31 = vpop.permute.xlu1 %298  ;;  %3502 = vset.pattern.permute.xlu1 %v5134_v14 }
 0x10c   :  { %310 = vst.msk [vmem:[#allocation3 + $0x8] sm:$0xff] %vm308_vm7, %v299_v31  ;;  %986 = vperm.xlu1 %3502, %v3692_v3   ;;  %1049 = vperm.xlu0 %3511, %v3728_v11   ;;  %v3194_v31 = vld [vmem:[%s5112_s3] ss:$0 sm:$0xff]  ;;  %s3611_s3 = smov 40  }
 0x10e   :  { %v195_v32 = vpop.permute.xlu0 %194 }
 0x10f   :  { %205 = vst.msk [vmem:[#allocation3 + $0x10] sm:$0xff] %vm202_vm5, %v195_v32  ;;  %v144_v34 = vpop.permute.xlu1 %143  ;;  %v3195_v32 = vld [vmem:[%s5113_s4] ss:$0 sm:$0xff]  ;;  %s3612_s4 = smov 48  }
 0x110   :  { %153 = vst.msk [vmem:[#allocation3 + $0x18] sm:$0xff] %vm149_vm4, %v144_v34  ;;  %3503 = vset.pattern.permute.xlu1 %v5132_v15  ;;  %3515 = vset.pattern.permute.xlu0 %v5130_v16  ;;  %vm1072_vm4 = vcmask 523712  }
 0x111   :  { %1034 = vperm.xlu1 %3503, %v3685_v2   ;;  %680 = vperm.xlu0 %3515, %v3685_v2  }
 0x113   :  { %v403_v35 = vpop.permute.xlu0 %402  ;;  %v352_v36 = vpop.permute.xlu1 %351 }
 0x114   :  { %415 = vst.msk [vmem:[#allocation3] sm:$0xff] %vm414_vm9, %v403_v35 }
 0x115   :  { %363 = vst.msk [vmem:[#allocation3 + $0x8] sm:$0xff] %vm361_vm8, %v352_v36  ;;  %3505 = vset.pattern.permute.xlu1 %v5140_v12  ;;  %695 = vperm.xlu0 %3515, %v3728_v11  }
 0x116   :  { %885 = vperm.xlu1 %3505, %v3720_v9  }
 0x117   :  { %v248_v23 = vpop.permute.xlu0 %247 }
 0x118   :  { %258 = vst.msk [vmem:[#allocation3 + $0x10] sm:$0xff] %vm255_vm6, %v248_v23  ;;  %v197_v33 = vpop.permute.xlu1 %196 }
 0x119   :  { %206 = vst.msk [vmem:[#allocation3 + $0x18] sm:$0xff] %vm202_vm5, %v197_v33  ;;  %3518 = vset.pattern.permute.xlu0 %v5128_v1  ;;  %vm1125_vm5 = vcmask 589312  }
 0x11a   :  { %3506 = vset.pattern.permute.xlu1 %v5126_v17 }
 0x11b   :  { %1087 = vperm.xlu1 %3506, %v3685_v2  }
 0x11d   :  { %v405_v37 = vpop.permute.xlu1 %404 }
 0x11e   :  { %416 = vst.msk [vmem:[#allocation3 + $0x8] sm:$0xff] %vm414_vm9, %v405_v37 }
 0x11f   :  { %3507 = vset.pattern.permute.xlu1 %v5140_v12 }
 0x120   :  { %890 = vperm.xlu1 %3507, %v3728_v11  }
 0x121   :  { %v250_v38 = vpop.permute.xlu1 %249 }
 0x122   :  { %259 = vst.msk [vmem:[#allocation3 + $0x18] sm:$0xff] %vm255_vm6, %v250_v38  ;;  %v456_v39 = vpop.permute.xlu0 %455  ;;  %vm1134_vm6 = vcmask 588800  }
 0x123   :  { %468 = vst.msk [vmem:[#allocation3] sm:$0xff] %vm467_vm10, %v456_v39 }
 0x124   :  { %3508 = vset.pattern.permute.xlu1 %v5126_v17 }
 0x125   :  { %v458_v40 = vpop.permute.xlu1 %457  ;;  %1092 = vperm.xlu1 %3508, %v3692_v3  }
 0x126   :  { %469 = vst.msk [vmem:[#allocation3 + $0x8] sm:$0xff] %vm467_vm10, %v458_v40 }
 0x127   :  { %v301_v2 = vpop.permute.xlu0 %300 }
 0x128   :  { %311 = vst.msk [vmem:[#allocation3 + $0x10] sm:$0xff] %vm308_vm7, %v301_v2 }
 0x129   :  { %3509 = vset.pattern.permute.xlu1 %v5136_v13 }
 0x12a   :  { %943 = vperm.xlu1 %3509, %v3728_v11  }
 0x12c   :  { %v509_v41 = vpop.permute.xlu0 %508 }
 0x12d   :  { %521 = vst.msk [vmem:[#allocation3] sm:$0xff] %vm520_vm11, %v509_v41 }
 0x12e   :  { %3512 = vset.pattern.permute.xlu1 %v5134_v14 }
 0x12f   :  { %996 = vperm.xlu1 %3512, %v3728_v11  }
 0x130   :  { %v354_v42 = vpop.permute.xlu0 %353 }
 0x131   :  { %364 = vst.msk [vmem:[#allocation3 + $0x10] sm:$0xff] %vm361_vm8, %v354_v42  ;;  %v303_v43 = vpop.permute.xlu1 %302 }
 0x132   :  { %312 = vst.msk [vmem:[#allocation3 + $0x18] sm:$0xff] %vm308_vm7, %v303_v43 }
 0x133   :  { %3513 = vset.pattern.permute.xlu1 %v5132_v15 }
 0x134   :  { %v525_v44 = vld [vmem:[#allocation3] sm:$0xff]  ;;  %1044 = vperm.xlu1 %3513, %v3720_v9  }
 0x135   :  { %3336 = vmatprep.mubr.msk.f32.mxu0 %vm529_vm12, %v525_v44 }
 0x136   :  { %v511_v45 = vpop.permute.xlu1 %510 }
 0x137   :  { %522 = vst.msk [vmem:[#allocation3 + $0x8] sm:$0xff] %vm520_vm11, %v511_v45 }
 0x138   :  { %3514 = vset.pattern.permute.xlu1 %v5126_v17 }
 0x139   :  { %1097 = vperm.xlu1 %3514, %v3720_v9  }
 0x13a   :  { %v407_v46 = vpop.permute.xlu1 %406 }
 0x13b   :  { %417 = vst.msk [vmem:[#allocation3 + $0x10] sm:$0xff] %vm414_vm9, %v407_v46  ;;  %v356_v47 = vpop.permute.xlu0 %355 }
 0x13c   :  { %365 = vst.msk [vmem:[#allocation3 + $0x18] sm:$0xff] %vm361_vm8, %v356_v47 }
 0x13d   :  { %1102 = vperm.xlu1 %3514, %v3728_v11  }
 0x13e   :  { %v526_v28 = vld [vmem:[#allocation3 + $0x8] sm:$0xff] }
 0x13f   :  { %3337 = vmatmul.mubr.msk.f32.vlgmr.msra.gmra.mxu0 %vm529_vm12, %v526_v28 }
 0x140   :  { %v409_v48 = vpop.permute.xlu0 %408 }
 0x141   :  { %418 = vst.msk [vmem:[#allocation3 + $0x18] sm:$0xff] %vm414_vm9, %v409_v48  ;;  %3516 = vset.pattern.permute.xlu1 %v5130_v16 }
 0x142   :  { %685 = vperm.xlu1 %3516, %v3692_v3  }
 0x144   :  { %v462_v49 = vpop.permute.xlu0 %461 }
 0x145   :  { %471 = vst.msk [vmem:[#allocation3 + $0x18] sm:$0xff] %vm467_vm10, %v462_v49  ;;  %v460_v50 = vpop.permute.xlu1 %459 }
 0x146   :  { %470 = vst.msk [vmem:[#allocation3 + $0x10] sm:$0xff] %vm467_vm10, %v460_v50  ;;  %690 = vperm.xlu1 %3516, %v3720_v9  }
 0x14a   :  { %v513_v53 = vpop.permute.xlu1 %512  ;;  %3517 = vset.pattern.permute.xlu1 %v5128_v1 }
 0x14b   :  { %523 = vst.msk [vmem:[#allocation3 + $0x10] sm:$0xff] %vm520_vm11, %v513_v53 }
 0x14e   :  { %v515_v11 = vpop.permute.xlu0 %514 }
 0x14f   :  { %524 = vst.msk [vmem:[#allocation3 + $0x18] sm:$0xff] %vm520_vm11, %v515_v11 }
 0x152   :  { %v527_v54 = vld [vmem:[#allocation3 + $0x10] sm:$0xff] }
 0x153   :  { %3339 = vmatprep.mubr.msk.f32.mxu0 %vm529_vm12, %v527_v54 }
 0x156   :  { %v528_v3 = vld [vmem:[#allocation3 + $0x18] sm:$0xff] }
 0x157   :  { %3340 = vmatmul.mubr.msk.f32.gmra.mxu0 %vm529_vm12, %v528_v3  ;;  %v717_v55 = vpop.permute.xlu1 %716 }
 0x15b   :  { %v722_v5 = vpop.permute.xlu0 %721 }
 0x15c   :  { %v3963_v56 = vpop.permute.xlu1 %769 }
 0x15f   :  { %v3981_v7 = vpop.permute.xlu0 %726 }
 0x160   :  { %v3965_v57 = vpop.permute.xlu1 %774 }
 0x163   :  { %v3985_v19 = vpop.permute.xlu0 %731 }
 0x165   :  { %v3967_v9 = vpop.permute.xlu1 %827 }
 0x168   :  { %v3989_v21 = vpop.permute.xlu0 %822 }
 0x16a   :  { %v3969_v59 = vpop.permute.xlu1 %875 }
 0x16c   :  { %v3993_v4 = vpop.permute.xlu0 %832 }
 0x16e   :  { %v881_v60 = vpop.permute.xlu1 %880 }
 0x170   :  { %v3997_v18 = vpop.permute.xlu0 %837 }
 0x173   :  { %v3971_v61 = vpop.permute.xlu1 %928 }
 0x175   :  { %v4001_v24 = vpop.permute.xlu0 %933 }
 0x178   :  { %v3973_v62 = vpop.permute.xlu1 %779 }
 0x179   :  { %v4005_v26 = vpop.permute.xlu0 %938 }
 0x17d   :  { %v3975_v63 = vpop.permute.xlu1 %981 }
 0x17e   :  { %v4009_v29 = vpop.permute.xlu0 %991 }
 0x182   :  { %v3977_v51 = vpop.permute.xlu1 %784 }
 0x183   :  { %v4019_v36 = vpop.permute.xlu0 %1039 }
 0x187   :  { %v3979_v6 = vpop.permute.xlu1 %986  ;;  %v4032_v41 = vpop.permute.xlu0 %1049 }
 0x18c   :  { %v3983_v8 = vpop.permute.xlu1 %1034  ;;  %v681_v43 = vpop.permute.xlu0 %680 }
 0x191   :  { %v3987_v20 = vpop.permute.xlu1 %885 }
 0x196   :  { %v3991_v52 = vpop.permute.xlu1 %1087 }
 0x19b   :  { %v3995_v58 = vpop.permute.xlu1 %890 }
 0x1a0   :  { %v3999_v22 = vpop.permute.xlu1 %1092 }
 0x1a5   :  { %v4003_v25 = vpop.permute.xlu1 %943 }
 0x1aa   :  { %v4007_v27 = vpop.permute.xlu1 %996 }
 0x1af   :  { %v4011_v30 = vpop.permute.xlu1 %1044 }
 0x1b4   :  { %v4021_v33 = vpop.permute.xlu1 %1097 }
 0x1b8   :  { %v4034_v42 = vpop.permute.xlu1 %1102 }
 0x1bd   :  { %v686_v44 = vpop.permute.xlu1 %685 }
 0x1ff   :  { %v3338_v34 = vpop.f32.mrf.mxu0 }
 0x200   :  { %v638_v35 = vmul.f32 %v3338_v34, %v3194_v31 }
 0x201   :  { %v612_v23 = vpop.f32.mrf.mxu0 }
 0x202   :  { %v4023_v37 = vadd.f32 %v3195_v32, %v638_v35  ;;  %v637_v38 = vmul.f32 %v3194_v31, %v612_v23 }
 0x204   :  { %v5125_v39 = vmax.f32 %v4023_v37, 0.0  ;;  %v4026_v40 = vadd.f32 %v3195_v32, %v637_v38 }
 0x206   :  { %667 = vst.msk [vmem:[#allocation2 + $0xd] sm:$0xff] %vm41_vm0, %v5125_v39  ;;  %v5124_v2 = vmax.f32 %v4026_v40, 0.0 }
 0x208   :  { %666 = vst.msk [vmem:[#allocation2 + $0x5] sm:$0xff] %vm41_vm0, %v5124_v2 }
 0x20d   :  { %v866_v45 = vld [vmem:[#allocation2 + $0xd] sm:$0xff] }
 0x20e   :  { %v894_v46 = vmul.f32 %v881_v60, %v866_v45 }
 0x20f   :  { %v670_v47 = vld [vmem:[#allocation2] sm:$0xff]  ;;  %v671_v28 = vld [vmem:[#allocation2 + $0x8] sm:$0xff] }
 0x210   :  { %v707_v48 = vld [vmem:[#allocation2 + $0x9] sm:$0xff]  ;;  %v698_v49 = vmul.f32 %v681_v43, %v670_v47  ;;  %v699_v50 = vmul.f32 %v686_v44, %v671_v28  ;;  %903 = vrot.lane.b32.xlu1 %v894_v46, %s3610_s13  ;;  %v706_v11 = vld [vmem:[#allocation2 + $0x1] sm:$0xff] }
 0x211   :  { %v735_v53 = vmul.f32 %v722_v5, %v707_v48  ;;  %v760_v54 = vld [vmem:[#allocation2 + $0xa] sm:$0xff]  ;;  %v734_v3 = vmul.f32 %v717_v55, %v706_v11  ;;  %v759_v34 = vld [vmem:[#allocation2 + $0x2] sm:$0xff]  ;;  %v691_v11 = vpop.permute.xlu1 %690 }
 0x212   :  { %702 = vst.msk [vmem:[#allocation3] sm:$0xff] %vm41_vm0, %v698_v49  ;;  %703 = vst.msk [vmem:[#allocation3 + $0x8] sm:$0xff] %vm41_vm0, %v699_v50  ;;  %v788_v60 = vmul.f32 %v3965_v57, %v760_v54  ;;  %v813_v35 = vld [vmem:[#allocation2 + $0xc] sm:$0xff]  ;;  %v787_v23 = vmul.f32 %v3963_v56, %v759_v34  ;;  %v812_v38 = vld [vmem:[#allocation2 + $0x4] sm:$0xff] }
 0x213   :  { %744 = vrot.lane.b32.xlu0 %v735_v53, %s3604_s19  ;;  %v841_v44 = vmul.f32 %v3967_v9, %v813_v35  ;;  %v918_v46 = vld [vmem:[#allocation2 + $0x6] sm:$0xff]  ;;  %v840_v57 = vmul.f32 %v3989_v21, %v812_v38 }
 0x214   :  { %742 = vrot.lane.b32.xlu1 %v734_v3, %s3604_s19  ;;  %v865_v49 = vld [vmem:[#allocation2 + $0x5] sm:$0xff]  ;;  %v946_v53 = vmul.f32 %v3971_v61, %v918_v46  ;;  %v1052_v61 = vmul.f32 %v3983_v8, %v707_v48  ;;  %v1105_v8 = vmul.f32 %v3991_v52, %v760_v54 }
 0x215   :  { %v893_v21 = vmul.f32 %v3969_v59, %v865_v49  ;;  %v663_v54 = vld [vmem:[%s5114_s5 + $0x40] sm:$0xff]  ;;  %v660_v46 = vld [vmem:[%s5114_s5 + $0x28] sm:$0xff] }
 0x216   :  { %3342 = vmatprep.subr.mxu1 %v663_v54 }
 0x217   :  { %797 = vrot.lane.b32.xlu0 %v788_v60, %s3606_s21  ;;  %v3341_v5 = vpop.f32.mrf.mxu0  ;;  %3343 = vmatpush3.msra.mxu1 %v663_v54 }
 0x218   :  { %v640_v43 = vmul.f32 %v3341_v5, %v3194_v31  ;;  %795 = vrot.lane.b32.xlu1 %v787_v23, %s3606_s21 }
 0x219   :  { %v622_v45 = vpop.f32.mrf.mxu0 }
 0x21a   :  { %v4049_v55 = vadd.f32 %v3195_v32, %v640_v43  ;;  %v639_v47 = vmul.f32 %v3194_v31, %v622_v45  ;;  %v999_v31 = vmul.f32 %v3975_v63, %v671_v28  ;;  %v661_v45 = vld [vmem:[%s5114_s5 + $0x30] sm:$0xff] }
 0x21b   :  { %850 = vrot.lane.b32.xlu0 %v841_v44, %s3608_s23 }
 0x21c   :  { %v5123_v50 = vmax.f32 %v4049_v55, 0.0  ;;  %v4054_v56 = vadd.f32 %v3195_v32, %v639_v47  ;;  %848 = vrot.lane.b32.xlu1 %v840_v57, %s3608_s23  ;;  %v696_v32 = vpop.permute.xlu0 %695  ;;  %v659_v57 = vld [vmem:[%s5114_s5 + $0x20] sm:$0xff] }
 0x21e   :  { %669 = vst.msk [vmem:[#allocation2 + $0x1d] sm:$0xff] %vm41_vm0, %v5123_v50  ;;  %v5122_v9 = vmax.f32 %v4054_v56, 0.0 }
 0x21f   :  { %954 = vrot.lane.b32.xlu0 %v946_v53, %s3611_s3  ;;  %v658_v53 = vld [vmem:[%s5114_s5 + $0x18] sm:$0xff] }
 0x220   :  { %668 = vst.msk [vmem:[#allocation2 + $0x15] sm:$0xff] %vm41_vm0, %v5122_v9  ;;  %901 = vrot.lane.b32.xlu1 %v893_v21, %s3610_s13 }
 0x223   :  { %1007 = vrot.lane.b32.xlu0 %v999_v31, %s3612_s4  ;;  %v657_v31 = vld [vmem:[%s5114_s5 + $0x10] sm:$0xff] }
 0x225   :  { %v868_v3 = vld [vmem:[#allocation2 + $0x1d] sm:$0xff] }
 0x226   :  { %v896_v59 = vmul.f32 %v3995_v58, %v868_v3  ;;  %v921_v48 = vld [vmem:[#allocation2 + $0x1e] sm:$0xff] }
 0x227   :  { %1060 = vrot.lane.b32.xlu0 %v1052_v61, %s3613_s22  ;;  %v4073_v34 = vld [vmem:[#allocation2 + $0x18] sm:$0xff]  ;;  %v672_v60 = vld [vmem:[#allocation2 + $0x10] sm:$0xff]  ;;  %v949_v5 = vmul.f32 %v4003_v25, %v921_v48  ;;  %v974_v38 = vld [vmem:[#allocation2 + $0x20] sm:$0xff] }
 0x228   :  { %v4075_v35 = vld [vmem:[#allocation2 + $0x19] sm:$0xff]  ;;  %v701_v63 = vmul.f32 %v696_v32, %v4073_v34  ;;  %v700_v28 = vmul.f32 %v691_v11, %v672_v60  ;;  %907 = vrot.lane.b32.xlu1 %v896_v59, %s3610_s13  ;;  %v919_v23 = vld [vmem:[#allocation2 + $0xe] sm:$0xff]  ;;  %v1027_v44 = vld [vmem:[#allocation2 + $0x21] sm:$0xff] }
 0x229   :  { %v737_v58 = vmul.f32 %v3985_v19, %v4075_v35  ;;  %v947_v52 = vmul.f32 %v4001_v24, %v919_v23  ;;  %v4092_v43 = vld [vmem:[#allocation2 + $0x1a] sm:$0xff]  ;;  %v1002_v19 = vmul.f32 %v4007_v27, %v974_v38  ;;  %v1055_v27 = vmul.f32 %v4032_v41, %v1027_v44  ;;  %v708_v47 = vld [vmem:[#allocation2 + $0x11] sm:$0xff]  ;;  %v656_v61 = vld [vmem:[%s5114_s5 + $0x8] sm:$0xff] }
 0x22a   :  { %705 = vst.msk [vmem:[#allocation3 + $0x18] sm:$0xff] %vm41_vm0, %v701_v63  ;;  %704 = vst.msk [vmem:[#allocation3 + $0x10] sm:$0xff] %vm41_vm0, %v700_v28  ;;  %v790_v25 = vmul.f32 %v3977_v51, %v4092_v43  ;;  %v662_v24 = vld [vmem:[%s5114_s5 + $0x38] sm:$0xff]  ;;  %v1000_v51 = vmul.f32 %v3979_v6, %v672_v60  ;;  %v736_v41 = vmul.f32 %v3981_v7, %v708_v47  ;;  %v655_v11 = vld [vmem:[%s5114_s5] sm:$0xff] }
 0x22b   :  { %1113 = vrot.lane.b32.xlu0 %v1105_v8, %s3614_s24  ;;  %3344 = vmatprep.subr.mxu1 %v662_v24  ;;  %v815_v49 = vld [vmem:[#allocation2 + $0x1c] sm:$0xff]  ;;  %v761_v21 = vld [vmem:[#allocation2 + $0x12] sm:$0xff]  ;;  %v1001_v63 = vmul.f32 %v4009_v29, %v4073_v34  ;;  %v1107_v8 = vmul.f32 %v4021_v33, %v4092_v43  ;;  %v4163_v29 = vld [vmem:[%s5109_s1 + $0x8] sm:$0xff] }
 0x22c   :  { %748 = vrot.lane.b32.xlu1 %v737_v58, %s3604_s19  ;;  %3345 = vmatpush3.msra.mxu1 %v662_v24  ;;  %v843_v6 = vmul.f32 %v3997_v18, %v815_v49  ;;  %v789_v7 = vmul.f32 %v3973_v62, %v761_v21  ;;  %v814_v32 = vld [vmem:[#allocation2 + $0x14] sm:$0xff]  ;;  %v1053_v18 = vmul.f32 %v4019_v36, %v708_v47  ;;  %v1080_v28 = vld [vmem:[#allocation2 + $0x22] sm:$0xff] }
 0x22d   :  { %3346 = vmatprep.subr.mxu1 %v661_v45  ;;  %v842_v62 = vmul.f32 %v3993_v4, %v814_v32  ;;  %v867_v3 = vld [vmem:[#allocation2 + $0x15] sm:$0xff]  ;;  %v1106_v59 = vmul.f32 %v3999_v22, %v761_v21  ;;  %v1054_v22 = vmul.f32 %v4011_v30, %v4075_v35 }
 0x22e   :  { %3347 = vmatpush3.msra.mxu1 %v661_v45  ;;  %v895_v36 = vmul.f32 %v3987_v20, %v867_v3  ;;  %v920_v60 = vld [vmem:[#allocation2 + $0x16] sm:$0xff]  ;;  %v1108_v20 = vmul.f32 %v4034_v42, %v1080_v28 }
 0x22f   :  { %960 = vrot.lane.b32.xlu0 %v949_v5, %s3611_s3  ;;  %3348 = vmatprep.subr.mxu1 %v660_v46  ;;  %v948_v4 = vmul.f32 %v4005_v26, %v920_v60  ;;  %v4158_v26 = vld [vmem:[%s5109_s1] sm:$0xff]  ;;  %v4170_v30 = vld [vmem:[%s5109_s1 + $0x10] sm:$0xff]  ;;  %v4178_v33 = vld [vmem:[%s5109_s1 + $0x18] sm:$0xff] }
 0x230   :  { %956 = vrot.lane.b32.xlu1 %v947_v52, %s3611_s3  ;;  %3349 = vmatpush3.msra.mxu1 %v660_v46 }
 0x231   :  { %3350 = vmatprep.subr.mxu1 %v659_v57 }
 0x232   :  { %3351 = vmatpush3.msra.mxu1 %v659_v57 }
 0x233   :  { %1013 = vrot.lane.b32.xlu0 %v1002_v19, %s3612_s4  ;;  %3352 = vmatprep.subr.mxu1 %v658_v53 }
 0x234   :  { %801 = vrot.lane.b32.xlu1 %v790_v25, %s3606_s21  ;;  %3353 = vmatpush3.msra.mxu1 %v658_v53 }
 0x235   :  { %3354 = vmatprep.subr.mxu1 %v657_v31 }
 0x236   :  { %3355 = vmatpush3.msra.mxu1 %v657_v31 }
 0x237   :  { %1066 = vrot.lane.b32.xlu0 %v1055_v27, %s3613_s22  ;;  %3356 = vmatprep.subr.mxu1 %v656_v61 }
 0x238   :  { %1009 = vrot.lane.b32.xlu1 %v1000_v51, %s3612_s4  ;;  %3357 = vmatpush3.msra.mxu1 %v656_v61 }
 0x239   :  { %3358 = vmatprep.subr.mxu1 %v655_v11 }
 0x23a   :  { %3359 = vmatpush3.msra.mxu1 %v655_v11 }
 0x23b   :  { %746 = vrot.lane.b32.xlu0 %v736_v41, %s3604_s19 }
 0x23c   :  { %854 = vrot.lane.b32.xlu1 %v843_v6, %s3608_s23 }
 0x23f   :  { %799 = vrot.lane.b32.xlu0 %v789_v7, %s3606_s21 }
 0x240   :  { %1062 = vrot.lane.b32.xlu1 %v1053_v18, %s3613_s22 }
 0x243   :  { %852 = vrot.lane.b32.xlu0 %v842_v62, %s3608_s23 }
 0x244   :  { %1115 = vrot.lane.b32.xlu1 %v1106_v59, %s3614_s24 }
 0x247   :  { %905 = vrot.lane.b32.xlu0 %v895_v36, %s3610_s13 }
 0x248   :  { %1011 = vrot.lane.b32.xlu1 %v1001_v63, %s3612_s4 }
 0x24b   :  { %958 = vrot.lane.b32.xlu0 %v948_v4, %s3611_s3 }
 0x24c   :  { %1064 = vrot.lane.b32.xlu1 %v1054_v22, %s3613_s22 }
 0x24f   :  { %1119 = vrot.lane.b32.xlu0 %v1108_v20, %s3614_s24 }
 0x250   :  { %1117 = vrot.lane.b32.xlu1 %v1107_v8, %s3614_s24 }
 0x253   :  { %1325 = vperm.xlu0 %3518, %v4163_v29  }
 0x254   :  { %1320 = vperm.xlu1 %3517, %v4158_v26  }
 0x257   :  { %1330 = vperm.xlu0 %3518, %v4170_v30  }
 0x258   :  { %3519 = vset.pattern.permute.xlu1 %v3593_v0 }
 0x259   :  { %1372 = vperm.xlu1 %3519, %v4158_v26  }
 0x25b   :  { %1335 = vperm.xlu0 %3518, %v4178_v33  }
 0x25d   :  { %1377 = vperm.xlu1 %3519, %v4163_v29  }
 0x25f   :  { %3523 = vset.pattern.permute.xlu0 %v3596_v10 }
 0x260   :  { %1424 = vperm.xlu0 %3523, %v4158_v26  }
 0x261   :  { %3520 = vset.pattern.permute.xlu1 %v3596_v10 }
 0x262   :  { %1429 = vperm.xlu1 %3520, %v4163_v29  }
 0x264   :  { %1434 = vperm.xlu0 %3523, %v4170_v30  }
 0x266   :  { %3521 = vset.pattern.permute.xlu1 %v5140_v12 }
 0x267   :  { %1476 = vperm.xlu1 %3521, %v4158_v26  }
 0x268   :  { %1439 = vperm.xlu0 %3523, %v4178_v33  }
 0x26b   :  { %1481 = vperm.xlu1 %3521, %v4163_v29  }
 0x26c   :  { %3529 = vset.pattern.permute.xlu0 %v5136_v13 }
 0x26d   :  { %1533 = vperm.xlu0 %3529, %v4163_v29  }
 0x26f   :  { %3522 = vset.pattern.permute.xlu1 %v5136_v13 }
 0x270   :  { %1528 = vperm.xlu1 %3522, %v4158_v26  }
 0x271   :  { %1538 = vperm.xlu0 %3529, %v4170_v30  }
 0x274   :  { %3524 = vset.pattern.permute.xlu1 %v3593_v0 }
 0x275   :  { %3535 = vset.pattern.permute.xlu0 %v5134_v14  ;;  %1382 = vperm.xlu1 %3524, %v4170_v30  }
 0x276   :  { %1590 = vperm.xlu0 %3535, %v4170_v30  }
 0x279   :  { %3525 = vset.pattern.permute.xlu1 %v5134_v14 }
 0x27a   :  { %3536 = vset.pattern.permute.xlu0 %v5132_v15  ;;  %1580 = vperm.xlu1 %3525, %v4158_v26  }
 0x27b   :  { %1637 = vperm.xlu0 %3536, %v4163_v29  }
 0x27e   :  { %3526 = vset.pattern.permute.xlu1 %v3593_v0 }
 0x27f   :  { %1647 = vperm.xlu0 %3536, %v4178_v33   ;;  %1387 = vperm.xlu1 %3526, %v4178_v33  }
 0x282   :  { %v904_v42 = vpop.permute.xlu1 %903 }
 0x283   :  { %3540 = vset.pattern.permute.xlu0 %v5130_v16  ;;  %3527 = vset.pattern.permute.xlu1 %v5134_v14 }
 0x284   :  { %1284 = vperm.xlu0 %3540, %v4158_v26   ;;  %1585 = vperm.xlu1 %3527, %v4163_v29  }
 0x285   :  { %v745_v34 = vpop.permute.xlu0 %744 }
 0x286   :  { %756 = vst.msk [vmem:[#allocation3 + $0x8] sm:$0xff] %vm754_vm13, %v745_v34  ;;  %v743_v35 = vpop.permute.xlu1 %742 }
 0x287   :  { %755 = vst.msk [vmem:[#allocation3] sm:$0xff] %vm754_vm13, %v743_v35 }
 0x288   :  { %1299 = vperm.xlu0 %3540, %v4178_v33   ;;  %3528 = vset.pattern.permute.xlu1 %v5132_v15 }
 0x289   :  { %v798_v48 = vpop.permute.xlu0 %797  ;;  %1632 = vperm.xlu1 %3528, %v4158_v26  }
 0x28a   :  { %809 = vst.msk [vmem:[#allocation3 + $0x8] sm:$0xff] %vm807_vm14, %v798_v48  ;;  %v796_v58 = vpop.permute.xlu1 %795 }
 0x28b   :  { %808 = vst.msk [vmem:[#allocation3] sm:$0xff] %vm807_vm14, %v796_v58 }
 0x28c   :  { %3543 = vset.pattern.permute.xlu0 %v5128_v1 }
 0x28d   :  { %v851_v23 = vpop.permute.xlu0 %850  ;;  %3530 = vset.pattern.permute.xlu1 %v5140_v12 }
 0x28e   :  { %862 = vst.msk [vmem:[#allocation3 + $0x8] sm:$0xff] %vm860_vm15, %v851_v23  ;;  %v849_v5 = vpop.permute.xlu1 %848  ;;  %1486 = vperm.xlu1 %3530, %v4170_v30  }
 0x28f   :  { %915 = vst.msk [vmem:[#allocation3 + $0x8] sm:$0xff] %vm913_vm1, %v904_v42 }
 0x290   :  { %861 = vst.msk [vmem:[#allocation3] sm:$0xff] %vm860_vm15, %v849_v5 }
 0x291   :  { %v955_v38 = vpop.permute.xlu0 %954 }
 0x292   :  { %v902_v52 = vpop.permute.xlu1 %901  ;;  %3531 = vset.pattern.permute.xlu1 %v5126_v17 }
 0x293   :  { %914 = vst.msk [vmem:[#allocation3] sm:$0xff] %vm913_vm1, %v902_v52  ;;  %1684 = vperm.xlu1 %3531, %v4158_v26  }
 0x294   :  { %967 = vst.msk [vmem:[#allocation3] sm:$0xff] %vm966_vm2, %v955_v38 }
 0x295   :  { %v1008_v54 = vpop.permute.xlu0 %1007 }
 0x296   :  { %1020 = vst.msk [vmem:[#allocation3] sm:$0xff] %vm1019_vm3, %v1008_v54 }
 0x297   :  { %3532 = vset.pattern.permute.xlu1 %v5140_v12 }
 0x298   :  { %1491 = vperm.xlu1 %3532, %v4178_v33  }
 0x299   :  { %v1061_v43 = vpop.permute.xlu0 %1060 }
 0x29a   :  { %1073 = vst.msk [vmem:[#allocation3] sm:$0xff] %vm1072_vm4, %v1061_v43  ;;  %v908_v19 = vpop.permute.xlu1 %907 }
 0x29c   :  { %3533 = vset.pattern.permute.xlu1 %v5126_v17 }
 0x29d   :  { %v1114_v44 = vpop.permute.xlu0 %1113  ;;  %1689 = vperm.xlu1 %3533, %v4163_v29  }
 0x29e   :  { %1126 = vst.msk [vmem:[#allocation3] sm:$0xff] %vm1125_vm5, %v1114_v44  ;;  %v749_v25 = vpop.permute.xlu1 %748 }
 0x29f   :  { %758 = vst.msk [vmem:[#allocation3 + $0x18] sm:$0xff] %vm754_vm13, %v749_v25 }
 0x2a1   :  { %v961_v24 = vpop.permute.xlu0 %960  ;;  %3534 = vset.pattern.permute.xlu1 %v5136_v13 }
 0x2a2   :  { %v957_v45 = vpop.permute.xlu1 %956  ;;  %1543 = vperm.xlu1 %3534, %v4178_v33  }
 0x2a3   :  { %968 = vst.msk [vmem:[#allocation3 + $0x8] sm:$0xff] %vm966_vm2, %v957_v45 }
 0x2a5   :  { %v1014_v27 = vpop.permute.xlu0 %1013  ;;  %v1130_v46 = vld [vmem:[#allocation3] sm:$0xff] }
 0x2a6   :  { %3360 = vmatprep.mubr.msk.f32.mxu1 %vm1134_vm6, %v1130_v46  ;;  %v802_v47 = vpop.permute.xlu1 %801  ;;  %3537 = vset.pattern.permute.xlu1 %v5134_v14 }
 0x2a7   :  { %811 = vst.msk [vmem:[#allocation3 + $0x18] sm:$0xff] %vm807_vm14, %v802_v47  ;;  %1595 = vperm.xlu1 %3537, %v4178_v33  }
 0x2a9   :  { %v1067_v51 = vpop.permute.xlu0 %1066 }
 0x2aa   :  { %v1010_v57 = vpop.permute.xlu1 %1009 }
 0x2ab   :  { %1021 = vst.msk [vmem:[#allocation3 + $0x8] sm:$0xff] %vm1019_vm3, %v1010_v57  ;;  %3538 = vset.pattern.permute.xlu1 %v5132_v15 }
 0x2ac   :  { %1642 = vperm.xlu1 %3538, %v4170_v30  }
 0x2ad   :  { %v747_v49 = vpop.permute.xlu0 %746 }
 0x2ae   :  { %757 = vst.msk [vmem:[#allocation3 + $0x10] sm:$0xff] %vm754_vm13, %v747_v49  ;;  %v855_v41 = vpop.permute.xlu1 %854  ;;  %v3200_v49 = vld [vmem:[%s5115_s6] ss:$0 sm:$0xff] }
 0x2af   :  { %864 = vst.msk [vmem:[#allocation3 + $0x18] sm:$0xff] %vm860_vm15, %v855_v41  ;;  %v3201_v41 = vld [vmem:[%s5116_s7] ss:$0 sm:$0xff] }
 0x2b0   :  { %917 = vst.msk [vmem:[#allocation3 + $0x18] sm:$0xff] %vm913_vm1, %v908_v19  ;;  %3539 = vset.pattern.permute.xlu1 %v5126_v17 }
 0x2b1   :  { %v800_v53 = vpop.permute.xlu0 %799  ;;  %970 = vst.msk [vmem:[#allocation3 + $0x18] sm:$0xff] %vm966_vm2, %v961_v24  ;;  %1694 = vperm.xlu1 %3539, %v4170_v30  }
 0x2b2   :  { %810 = vst.msk [vmem:[#allocation3 + $0x10] sm:$0xff] %vm807_vm14, %v800_v53  ;;  %v1063_v21 = vpop.permute.xlu1 %1062 }
 0x2b3   :  { %1023 = vst.msk [vmem:[#allocation3 + $0x18] sm:$0xff] %vm1019_vm3, %v1014_v27 }
 0x2b4   :  { %1076 = vst.msk [vmem:[#allocation3 + $0x18] sm:$0xff] %vm1072_vm4, %v1067_v51  ;;  %1074 = vst.msk [vmem:[#allocation3 + $0x8] sm:$0xff] %vm1072_vm4, %v1063_v21 }
 0x2b5   :  { %v853_v6 = vpop.permute.xlu0 %852  ;;  %1699 = vperm.xlu1 %3539, %v4178_v33  }
 0x2b6   :  { %863 = vst.msk [vmem:[#allocation3 + $0x10] sm:$0xff] %vm860_vm15, %v853_v6  ;;  %v1116_v31 = vpop.permute.xlu1 %1115 }
 0x2b7   :  { %1127 = vst.msk [vmem:[#allocation3 + $0x8] sm:$0xff] %vm1125_vm5, %v1116_v31 }
 0x2b9   :  { %v906_v7 = vpop.permute.xlu0 %905  ;;  %3541 = vset.pattern.permute.xlu1 %v5130_v16 }
 0x2ba   :  { %916 = vst.msk [vmem:[#allocation3 + $0x10] sm:$0xff] %vm913_vm1, %v906_v7  ;;  %v1012_v61 = vpop.permute.xlu1 %1011  ;;  %1289 = vperm.xlu1 %3541, %v4163_v29  }
 0x2bd   :  { %v959_v32 = vpop.permute.xlu0 %958 }
 0x2be   :  { %969 = vst.msk [vmem:[#allocation3 + $0x10] sm:$0xff] %vm966_vm2, %v959_v32  ;;  %v1065_v18 = vpop.permute.xlu1 %1064  ;;  %v1131_v11 = vld [vmem:[#allocation3 + $0x8] sm:$0xff]  ;;  %1294 = vperm.xlu1 %3541, %v4170_v30  }
 0x2bf   :  { %1022 = vst.msk [vmem:[#allocation3 + $0x10] sm:$0xff] %vm1019_vm3, %v1012_v61  ;;  %3361 = vmatmul.mubr.msk.f32.vlgmr.msra.gmra.mxu1 %vm1134_vm6, %v1131_v11 }
 0x2c0   :  { %1075 = vst.msk [vmem:[#allocation3 + $0x10] sm:$0xff] %vm1072_vm4, %v1065_v18 }
 0x2c1   :  { %v1120_v62 = vpop.permute.xlu0 %1119 }
 0x2c2   :  { %1129 = vst.msk [vmem:[#allocation3 + $0x18] sm:$0xff] %vm1125_vm5, %v1120_v62  ;;  %v1118_v3 = vpop.permute.xlu1 %1117  ;;  %3542 = vset.pattern.permute.xlu1 %v5128_v1 }
 0x2c3   :  { %1128 = vst.msk [vmem:[#allocation3 + $0x10] sm:$0xff] %vm1125_vm5, %v1118_v3 }
 0x2c9   :  { %v1133_v36 = vld [vmem:[#allocation3 + $0x18] sm:$0xff] }
 0x2ca   :  { %v1132_v59 = vld [vmem:[#allocation3 + $0x10] sm:$0xff] }
 0x2cb   :  { %3363 = vmatprep.mubr.msk.f32.mxu1 %vm1134_vm6, %v1132_v59 }
 0x2cc   :  { %3364 = vmatmul.mubr.msk.f32.gmra.mxu1 %vm1134_vm6, %v1133_v36 }
 0x2ce   :  { %v1326_v48 = vpop.permute.xlu0 %1325 }
 0x2cf   :  { %v4272_v60 = vpop.permute.xlu1 %1320 }
 0x2d2   :  { %v4292_v23 = vpop.permute.xlu0 %1330 }
 0x2d4   :  { %v4274_v63 = vpop.permute.xlu1 %1372 }
 0x2d6   :  { %v4296_v38 = vpop.permute.xlu0 %1335 }
 0x2d8   :  { %v4276_v4 = vpop.permute.xlu1 %1377 }
 0x2db   :  { %v4300_v54 = vpop.permute.xlu0 %1424 }
 0x2dd   :  { %v4278_v28 = vpop.permute.xlu1 %1429 }
 0x2df   :  { %v4304_v19 = vpop.permute.xlu0 %1434 }
 0x2e2   :  { %v4280_v22 = vpop.permute.xlu1 %1476 }
 0x2e3   :  { %v4308_v25 = vpop.permute.xlu0 %1439 }
 0x2e6   :  { %v1482_v20 = vpop.permute.xlu1 %1481 }
 0x2e8   :  { %v4312_v45 = vpop.permute.xlu0 %1533 }
 0x2eb   :  { %v4282_v8 = vpop.permute.xlu1 %1528 }
 0x2ec   :  { %v4316_v46 = vpop.permute.xlu0 %1538 }
 0x2f0   :  { %v4284_v42 = vpop.permute.xlu1 %1382 }
 0x2f1   :  { %v4320_v51 = vpop.permute.xlu0 %1590 }
 0x2f5   :  { %v4286_v34 = vpop.permute.xlu1 %1580 }
 0x2f6   :  { %v4330_v6 = vpop.permute.xlu0 %1637 }
 0x2fa   :  { %v4288_v35 = vpop.permute.xlu1 %1387  ;;  %v4337_v59 = vpop.permute.xlu0 %1647 }
 0x2ff   :  { %v4290_v58 = vpop.permute.xlu1 %1585  ;;  %v1285_v50 = vpop.permute.xlu0 %1284 }
 0x304   :  { %v4294_v5 = vpop.permute.xlu1 %1632 }
 0x309   :  { %v4298_v52 = vpop.permute.xlu1 %1486 }
 0x30e   :  { %v4302_v43 = vpop.permute.xlu1 %1684 }
 0x313   :  { %v4306_v44 = vpop.permute.xlu1 %1491 }
 0x318   :  { %v4310_v24 = vpop.permute.xlu1 %1689 }
 0x31d   :  { %v4314_v27 = vpop.permute.xlu1 %1543 }
 0x322   :  { %v4318_v47 = vpop.permute.xlu1 %1595 }
 0x327   :  { %v4322_v57 = vpop.permute.xlu1 %1642 }
 0x32c   :  { %v4332_v7 = vpop.permute.xlu1 %1694 }
 0x330   :  { %v4335_v3 = vpop.permute.xlu1 %1699 }
 0x335   :  { %v1290_v9 = vpop.permute.xlu1 %1289 }
 0x37f   :  { %v3362_v53 = vpop.f32.mrf.mxu1 }
 0x380   :  { %v1239_v21 = vmul.f32 %v3362_v53, %v3200_v49 }
 0x381   :  { %v1213_v31 = vpop.f32.mrf.mxu1 }
 0x382   :  { %v1249_v61 = vadd.f32 %v3201_v41, %v1239_v21  ;;  %v1238_v32 = vmul.f32 %v3200_v49, %v1213_v31 }
 0x384   :  { %v1253_v18 = vmax.f32 %v1249_v61, 0.0  ;;  %v1248_v11 = vadd.f32 %v3201_v41, %v1238_v32 }
 0x386   :  { %1271 = vst.msk [vmem:[#allocation2 + $0xd] sm:$0xff] %vm41_vm0, %v1253_v18  ;;  %v1252_v62 = vmax.f32 %v1248_v11, 0.0 }
 0x388   :  { %1270 = vst.msk [vmem:[#allocation2 + $0x5] sm:$0xff] %vm41_vm0, %v1252_v62 }
 0x38c   :  { %v3365_v36 = vpop.f32.mrf.mxu1 }
 0x38d   :  { %v1241_v53 = vmul.f32 %v3365_v36, %v3200_v49  ;;  %v1467_v2 = vld [vmem:[#allocation2 + $0xd] sm:$0xff] }
 0x38e   :  { %v1223_v39 = vpop.f32.mrf.mxu1  ;;  %v1495_v17 = vmul.f32 %v1482_v20, %v1467_v2 }
 0x38f   :  { %v1251_v21 = vadd.f32 %v3201_v41, %v1241_v53  ;;  %v1240_v31 = vmul.f32 %v3200_v49, %v1223_v39  ;;  %v1275_v61 = vld [vmem:[#allocation2 + $0x8] sm:$0xff]  ;;  %v1274_v32 = vld [vmem:[#allocation2] sm:$0xff] }
 0x390   :  { %v1311_v1 = vld [vmem:[#allocation2 + $0x9] sm:$0xff]  ;;  %v1303_v18 = vmul.f32 %v1290_v9, %v1275_v61  ;;  %v1302_v11 = vmul.f32 %v1285_v50, %v1274_v32  ;;  %1504 = vrot.lane.b32.xlu1 %v1495_v17, %s3610_s13  ;;  %v1310_v15 = vld [vmem:[#allocation2 + $0x1] sm:$0xff] }
 0x391   :  { %v1339_v16 = vmul.f32 %v1326_v48, %v1311_v1  ;;  %v1255_v14 = vmax.f32 %v1251_v21, 0.0  ;;  %v1250_v62 = vadd.f32 %v3201_v41, %v1240_v31  ;;  %v1363_v13 = vld [vmem:[#allocation2 + $0xa] sm:$0xff]  ;;  %v1338_v39 = vmul.f32 %v4272_v60, %v1310_v15  ;;  %v1362_v9 = vld [vmem:[#allocation2 + $0x2] sm:$0xff]  ;;  %v1300_v60 = vpop.permute.xlu0 %1299 }
 0x392   :  { %1307 = vst.msk [vmem:[#allocation3 + $0x8] sm:$0xff] %vm41_vm0, %v1303_v18  ;;  %1306 = vst.msk [vmem:[#allocation3] sm:$0xff] %vm41_vm0, %v1302_v11  ;;  %v1391_v17 = vmul.f32 %v4276_v4, %v1363_v13  ;;  %v1415_v50 = vld [vmem:[#allocation2 + $0xc] sm:$0xff]  ;;  %v1390_v20 = vmul.f32 %v4274_v63, %v1362_v9  ;;  %v1414_v48 = vld [vmem:[#allocation2 + $0x4] sm:$0xff]  ;;  %v1598_v31 = vmul.f32 %v4286_v34, %v1275_v61 }
 0x393   :  { %1348 = vrot.lane.b32.xlu0 %v1339_v16, %s3604_s19  ;;  %1273 = vst.msk [vmem:[#allocation2 + $0x1d] sm:$0xff] %vm41_vm0, %v1255_v14  ;;  %v1254_v2 = vmax.f32 %v1250_v62, 0.0  ;;  %v1443_v15 = vmul.f32 %v4278_v28, %v1415_v50  ;;  %v1518_v16 = vld [vmem:[#allocation2 + $0x6] sm:$0xff]  ;;  %v1295_v14 = vpop.permute.xlu1 %1294  ;;  %v1442_v49 = vmul.f32 %v4300_v54, %v1414_v48  ;;  %v1650_v18 = vmul.f32 %v4294_v5, %v1311_v1  ;;  %v3204_v48 = vld [vmem:[%s5114_s5 + $0x58] sm:$0xff] }
 0x394   :  { %1346 = vrot.lane.b32.xlu1 %v1338_v39, %s3604_s19  ;;  %v1466_v4 = vld [vmem:[#allocation2 + $0x5] sm:$0xff]  ;;  %v1546_v63 = vmul.f32 %v4282_v8, %v1518_v16  ;;  %v1702_v34 = vmul.f32 %v4302_v43, %v1363_v13 }
 0x395   :  { %1272 = vst.msk [vmem:[#allocation2 + $0x15] sm:$0xff] %vm41_vm0, %v1254_v2  ;;  %v1494_v28 = vmul.f32 %v4280_v22, %v1466_v4  ;;  %v3209_v43 = vld [vmem:[%s5114_s5 + $0x80] sm:$0xff]  ;;  %v3206_v9 = vld [vmem:[%s5114_s5 + $0x68] sm:$0xff] }
 0x396   :  { %v3205_v50 = vld [vmem:[%s5114_s5 + $0x60] sm:$0xff] }
 0x397   :  { %1400 = vrot.lane.b32.xlu0 %v1391_v17, %s3606_s21 }
 0x398   :  { %1398 = vrot.lane.b32.xlu1 %v1390_v20, %s3606_s21 }
 0x39a   :  { %v1469_v54 = vld [vmem:[#allocation2 + $0x1d] sm:$0xff] }
 0x39b   :  { %1452 = vrot.lane.b32.xlu0 %v1443_v15, %s3608_s23  ;;  %v1497_v8 = vmul.f32 %v4306_v44, %v1469_v54  ;;  %v3210_v44 = vld [vmem:[%s5114_s5 + $0x88] sm:$0xff]  ;;  %v1521_v61 = vld [vmem:[#allocation2 + $0x1e] sm:$0xff]  ;;  %v3203_v15 = vld [vmem:[%s5114_s5 + $0x50] sm:$0xff] }
 0x39c   :  { %v1276_v41 = vld [vmem:[#allocation2 + $0x10] sm:$0xff]  ;;  %v4355_v36 = vld [vmem:[#allocation2 + $0x18] sm:$0xff]  ;;  %1450 = vrot.lane.b32.xlu1 %v1442_v49, %s3608_s23  ;;  %3366 = vmatprep.subr.mxu0 %v3210_v44  ;;  %v1573_v62 = vld [vmem:[#allocation2 + $0x20] sm:$0xff] }
 0x39d   :  { %v1304_v53 = vmul.f32 %v1295_v14, %v1276_v41  ;;  %v1305_v21 = vmul.f32 %v1300_v60, %v4355_v36  ;;  %v4368_v32 = vld [vmem:[#allocation2 + $0x19] sm:$0xff]  ;;  %v1519_v11 = vld [vmem:[#allocation2 + $0xe] sm:$0xff]  ;;  %3367 = vmatpush3.msra.mxu0 %v3210_v44  ;;  %v1601_v39 = vmul.f32 %v4318_v47, %v1573_v62  ;;  %v1625_v2 = vld [vmem:[#allocation2 + $0x21] sm:$0xff] }
 0x39e   :  { %v1341_v22 = vmul.f32 %v4296_v38, %v4368_v32  ;;  %v1547_v1 = vmul.f32 %v4312_v45, %v1519_v11  ;;  %v4382_v5 = vld [vmem:[#allocation2 + $0x1a] sm:$0xff]  ;;  %v1549_v38 = vmul.f32 %v4314_v27, %v1521_v61  ;;  %3368 = vmatprep.subr.mxu0 %v3209_v43  ;;  %v3207_v27 = vld [vmem:[%s5114_s5 + $0x70] sm:$0xff]  ;;  %v1653_v47 = vmul.f32 %v4337_v59, %v1625_v2  ;;  %v3202_v14 = vld [vmem:[%s5114_s5 + $0x48] sm:$0xff] }
 0x39f   :  { %1554 = vrot.lane.b32.xlu0 %v1546_v63, %s3611_s3  ;;  %1308 = vst.msk [vmem:[#allocation3 + $0x10] sm:$0xff] %vm41_vm0, %v1304_v53  ;;  %1309 = vst.msk [vmem:[#allocation3 + $0x18] sm:$0xff] %vm41_vm0, %v1305_v21  ;;  %v1393_v13 = vmul.f32 %v4288_v35, %v4382_v5  ;;  %v3208_v45 = vld [vmem:[%s5114_s5 + $0x78] sm:$0xff]  ;;  %3369 = vmatpush3.msra.mxu0 %v3209_v43  ;;  %v1599_v35 = vmul.f32 %v4290_v58, %v1276_v41  ;;  %v1677_v53 = vld [vmem:[#allocation2 + $0x22] sm:$0xff] }
 0x3a0   :  { %1502 = vrot.lane.b32.xlu1 %v1494_v28, %s3610_s13  ;;  %3370 = vmatprep.subr.mxu0 %v3208_v45  ;;  %v1417_v17 = vld [vmem:[#allocation2 + $0x1c] sm:$0xff]  ;;  %v1312_v20 = vld [vmem:[#allocation2 + $0x11] sm:$0xff]  ;;  %v1600_v41 = vmul.f32 %v4320_v51, %v4355_v36  ;;  %v1704_v51 = vmul.f32 %v4332_v7, %v4382_v5  ;;  %v5144_v7 = vmov 7   ;;  %v5145_v36 = vmov 0  }
 0x3a1   :  { %3371 = vmatpush3.msra.mxu0 %v3208_v45  ;;  %v1445_v58 = vmul.f32 %v4308_v25, %v1417_v17  ;;  %v1340_v59 = vmul.f32 %v4292_v23, %v1312_v20  ;;  %v1364_v16 = vld [vmem:[#allocation2 + $0x12] sm:$0xff]  ;;  %v1651_v25 = vmul.f32 %v4330_v6, %v1312_v20 }
 0x3a2   :  { %3372 = vmatprep.subr.mxu0 %v3207_v27  ;;  %v1392_v23 = vmul.f32 %v4284_v42, %v1364_v16  ;;  %v1416_v60 = vld [vmem:[#allocation2 + $0x14] sm:$0xff]  ;;  %v1703_v49 = vmul.f32 %v4310_v24, %v1364_v16  ;;  %v1652_v24 = vmul.f32 %v4322_v57, %v4368_v32  ;;  %v5143_v57 = vmov 6  }
 0x3a3   :  { %1606 = vrot.lane.b32.xlu0 %v1598_v31, %s3612_s4  ;;  %3373 = vmatpush3.msra.mxu0 %v3207_v27  ;;  %v1444_v6 = vmul.f32 %v4304_v19, %v1416_v60  ;;  %v1468_v4 = vld [vmem:[#allocation2 + $0x15] sm:$0xff] }
 0x3a4   :  { %1508 = vrot.lane.b32.xlu1 %v1497_v8, %s3610_s13  ;;  %3374 = vmatprep.subr.mxu0 %v3206_v9  ;;  %v1496_v42 = vmul.f32 %v4298_v52, %v1468_v4  ;;  %v1520_v63 = vld [vmem:[#allocation2 + $0x16] sm:$0xff]  ;;  %v1705_v52 = vmul.f32 %v4335_v3, %v1677_v53  ;;  %v5146_v8 = vmov 1  }
 0x3a5   :  { %3375 = vmatpush3.msra.mxu0 %v3206_v9  ;;  %v1548_v19 = vmul.f32 %v4316_v46, %v1520_v63  ;;  %v5142_v46 = vmov 5  }
 0x3a6   :  { %3376 = vmatprep.subr.mxu0 %v3205_v50 }
 0x3a7   :  { %1658 = vrot.lane.b32.xlu0 %v1650_v18, %s3613_s22  ;;  %3377 = vmatpush3.msra.mxu0 %v3205_v50 }
 0x3a8   :  { %1352 = vrot.lane.b32.xlu1 %v1341_v22, %s3604_s19  ;;  %3378 = vmatprep.subr.mxu0 %v3204_v48  ;;  %v5147_v22 = vmov 8  }
 0x3a9   :  { %3379 = vmatpush3.msra.mxu0 %v3204_v48 }
 0x3aa   :  { %3380 = vmatprep.subr.mxu0 %v3203_v15 }
 0x3ab   :  { %1710 = vrot.lane.b32.xlu0 %v1702_v34, %s3614_s24  ;;  %3381 = vmatpush3.msra.mxu0 %v3203_v15 }
 0x3ac   :  { %1556 = vrot.lane.b32.xlu1 %v1547_v1, %s3611_s3  ;;  %3382 = vmatprep.subr.mxu0 %v3202_v14 }
 0x3ad   :  { %3383 = vmatpush3.msra.mxu0 %v3202_v14 }
 0x3af   :  { %1560 = vrot.lane.b32.xlu0 %v1549_v38, %s3611_s3 }
 0x3b0   :  { %1404 = vrot.lane.b32.xlu1 %v1393_v13, %s3606_s21 }
 0x3b3   :  { %1612 = vrot.lane.b32.xlu0 %v1601_v39, %s3612_s4 }
 0x3b4   :  { %1608 = vrot.lane.b32.xlu1 %v1599_v35, %s3612_s4 }
 0x3b7   :  { %1664 = vrot.lane.b32.xlu0 %v1653_v47, %s3613_s22 }
 0x3b8   :  { %1456 = vrot.lane.b32.xlu1 %v1445_v58, %s3608_s23 }
 0x3bb   :  { %1350 = vrot.lane.b32.xlu0 %v1340_v59, %s3604_s19 }
 0x3bc   :  { %1660 = vrot.lane.b32.xlu1 %v1651_v25, %s3613_s22 }
 0x3bf   :  { %1402 = vrot.lane.b32.xlu0 %v1392_v23, %s3606_s21 }
 0x3c0   :  { %1712 = vrot.lane.b32.xlu1 %v1703_v49, %s3614_s24 }
 0x3c3   :  { %1454 = vrot.lane.b32.xlu0 %v1444_v6, %s3608_s23 }
 0x3c4   :  { %1610 = vrot.lane.b32.xlu1 %v1600_v41, %s3612_s4 }
 0x3c7   :  { %1506 = vrot.lane.b32.xlu0 %v1496_v42, %s3610_s13 }
 0x3c8   :  { %1662 = vrot.lane.b32.xlu1 %v1652_v24, %s3613_s22 }
 0x3cb   :  { %1558 = vrot.lane.b32.xlu0 %v1548_v19, %s3611_s3 }
 0x3cc   :  { %1714 = vrot.lane.b32.xlu1 %v1704_v51, %s3614_s24 }
 0x3cf   :  { %1716 = vrot.lane.b32.xlu0 %v1705_v52, %s3614_s24 }
 0x3d0   :  { %1919 = vperm.xlu1 %3542, %v4158_v26  }
 0x3d3   :  { %1924 = vperm.xlu0 %3543, %v4163_v29  }
 0x3d4   :  { %3544 = vset.pattern.permute.xlu1 %v3593_v0 }
 0x3d5   :  { %1971 = vperm.xlu1 %3544, %v4158_v26  }
 0x3d7   :  { %1929 = vperm.xlu0 %3543, %v4170_v30  }
 0x3d9   :  { %1976 = vperm.xlu1 %3544, %v4163_v29  }
 0x3db   :  { %1934 = vperm.xlu0 %3543, %v4178_v33  }
 0x3dd   :  { %3545 = vset.pattern.permute.xlu1 %v3596_v10 }
 0x3de   :  { %2028 = vperm.xlu1 %3545, %v4163_v29  }
 0x3df   :  { %3548 = vset.pattern.permute.xlu0 %v3596_v10 }
 0x3e0   :  { %2023 = vperm.xlu0 %3548, %v4158_v26  }
 0x3e2   :  { %3546 = vset.pattern.permute.xlu1 %v5140_v12 }
 0x3e3   :  { %2075 = vperm.xlu1 %3546, %v4158_v26  }
 0x3e4   :  { %2033 = vperm.xlu0 %3548, %v4170_v30  }
 0x3e7   :  { %2080 = vperm.xlu1 %3546, %v4163_v29  }
 0x3e8   :  { %2038 = vperm.xlu0 %3548, %v4178_v33  }
 0x3eb   :  { %3547 = vset.pattern.permute.xlu1 %v5142_v46 }
 0x3ec   :  { %3554 = vset.pattern.permute.xlu0 %v5142_v46  ;;  %2127 = vperm.xlu1 %3547, %v4158_v26  }
 0x3ed   :  { %2132 = vperm.xlu0 %3554, %v4163_v29  }
 0x3f0   :  { %3549 = vset.pattern.permute.xlu1 %v3593_v0 }
 0x3f1   :  { %2137 = vperm.xlu0 %3554, %v4170_v30   ;;  %1981 = vperm.xlu1 %3549, %v4170_v30  }
 0x3f5   :  { %3560 = vset.pattern.permute.xlu0 %v5143_v57  ;;  %3550 = vset.pattern.permute.xlu1 %v5143_v57 }
 0x3f6   :  { %2189 = vperm.xlu0 %3560, %v4170_v30   ;;  %2179 = vperm.xlu1 %3550, %v4158_v26  }
 0x3fa   :  { %3561 = vset.pattern.permute.xlu0 %v5144_v7  ;;  %3551 = vset.pattern.permute.xlu1 %v3593_v0 }
 0x3fb   :  { %2236 = vperm.xlu0 %3561, %v4163_v29   ;;  %1986 = vperm.xlu1 %3551, %v4178_v33  }
 0x3ff   :  { %2246 = vperm.xlu0 %3561, %v4178_v33   ;;  %3552 = vset.pattern.permute.xlu1 %v5143_v57 }
 0x400   :  { %2184 = vperm.xlu1 %3552, %v4163_v29  }
 0x402   :  { %v1505_v3 = vpop.permute.xlu1 %1504 }
 0x403   :  { %3565 = vset.pattern.permute.xlu0 %v5145_v36 }
 0x404   :  { %1883 = vperm.xlu0 %3565, %v4158_v26   ;;  %3553 = vset.pattern.permute.xlu1 %v5144_v7 }
 0x405   :  { %v1349_v21 = vpop.permute.xlu0 %1348  ;;  %2231 = vperm.xlu1 %3553, %v4158_v26  }
 0x406   :  { %1359 = vst.msk [vmem:[#allocation3 + $0x8] sm:$0xff] %vm754_vm13, %v1349_v21  ;;  %v1347_v28 = vpop.permute.xlu1 %1346 }
 0x407   :  { %1358 = vst.msk [vmem:[#allocation3] sm:$0xff] %vm754_vm13, %v1347_v28 }
 0x408   :  { %1898 = vperm.xlu0 %3565, %v4178_v33  }
 0x409   :  { %v1401_v54 = vpop.permute.xlu0 %1400  ;;  %3555 = vset.pattern.permute.xlu1 %v5140_v12 }
 0x40a   :  { %1411 = vst.msk [vmem:[#allocation3 + $0x8] sm:$0xff] %vm807_vm14, %v1401_v54  ;;  %v1399_v31 = vpop.permute.xlu1 %1398  ;;  %2085 = vperm.xlu1 %3555, %v4170_v30  }
 0x40b   :  { %1410 = vst.msk [vmem:[#allocation3] sm:$0xff] %vm807_vm14, %v1399_v31 }
 0x40c   :  { %3568 = vset.pattern.permute.xlu0 %v5146_v8 }
 0x40d   :  { %v1453_v32 = vpop.permute.xlu0 %1452 }
 0x40e   :  { %1463 = vst.msk [vmem:[#allocation3 + $0x8] sm:$0xff] %vm860_vm15, %v1453_v32  ;;  %v1451_v18 = vpop.permute.xlu1 %1450  ;;  %3556 = vset.pattern.permute.xlu1 %v5147_v22 }
 0x40f   :  { %1515 = vst.msk [vmem:[#allocation3 + $0x8] sm:$0xff] %vm913_vm1, %v1505_v3  ;;  %2283 = vperm.xlu1 %3556, %v4158_v26  }
 0x410   :  { %1462 = vst.msk [vmem:[#allocation3] sm:$0xff] %vm860_vm15, %v1451_v18 }
 0x411   :  { %v1555_v11 = vpop.permute.xlu0 %1554 }
 0x412   :  { %v1503_v34 = vpop.permute.xlu1 %1502 }
 0x413   :  { %1514 = vst.msk [vmem:[#allocation3] sm:$0xff] %vm913_vm1, %v1503_v34  ;;  %3557 = vset.pattern.permute.xlu1 %v5140_v12 }
 0x414   :  { %1566 = vst.msk [vmem:[#allocation3] sm:$0xff] %vm966_vm2, %v1555_v11  ;;  %2090 = vperm.xlu1 %3557, %v4178_v33  }
 0x415   :  { %v1607_v44 = vpop.permute.xlu0 %1606 }
 0x416   :  { %1618 = vst.msk [vmem:[#allocation3] sm:$0xff] %vm1019_vm3, %v1607_v44  ;;  %v1509_v61 = vpop.permute.xlu1 %1508 }
 0x418   :  { %3558 = vset.pattern.permute.xlu1 %v5147_v22 }
 0x419   :  { %v1659_v1 = vpop.permute.xlu0 %1658  ;;  %2288 = vperm.xlu1 %3558, %v4163_v29  }
 0x41a   :  { %1670 = vst.msk [vmem:[#allocation3] sm:$0xff] %vm1072_vm4, %v1659_v1  ;;  %v1353_v26 = vpop.permute.xlu1 %1352  ;;  %v3217_v1 = vld [vmem:[%s5115_s6 + $0x1] ss:$0 sm:$0xff] }
 0x41b   :  { %1361 = vst.msk [vmem:[#allocation3 + $0x18] sm:$0xff] %vm754_vm13, %v1353_v26 }
 0x41d   :  { %v1711_v5 = vpop.permute.xlu0 %1710  ;;  %3559 = vset.pattern.permute.xlu1 %v5142_v46 }
 0x41e   :  { %1722 = vst.msk [vmem:[#allocation3] sm:$0xff] %vm1125_vm5, %v1711_v5  ;;  %v1557_v38 = vpop.permute.xlu1 %1556  ;;  %2142 = vperm.xlu1 %3559, %v4178_v33   ;;  %v3218_v5 = vld [vmem:[%s5116_s7 + $0x1] ss:$0 sm:$0xff] }
 0x41f   :  { %1567 = vst.msk [vmem:[#allocation3 + $0x8] sm:$0xff] %vm966_vm2, %v1557_v38 }
 0x421   :  { %v1561_v62 = vpop.permute.xlu0 %1560 }
 0x422   :  { %v1405_v13 = vpop.permute.xlu1 %1404  ;;  %3562 = vset.pattern.permute.xlu1 %v5143_v57 }
 0x423   :  { %1413 = vst.msk [vmem:[#allocation3 + $0x18] sm:$0xff] %vm807_vm14, %v1405_v13  ;;  %2194 = vperm.xlu1 %3562, %v4178_v33  }
 0x425   :  { %v1613_v43 = vpop.permute.xlu0 %1612  ;;  %v1726_v45 = vld [vmem:[#allocation3] sm:$0xff] }
 0x426   :  { %3384 = vmatprep.mubr.msk.f32.mxu0 %vm1134_vm6, %v1726_v45  ;;  %v1609_v39 = vpop.permute.xlu1 %1608 }
 0x427   :  { %1619 = vst.msk [vmem:[#allocation3 + $0x8] sm:$0xff] %vm1019_vm3, %v1609_v39  ;;  %3563 = vset.pattern.permute.xlu1 %v5144_v7 }
 0x428   :  { %2241 = vperm.xlu1 %3563, %v4170_v30  }
 0x429   :  { %v1665_v27 = vpop.permute.xlu0 %1664 }
 0x42a   :  { %v1457_v2 = vpop.permute.xlu1 %1456 }
 0x42b   :  { %1465 = vst.msk [vmem:[#allocation3 + $0x18] sm:$0xff] %vm860_vm15, %v1457_v2  ;;  %v5148_v2 = vmax.f32 %v4023_v37, 0.0 }
 0x42c   :  { %1517 = vst.msk [vmem:[#allocation3 + $0x18] sm:$0xff] %vm913_vm1, %v1509_v61  ;;  %3564 = vset.pattern.permute.xlu1 %v5147_v22 }
 0x42d   :  { %v1351_v35 = vpop.permute.xlu0 %1350  ;;  %1569 = vst.msk [vmem:[#allocation3 + $0x18] sm:$0xff] %vm966_vm2, %v1561_v62  ;;  %2293 = vperm.xlu1 %3564, %v4170_v30  }
 0x42e   :  { %1360 = vst.msk [vmem:[#allocation3 + $0x10] sm:$0xff] %vm754_vm13, %v1351_v35  ;;  %v1661_v9 = vpop.permute.xlu1 %1660 }
 0x42f   :  { %1621 = vst.msk [vmem:[#allocation3 + $0x18] sm:$0xff] %vm1019_vm3, %v1613_v43 }
 0x430   :  { %1673 = vst.msk [vmem:[#allocation3 + $0x18] sm:$0xff] %vm1072_vm4, %v1665_v27  ;;  %1671 = vst.msk [vmem:[#allocation3 + $0x8] sm:$0xff] %vm1072_vm4, %v1661_v9 }
 0x431   :  { %v1403_v17 = vpop.permute.xlu0 %1402  ;;  %2298 = vperm.xlu1 %3564, %v4178_v33  }
 0x432   :  { %1412 = vst.msk [vmem:[#allocation3 + $0x10] sm:$0xff] %vm807_vm14, %v1403_v17  ;;  %v1713_v47 = vpop.permute.xlu1 %1712 }
 0x433   :  { %1723 = vst.msk [vmem:[#allocation3 + $0x8] sm:$0xff] %vm1125_vm5, %v1713_v47  ;;  %v5149_v47 = vmax.f32 %v4026_v40, 0.0 }
 0x435   :  { %v1455_v50 = vpop.permute.xlu0 %1454  ;;  %3566 = vset.pattern.permute.xlu1 %v5145_v36 }
 0x436   :  { %1464 = vst.msk [vmem:[#allocation3 + $0x10] sm:$0xff] %vm860_vm15, %v1455_v50  ;;  %v1611_v20 = vpop.permute.xlu1 %1610  ;;  %1888 = vperm.xlu1 %3566, %v4163_v29  }
 0x439   :  { %v1507_v58 = vpop.permute.xlu0 %1506 }
 0x43a   :  { %1516 = vst.msk [vmem:[#allocation3 + $0x10] sm:$0xff] %vm913_vm1, %v1507_v58  ;;  %v1663_v48 = vpop.permute.xlu1 %1662  ;;  %v1727_v59 = vld [vmem:[#allocation3 + $0x8] sm:$0xff]  ;;  %1893 = vperm.xlu1 %3566, %v4170_v30  }
 0x43b   :  { %3385 = vmatmul.mubr.msk.f32.vlgmr.msra.gmra.mxu0 %vm1134_vm6, %v1727_v59 }
 0x43d   :  { %v1559_v33 = vpop.permute.xlu0 %1558 }
 0x43e   :  { %1568 = vst.msk [vmem:[#allocation3 + $0x10] sm:$0xff] %vm966_vm2, %v1559_v33  ;;  %v1715_v15 = vpop.permute.xlu1 %1714  ;;  %3567 = vset.pattern.permute.xlu1 %v5146_v8 }
 0x43f   :  { %1620 = vst.msk [vmem:[#allocation3 + $0x10] sm:$0xff] %vm1019_vm3, %v1611_v20 }
 0x440   :  { %1672 = vst.msk [vmem:[#allocation3 + $0x10] sm:$0xff] %vm1072_vm4, %v1663_v48 }
 0x441   :  { %1724 = vst.msk [vmem:[#allocation3 + $0x10] sm:$0xff] %vm1125_vm5, %v1715_v15  ;;  %v1717_v29 = vpop.permute.xlu0 %1716 }
 0x442   :  { %1725 = vst.msk [vmem:[#allocation3 + $0x18] sm:$0xff] %vm1125_vm5, %v1717_v29 }
 0x448   :  { %v1728_v16 = vld [vmem:[#allocation3 + $0x10] sm:$0xff] }
 0x449   :  { %3387 = vmatprep.mubr.msk.f32.mxu0 %vm1134_vm6, %v1728_v16  ;;  %v1729_v30 = vld [vmem:[#allocation3 + $0x18] sm:$0xff] }
 0x44a   :  { %3388 = vmatmul.mubr.msk.f32.gmra.mxu0 %vm1134_vm6, %v1729_v30 }
 0x44b   :  { %v4544_v25 = vpop.permute.xlu1 %1919 }
 0x44e   :  { %v1925_v24 = vpop.permute.xlu0 %1924 }
 0x450   :  { %v4546_v14 = vpop.permute.xlu1 %1971 }
 0x452   :  { %v4564_v53 = vpop.permute.xlu0 %1929 }
 0x454   :  { %v4548_v23 = vpop.permute.xlu1 %1976 }
 0x456   :  { %v4568_v52 = vpop.permute.xlu0 %1934 }
 0x459   :  { %v4550_v60 = vpop.permute.xlu1 %2028 }
 0x45b   :  { %v4572_v21 = vpop.permute.xlu0 %2023 }
 0x45e   :  { %v4552_v49 = vpop.permute.xlu1 %2075 }
 0x45f   :  { %v4576_v54 = vpop.permute.xlu0 %2033 }
 0x462   :  { %v2081_v6 = vpop.permute.xlu1 %2080 }
 0x463   :  { %v4580_v8 = vpop.permute.xlu0 %2038 }
 0x467   :  { %v4554_v4 = vpop.permute.xlu1 %2127 }
 0x468   :  { %v4584_v18 = vpop.permute.xlu0 %2132 }
 0x46c   :  { %v4556_v41 = vpop.permute.xlu1 %1981  ;;  %v4588_v34 = vpop.permute.xlu0 %2137 }
 0x471   :  { %v4558_v42 = vpop.permute.xlu1 %2179  ;;  %v4592_v61 = vpop.permute.xlu0 %2189 }
 0x476   :  { %v4560_v63 = vpop.permute.xlu1 %1986  ;;  %v4602_v39 = vpop.permute.xlu0 %2236 }
 0x47a   :  { %v4619_v58 = vpop.permute.xlu0 %2246 }
 0x47b   :  { %v4562_v19 = vpop.permute.xlu1 %2184 }
 0x47f   :  { %v1884_v33 = vpop.permute.xlu0 %1883 }
 0x480   :  { %v4566_v51 = vpop.permute.xlu1 %2231 }
 0x485   :  { %v4570_v3 = vpop.permute.xlu1 %2085 }
 0x48a   :  { %v4574_v28 = vpop.permute.xlu1 %2283 }
 0x48f   :  { %v4578_v31 = vpop.permute.xlu1 %2090 }
 0x494   :  { %v4582_v32 = vpop.permute.xlu1 %2288 }
 0x499   :  { %v4586_v11 = vpop.permute.xlu1 %2142 }
 0x49e   :  { %v4590_v44 = vpop.permute.xlu1 %2194 }
 0x4a3   :  { %v4597_v26 = vpop.permute.xlu1 %2241 }
 0x4a8   :  { %v4604_v27 = vpop.permute.xlu1 %2293 }
 0x4ac   :  { %v4621_v48 = vpop.permute.xlu1 %2298 }
 0x4b1   :  { %v1889_v15 = vpop.permute.xlu1 %1888 }
 0x4fb   :  { %v3386_v38 = vpop.f32.mrf.mxu0 }
 0x4fc   :  { %v1834_v62 = vmul.f32 %v3386_v38, %v3217_v1 }
 0x4fd   :  { %v1808_v13 = vpop.f32.mrf.mxu0 }
 0x4fe   :  { %v1844_v43 = vadd.f32 %v3218_v5, %v1834_v62  ;;  %v1833_v45 = vmul.f32 %v3217_v1, %v1808_v13 }
 0x500   :  { %v4608_v35 = vadd.f32 %v1844_v43, %v5148_v2  ;;  %v1843_v9 = vadd.f32 %v3218_v5, %v1833_v45  ;;  %v5150_v45 = vmax.f32 %v4049_v55, 0.0 }
 0x502   :  { %v5138_v17 = vmax.f32 %v4608_v35, 0.0  ;;  %v4613_v50 = vadd.f32 %v1843_v9, %v5149_v47 }
 0x504   :  { %1870 = vst.msk [vmem:[#allocation2 + $0xd] sm:$0xff] %vm41_vm0, %v5138_v17  ;;  %v5139_v20 = vmax.f32 %v4613_v50, 0.0 }
 0x506   :  { %1869 = vst.msk [vmem:[#allocation2 + $0x5] sm:$0xff] %vm41_vm0, %v5139_v20 }
 0x50a   :  { %v3389_v37 = vpop.f32.mrf.mxu0 }
 0x50b   :  { %v1836_v59 = vmul.f32 %v3389_v37, %v3217_v1  ;;  %v2066_v29 = vld [vmem:[#allocation2 + $0xd] sm:$0xff] }
 0x50c   :  { %v1818_v40 = vpop.f32.mrf.mxu0  ;;  %v2094_v38 = vmul.f32 %v2081_v6, %v2066_v29  ;;  %v1899_v29 = vpop.permute.xlu0 %1898 }
 0x50d   :  { %v1846_v16 = vadd.f32 %v3218_v5, %v1836_v59  ;;  %v1835_v30 = vmul.f32 %v3217_v1, %v1818_v40  ;;  %v1874_v62 = vld [vmem:[#allocation2 + $0x8] sm:$0xff]  ;;  %v1873_v13 = vld [vmem:[#allocation2] sm:$0xff]  ;;  %v5151_v59 = vmax.f32 %v4054_v56, 0.0 }
 0x50e   :  { %v1910_v43 = vld [vmem:[#allocation2 + $0x9] sm:$0xff]  ;;  %v1902_v47 = vmul.f32 %v1889_v15, %v1874_v62  ;;  %v1901_v17 = vmul.f32 %v1884_v33, %v1873_v13  ;;  %2103 = vrot.lane.b32.xlu1 %v2094_v38, %s3610_s13  ;;  %v1909_v37 = vld [vmem:[#allocation2 + $0x1] sm:$0xff] }
 0x50f   :  { %v4628_v2 = vadd.f32 %v1846_v16, %v5150_v45  ;;  %v1845_v9 = vadd.f32 %v3218_v5, %v1835_v30  ;;  %v1938_v20 = vmul.f32 %v1925_v24, %v1910_v43  ;;  %v1937_v55 = vmul.f32 %v4544_v25, %v1909_v37  ;;  %v1962_v6 = vld [vmem:[#allocation2 + $0xa] sm:$0xff]  ;;  %v1961_v5 = vld [vmem:[#allocation2 + $0x2] sm:$0xff] }
 0x510   :  { %1906 = vst.msk [vmem:[#allocation3 + $0x8] sm:$0xff] %vm41_vm0, %v1902_v47  ;;  %1905 = vst.msk [vmem:[#allocation3] sm:$0xff] %vm41_vm0, %v1901_v17  ;;  %v1990_v56 = vmul.f32 %v4548_v23, %v1962_v6  ;;  %v1989_v25 = vmul.f32 %v4546_v14, %v1961_v5  ;;  %v2014_v17 = vld [vmem:[#allocation2 + $0xc] sm:$0xff]  ;;  %v1894_v23 = vpop.permute.xlu1 %1893 }
 0x511   :  { %v1854_v12 = vmax.f32 %v4628_v2, 0.0  ;;  %v4634_v1 = vadd.f32 %v1845_v9, %v5151_v59  ;;  %1947 = vrot.lane.b32.xlu0 %v1938_v20, %s3604_s19  ;;  %v2013_v20 = vld [vmem:[#allocation2 + $0x4] sm:$0xff]  ;;  %v2042_v33 = vmul.f32 %v4550_v60, %v2014_v17  ;;  %v2197_v9 = vmul.f32 %v4558_v42, %v1874_v62 }
 0x512   :  { %1945 = vrot.lane.b32.xlu1 %v1937_v55, %s3604_s19  ;;  %v2041_v40 = vmul.f32 %v4572_v21, %v2013_v20  ;;  %v2117_v15 = vld [vmem:[#allocation2 + $0x6] sm:$0xff]  ;;  %v2301_v42 = vmul.f32 %v4574_v28, %v1962_v6 }
 0x513   :  { %1872 = vst.msk [vmem:[#allocation2 + $0x1d] sm:$0xff] %vm41_vm0, %v1854_v12  ;;  %v1853_v24 = vmax.f32 %v4634_v1, 0.0  ;;  %v2065_v16 = vld [vmem:[#allocation2 + $0x5] sm:$0xff]  ;;  %v2145_v38 = vmul.f32 %v4554_v4, %v2117_v15  ;;  %v3220_v15 = vld [vmem:[%s5114_s5 + $0x98] sm:$0xff] }
 0x514   :  { %v2093_v60 = vmul.f32 %v4552_v49, %v2065_v16  ;;  %v2249_v49 = vmul.f32 %v4566_v51, %v1910_v43  ;;  %v3226_v6 = vld [vmem:[%s5114_s5 + $0xc8] sm:$0xff] }
 0x515   :  { %1871 = vst.msk [vmem:[#allocation2 + $0x15] sm:$0xff] %vm41_vm0, %v1853_v24  ;;  %1999 = vrot.lane.b32.xlu0 %v1990_v56, %s3606_s21 }
 0x516   :  { %1997 = vrot.lane.b32.xlu1 %v1989_v25, %s3606_s21  ;;  %v3223_v25 = vld [vmem:[%s5114_s5 + $0xb0] sm:$0xff] }
 0x519   :  { %2051 = vrot.lane.b32.xlu0 %v2042_v33, %s3608_s23 }
 0x51a   :  { %2049 = vrot.lane.b32.xlu1 %v2041_v40, %s3608_s23  ;;  %v2068_v21 = vld [vmem:[#allocation2 + $0x1d] sm:$0xff] }
 0x51b   :  { %v2096_v47 = vmul.f32 %v4578_v31, %v2068_v21  ;;  %v3227_v31 = vld [vmem:[%s5114_s5 + $0xd0] sm:$0xff]  ;;  %v2120_v55 = vld [vmem:[#allocation2 + $0x1e] sm:$0xff] }
 0x51c   :  { %v1875_v30 = vld [vmem:[#allocation2 + $0x10] sm:$0xff]  ;;  %v4656_v14 = vld [vmem:[#allocation2 + $0x18] sm:$0xff]  ;;  %3390 = vmatprep.subr.mxu1 %v3227_v31  ;;  %v2172_v43 = vld [vmem:[#allocation2 + $0x20] sm:$0xff] }
 0x51d   :  { %v1903_v13 = vmul.f32 %v1894_v23, %v1875_v30  ;;  %v1904_v45 = vmul.f32 %v1899_v29, %v4656_v14  ;;  %2153 = vrot.lane.b32.xlu0 %v2145_v38, %s3611_s3  ;;  %v4668_v4 = vld [vmem:[#allocation2 + $0x19] sm:$0xff]  ;;  %v2118_v59 = vld [vmem:[#allocation2 + $0xe] sm:$0xff]  ;;  %3391 = vmatpush3.msra.mxu1 %v3227_v31  ;;  %v2198_v5 = vmul.f32 %v4562_v19, %v1875_v30  ;;  %v2224_v56 = vld [vmem:[#allocation2 + $0x21] sm:$0xff] }
 0x51e   :  { %2101 = vrot.lane.b32.xlu1 %v2093_v60, %s3610_s13  ;;  %v1940_v37 = vmul.f32 %v4568_v52, %v4668_v4  ;;  %v2146_v62 = vmul.f32 %v4584_v18, %v2118_v59  ;;  %v4682_v51 = vld [vmem:[#allocation2 + $0x1a] sm:$0xff]  ;;  %v2148_v52 = vmul.f32 %v4586_v11, %v2120_v55  ;;  %3392 = vmatprep.subr.mxu1 %v3226_v6  ;;  %v1911_v33 = vld [vmem:[#allocation2 + $0x11] sm:$0xff]  ;;  %v5152_v60 = vmov 4  }
 0x51f   :  { %1907 = vst.msk [vmem:[#allocation3 + $0x10] sm:$0xff] %vm41_vm0, %v1903_v13  ;;  %1908 = vst.msk [vmem:[#allocation3 + $0x18] sm:$0xff] %vm41_vm0, %v1904_v45  ;;  %v1992_v28 = vmul.f32 %v4560_v63, %v4682_v51  ;;  %v3225_v18 = vld [vmem:[%s5114_s5 + $0xc0] sm:$0xff]  ;;  %3393 = vmatpush3.msra.mxu1 %v3226_v6  ;;  %v3224_v11 = vld [vmem:[%s5114_s5 + $0xb8] sm:$0xff]  ;;  %v2200_v63 = vmul.f32 %v4590_v44, %v2172_v43  ;;  %v2252_v20 = vmul.f32 %v4619_v58, %v2224_v56 }
 0x520   :  { %3394 = vmatprep.subr.mxu1 %v3225_v18  ;;  %v2016_v17 = vld [vmem:[#allocation2 + $0x1c] sm:$0xff]  ;;  %v3222_v44 = vld [vmem:[%s5114_s5 + $0xa8] sm:$0xff]  ;;  %v1939_v58 = vmul.f32 %v4564_v53, %v1911_v33  ;;  %v1963_v23 = vld [vmem:[#allocation2 + $0x12] sm:$0xff]  ;;  %v2199_v38 = vmul.f32 %v4592_v61, %v4656_v14  ;;  %v2303_v61 = vmul.f32 %v4604_v27, %v4682_v51 }
 0x521   :  { %2205 = vrot.lane.b32.xlu0 %v2197_v9, %s3612_s4  ;;  %3395 = vmatpush3.msra.mxu1 %v3225_v18  ;;  %v2044_v19 = vmul.f32 %v4580_v8, %v2016_v17  ;;  %v3221_v40 = vld [vmem:[%s5114_s5 + $0xa0] sm:$0xff]  ;;  %v2250_v8 = vmul.f32 %v4602_v39, %v1911_v33  ;;  %v3219_v29 = vld [vmem:[%s5114_s5 + $0x90] sm:$0xff]  ;;  %v1991_v16 = vmul.f32 %v4556_v41, %v1963_v23 }
 0x522   :  { %2107 = vrot.lane.b32.xlu1 %v2096_v47, %s3610_s13  ;;  %3396 = vmatprep.subr.mxu1 %v3224_v11  ;;  %v2302_v53 = vmul.f32 %v4582_v32, %v1963_v23  ;;  %v2015_v30 = vld [vmem:[#allocation2 + $0x14] sm:$0xff]  ;;  %v2251_v32 = vmul.f32 %v4597_v26, %v4668_v4  ;;  %v2276_v14 = vld [vmem:[#allocation2 + $0x22] sm:$0xff] }
 0x523   :  { %3397 = vmatpush3.msra.mxu1 %v3224_v11  ;;  %v2043_v39 = vmul.f32 %v4576_v54, %v2015_v30  ;;  %v2067_v13 = vld [vmem:[#allocation2 + $0x15] sm:$0xff]  ;;  %v2508_v26 = vld [vmem:[%s5109_s1] sm:$0xff] }
 0x524   :  { %3398 = vmatprep.subr.mxu1 %v3223_v25  ;;  %v2095_v41 = vmul.f32 %v4570_v3, %v2067_v13  ;;  %v2119_v45 = vld [vmem:[#allocation2 + $0x16] sm:$0xff]  ;;  %v2304_v3 = vmul.f32 %v4621_v48, %v2276_v14 }
 0x525   :  { %2257 = vrot.lane.b32.xlu0 %v2249_v49, %s3613_s22  ;;  %3399 = vmatpush3.msra.mxu1 %v3223_v25  ;;  %v2147_v54 = vmul.f32 %v4588_v34, %v2119_v45  ;;  %v4753_v34 = vld [vmem:[%s5109_s1 + $0x8] sm:$0xff]  ;;  %v4760_v27 = vld [vmem:[%s5109_s1 + $0x10] sm:$0xff]  ;;  %v4767_v48 = vld [vmem:[%s5109_s1 + $0x18] sm:$0xff] }
 0x526   :  { %1951 = vrot.lane.b32.xlu1 %v1940_v37, %s3604_s19  ;;  %3400 = vmatprep.subr.mxu1 %v3222_v44 }
 0x527   :  { %3401 = vmatpush3.msra.mxu1 %v3222_v44 }
 0x528   :  { %3402 = vmatprep.subr.mxu1 %v3221_v40 }
 0x529   :  { %2309 = vrot.lane.b32.xlu0 %v2301_v42, %s3614_s24  ;;  %3403 = vmatpush3.msra.mxu1 %v3221_v40 }
 0x52a   :  { %2155 = vrot.lane.b32.xlu1 %v2146_v62, %s3611_s3  ;;  %3404 = vmatprep.subr.mxu1 %v3220_v15 }
 0x52b   :  { %3405 = vmatpush3.msra.mxu1 %v3220_v15 }
 0x52c   :  { %3406 = vmatprep.subr.mxu1 %v3219_v29 }
 0x52d   :  { %2159 = vrot.lane.b32.xlu0 %v2148_v52, %s3611_s3  ;;  %3407 = vmatpush3.msra.mxu1 %v3219_v29 }
 0x52e   :  { %2003 = vrot.lane.b32.xlu1 %v1992_v28, %s3606_s21 }
 0x531   :  { %2211 = vrot.lane.b32.xlu0 %v2200_v63, %s3612_s4 }
 0x532   :  { %2207 = vrot.lane.b32.xlu1 %v2198_v5, %s3612_s4 }
 0x535   :  { %2263 = vrot.lane.b32.xlu0 %v2252_v20, %s3613_s22 }
 0x536   :  { %2055 = vrot.lane.b32.xlu1 %v2044_v19, %s3608_s23 }
 0x539   :  { %1949 = vrot.lane.b32.xlu0 %v1939_v58, %s3604_s19 }
 0x53a   :  { %2259 = vrot.lane.b32.xlu1 %v2250_v8, %s3613_s22 }
 0x53d   :  { %2001 = vrot.lane.b32.xlu0 %v1991_v16, %s3606_s21 }
 0x53e   :  { %2311 = vrot.lane.b32.xlu1 %v2302_v53, %s3614_s24 }
 0x541   :  { %2053 = vrot.lane.b32.xlu0 %v2043_v39, %s3608_s23 }
 0x542   :  { %2209 = vrot.lane.b32.xlu1 %v2199_v38, %s3612_s4 }
 0x545   :  { %2105 = vrot.lane.b32.xlu0 %v2095_v41, %s3610_s13 }
 0x546   :  { %2261 = vrot.lane.b32.xlu1 %v2251_v32, %s3613_s22 }
 0x549   :  { %2157 = vrot.lane.b32.xlu0 %v2147_v54, %s3611_s3 }
 0x54a   :  { %2313 = vrot.lane.b32.xlu1 %v2303_v61, %s3614_s24 }
 0x54d   :  { %2315 = vrot.lane.b32.xlu0 %v2304_v3, %s3614_s24 }
 0x54e   :  { %2514 = vperm.xlu1 %3567, %v2508_v26  }
 0x551   :  { %2519 = vperm.xlu0 %3568, %v4753_v34  }
 0x552   :  { %3569 = vset.pattern.permute.xlu1 %v3593_v0 }
 0x553   :  { %2566 = vperm.xlu1 %3569, %v2508_v26  }
 0x555   :  { %2524 = vperm.xlu0 %3568, %v4760_v27  }
 0x557   :  { %2571 = vperm.xlu1 %3569, %v4753_v34  }
 0x559   :  { %2529 = vperm.xlu0 %3568, %v4767_v48  }
 0x55b   :  { %3570 = vset.pattern.permute.xlu1 %v3596_v10 }
 0x55c   :  { %2623 = vperm.xlu1 %3570, %v4753_v34  }
 0x55d   :  { %3573 = vset.pattern.permute.xlu0 %v3596_v10 }
 0x55e   :  { %2618 = vperm.xlu0 %3573, %v2508_v26  }
 0x560   :  { %3571 = vset.pattern.permute.xlu1 %v5152_v60 }
 0x561   :  { %2670 = vperm.xlu1 %3571, %v2508_v26  }
 0x562   :  { %2628 = vperm.xlu0 %3573, %v4760_v27  }
 0x565   :  { %2675 = vperm.xlu1 %3571, %v4753_v34  }
 0x566   :  { %2633 = vperm.xlu0 %3573, %v4767_v48  }
 0x569   :  { %3572 = vset.pattern.permute.xlu1 %v5142_v46 }
 0x56a   :  { %2722 = vperm.xlu1 %3572, %v2508_v26   ;;  %3579 = vset.pattern.permute.xlu0 %v5142_v46 }
 0x56b   :  { %2727 = vperm.xlu0 %3579, %v4753_v34  }
 0x56e   :  { %3574 = vset.pattern.permute.xlu1 %v3593_v0 }
 0x56f   :  { %2576 = vperm.xlu1 %3574, %v4760_v27   ;;  %2732 = vperm.xlu0 %3579, %v4760_v27  }
 0x573   :  { %3575 = vset.pattern.permute.xlu1 %v5143_v57  ;;  %3585 = vset.pattern.permute.xlu0 %v5143_v57 }
 0x574   :  { %2774 = vperm.xlu1 %3575, %v2508_v26   ;;  %2784 = vperm.xlu0 %3585, %v4760_v27  }
 0x578   :  { %3576 = vset.pattern.permute.xlu1 %v3593_v0  ;;  %3586 = vset.pattern.permute.xlu0 %v5144_v7 }
 0x579   :  { %2581 = vperm.xlu1 %3576, %v4767_v48   ;;  %2831 = vperm.xlu0 %3586, %v4753_v34  }
 0x57d   :  { %3577 = vset.pattern.permute.xlu1 %v5143_v57  ;;  %2841 = vperm.xlu0 %3586, %v4767_v48  }
 0x57e   :  { %2779 = vperm.xlu1 %3577, %v4753_v34  }
 0x580   :  { %v2104_v10 = vpop.permute.xlu1 %2103 }
 0x581   :  { %3590 = vset.pattern.permute.xlu0 %v5145_v36 }
 0x582   :  { %3578 = vset.pattern.permute.xlu1 %v5144_v7  ;;  %2478 = vperm.xlu0 %3590, %v2508_v26  }
 0x583   :  { %v1948_v21 = vpop.permute.xlu0 %1947  ;;  %2826 = vperm.xlu1 %3578, %v2508_v26  }
 0x584   :  { %1958 = vst.msk [vmem:[#allocation3 + $0x8] sm:$0xff] %vm754_vm13, %v1948_v21  ;;  %v1946_v0 = vpop.permute.xlu1 %1945 }
 0x585   :  { %1957 = vst.msk [vmem:[#allocation3] sm:$0xff] %vm754_vm13, %v1946_v0 }
 0x586   :  { %2493 = vperm.xlu0 %3590, %v4767_v48  }
 0x587   :  { %v2000_v9 = vpop.permute.xlu0 %1999  ;;  %3580 = vset.pattern.permute.xlu1 %v5152_v60 }
 0x588   :  { %2010 = vst.msk [vmem:[#allocation3 + $0x8] sm:$0xff] %vm807_vm14, %v2000_v9  ;;  %v1998_v47 = vpop.permute.xlu1 %1997  ;;  %2680 = vperm.xlu1 %3580, %v4760_v27  }
 0x589   :  { %2009 = vst.msk [vmem:[#allocation3] sm:$0xff] %vm807_vm14, %v1998_v47 }
 0x58a   :  { %3592 = vset.pattern.permute.xlu0 %v5147_v22 }
 0x58b   :  { %v2052_v4 = vpop.permute.xlu0 %2051 }
 0x58c   :  { %2062 = vst.msk [vmem:[#allocation3 + $0x8] sm:$0xff] %vm860_vm15, %v2052_v4  ;;  %v2050_v49 = vpop.permute.xlu1 %2049  ;;  %3581 = vset.pattern.permute.xlu1 %v5147_v22 }
 0x58d   :  { %2114 = vst.msk [vmem:[#allocation3 + $0x8] sm:$0xff] %vm913_vm1, %v2104_v10  ;;  %2878 = vperm.xlu1 %3581, %v2508_v26  }
 0x58e   :  { %2061 = vst.msk [vmem:[#allocation3] sm:$0xff] %vm860_vm15, %v2050_v49  ;;  %v3234_v49 = vld [vmem:[%s5115_s6 + $0x2] ss:$0 sm:$0xff] }
 0x58f   :  { %v2154_v37 = vpop.permute.xlu0 %2153 }
 0x590   :  { %v2102_v59 = vpop.permute.xlu1 %2101 }
 0x591   :  { %2113 = vst.msk [vmem:[#allocation3] sm:$0xff] %vm913_vm1, %v2102_v59  ;;  %3582 = vset.pattern.permute.xlu1 %v5152_v60 }
 0x592   :  { %2165 = vst.msk [vmem:[#allocation3] sm:$0xff] %vm966_vm2, %v2154_v37  ;;  %2685 = vperm.xlu1 %3582, %v4767_v48   ;;  %v3235_v37 = vld [vmem:[%s5116_s7 + $0x2] ss:$0 sm:$0xff] }
 0x593   :  { %v2206_v42 = vpop.permute.xlu0 %2205 }
 0x594   :  { %2217 = vst.msk [vmem:[#allocation3] sm:$0xff] %vm1019_vm3, %v2206_v42  ;;  %v2108_v31 = vpop.permute.xlu1 %2107 }
 0x596   :  { %3583 = vset.pattern.permute.xlu1 %v5147_v22 }
 0x597   :  { %v2258_v62 = vpop.permute.xlu0 %2257  ;;  %2883 = vperm.xlu1 %3583, %v4753_v34  }
 0x598   :  { %2269 = vst.msk [vmem:[#allocation3] sm:$0xff] %vm1072_vm4, %v2258_v62  ;;  %v1952_v55 = vpop.permute.xlu1 %1951 }
 0x599   :  { %1960 = vst.msk [vmem:[#allocation3 + $0x18] sm:$0xff] %vm754_vm13, %v1952_v55 }
 0x59b   :  { %v2310_v51 = vpop.permute.xlu0 %2309  ;;  %3584 = vset.pattern.permute.xlu1 %v5142_v46 }
 0x59c   :  { %2321 = vst.msk [vmem:[#allocation3] sm:$0xff] %vm1125_vm5, %v2310_v51  ;;  %v2156_v52 = vpop.permute.xlu1 %2155  ;;  %2737 = vperm.xlu1 %3584, %v4767_v48  }
 0x59d   :  { %2166 = vst.msk [vmem:[#allocation3 + $0x8] sm:$0xff] %vm966_vm2, %v2156_v52 }
 0x59f   :  { %v2160_v28 = vpop.permute.xlu0 %2159 }
 0x5a0   :  { %v2004_v43 = vpop.permute.xlu1 %2003  ;;  %3587 = vset.pattern.permute.xlu1 %v5143_v57 }
 0x5a1   :  { %2012 = vst.msk [vmem:[#allocation3 + $0x18] sm:$0xff] %vm807_vm14, %v2004_v43  ;;  %2789 = vperm.xlu1 %3587, %v4767_v48  }
 0x5a3   :  { %v2212_v6 = vpop.permute.xlu0 %2211  ;;  %v2325_v18 = vld [vmem:[#allocation3] sm:$0xff] }
 0x5a4   :  { %3408 = vmatprep.mubr.msk.f32.mxu1 %vm1134_vm6, %v2325_v18  ;;  %v2208_v46 = vpop.permute.xlu1 %2207 }
 0x5a5   :  { %2218 = vst.msk [vmem:[#allocation3 + $0x8] sm:$0xff] %vm1019_vm3, %v2208_v46  ;;  %3588 = vset.pattern.permute.xlu1 %v5144_v7 }
 0x5a6   :  { %2836 = vperm.xlu1 %3588, %v4760_v27  }
 0x5a7   :  { %v2264_v11 = vpop.permute.xlu0 %2263 }
 0x5a8   :  { %v2056_v63 = vpop.permute.xlu1 %2055 }
 0x5a9   :  { %2064 = vst.msk [vmem:[#allocation3 + $0x18] sm:$0xff] %vm860_vm15, %v2056_v63 }
 0x5aa   :  { %2116 = vst.msk [vmem:[#allocation3 + $0x18] sm:$0xff] %vm913_vm1, %v2108_v31  ;;  %3589 = vset.pattern.permute.xlu1 %v5147_v22 }
 0x5ab   :  { %2168 = vst.msk [vmem:[#allocation3 + $0x18] sm:$0xff] %vm966_vm2, %v2160_v28  ;;  %v1950_v57 = vpop.permute.xlu0 %1949  ;;  %2888 = vperm.xlu1 %3589, %v4760_v27  }
 0x5ac   :  { %2220 = vst.msk [vmem:[#allocation3 + $0x18] sm:$0xff] %vm1019_vm3, %v2212_v6  ;;  %v2260_v7 = vpop.permute.xlu1 %2259 }
 0x5ad   :  { %1959 = vst.msk [vmem:[#allocation3 + $0x10] sm:$0xff] %vm754_vm13, %v1950_v57 }
 0x5ae   :  { %2272 = vst.msk [vmem:[#allocation3 + $0x18] sm:$0xff] %vm1072_vm4, %v2264_v11  ;;  %2270 = vst.msk [vmem:[#allocation3 + $0x8] sm:$0xff] %vm1072_vm4, %v2260_v7 }
 0x5af   :  { %v2002_v5 = vpop.permute.xlu0 %2001  ;;  %2893 = vperm.xlu1 %3589, %v4767_v48  }
 0x5b0   :  { %2011 = vst.msk [vmem:[#allocation3 + $0x10] sm:$0xff] %vm807_vm14, %v2002_v5  ;;  %v2312_v22 = vpop.permute.xlu1 %2311 }
 0x5b1   :  { %2322 = vst.msk [vmem:[#allocation3 + $0x8] sm:$0xff] %vm1125_vm5, %v2312_v22 }
 0x5b3   :  { %v2054_v56 = vpop.permute.xlu0 %2053  ;;  %3591 = vset.pattern.permute.xlu1 %v5145_v36 }
 0x5b4   :  { %2063 = vst.msk [vmem:[#allocation3 + $0x10] sm:$0xff] %vm860_vm15, %v2054_v56  ;;  %v2210_v25 = vpop.permute.xlu1 %2209  ;;  %2483 = vperm.xlu1 %3591, %v4753_v34  }
 0x5b7   :  { %v2106_v17 = vpop.permute.xlu0 %2105 }
 0x5b8   :  { %2115 = vst.msk [vmem:[#allocation3 + $0x10] sm:$0xff] %vm913_vm1, %v2106_v17  ;;  %v2262_v44 = vpop.permute.xlu1 %2261  ;;  %v2326_v20 = vld [vmem:[#allocation3 + $0x8] sm:$0xff]  ;;  %2488 = vperm.xlu1 %3591, %v4760_v27  }
 0x5b9   :  { %3409 = vmatmul.mubr.msk.f32.vlgmr.msra.gmra.mxu1 %vm1134_vm6, %v2326_v20 }
 0x5bb   :  { %v2158_v19 = vpop.permute.xlu0 %2157 }
 0x5bc   :  { %2167 = vst.msk [vmem:[#allocation3 + $0x10] sm:$0xff] %vm966_vm2, %v2158_v19  ;;  %v2314_v33 = vpop.permute.xlu1 %2313 }
 0x5bd   :  { %2219 = vst.msk [vmem:[#allocation3 + $0x10] sm:$0xff] %vm1019_vm3, %v2210_v25 }
 0x5be   :  { %2271 = vst.msk [vmem:[#allocation3 + $0x10] sm:$0xff] %vm1072_vm4, %v2262_v44 }
 0x5bf   :  { %2323 = vst.msk [vmem:[#allocation3 + $0x10] sm:$0xff] %vm1125_vm5, %v2314_v33  ;;  %v2316_v36 = vpop.permute.xlu0 %2315 }
 0x5c0   :  { %2324 = vst.msk [vmem:[#allocation3 + $0x18] sm:$0xff] %vm1125_vm5, %v2316_v36 }
 0x5c6   :  { %v2327_v40 = vld [vmem:[#allocation3 + $0x10] sm:$0xff] }
 0x5c7   :  { %3411 = vmatprep.mubr.msk.f32.mxu1 %vm1134_vm6, %v2327_v40  ;;  %v2328_v15 = vld [vmem:[#allocation3 + $0x18] sm:$0xff] }
 0x5c8   :  { %3412 = vmatmul.mubr.msk.f32.gmra.mxu1 %vm1134_vm6, %v2328_v15 }
 0x5c9   :  { %v4852_v58 = vpop.permute.xlu1 %2514 }
 0x5cc   :  { %v2520_v41 = vpop.permute.xlu0 %2519 }
 0x5ce   :  { %v4854_v8 = vpop.permute.xlu1 %2566 }
 0x5d0   :  { %v4872_v45 = vpop.permute.xlu0 %2524 }
 0x5d2   :  { %v4856_v23 = vpop.permute.xlu1 %2571 }
 0x5d4   :  { %v4876_v61 = vpop.permute.xlu0 %2529 }
 0x5d7   :  { %v4858_v29 = vpop.permute.xlu1 %2623 }
 0x5d9   :  { %v4880_v3 = vpop.permute.xlu0 %2618 }
 0x5dc   :  { %v4860_v16 = vpop.permute.xlu1 %2670 }
 0x5dd   :  { %v4884_v34 = vpop.permute.xlu0 %2628 }
 0x5e0   :  { %v2676_v53 = vpop.permute.xlu1 %2675 }
 0x5e1   :  { %v4888_v48 = vpop.permute.xlu0 %2633 }
 0x5e5   :  { %v4862_v30 = vpop.permute.xlu1 %2722 }
 0x5e6   :  { %v4892_v10 = vpop.permute.xlu0 %2727 }
 0x5ea   :  { %v4864_v39 = vpop.permute.xlu1 %2576  ;;  %v4896_v0 = vpop.permute.xlu0 %2732 }
 0x5ef   :  { %v4866_v38 = vpop.permute.xlu1 %2774  ;;  %v4900_v47 = vpop.permute.xlu0 %2784 }
 0x5f4   :  { %v4868_v13 = vpop.permute.xlu1 %2581  ;;  %v4910_v31 = vpop.permute.xlu0 %2831 }
 0x5f8   :  { %v4917_v46 = vpop.permute.xlu0 %2841 }
 0x5f9   :  { %v4870_v32 = vpop.permute.xlu1 %2779 }
 0x5fd   :  { %v2479_v63 = vpop.permute.xlu0 %2478 }
 0x5fe   :  { %v4874_v54 = vpop.permute.xlu1 %2826 }
 0x603   :  { %v4878_v14 = vpop.permute.xlu1 %2680 }
 0x608   :  { %v4882_v26 = vpop.permute.xlu1 %2878 }
 0x60d   :  { %v4886_v27 = vpop.permute.xlu1 %2685 }
 0x612   :  { %v4890_v60 = vpop.permute.xlu1 %2883 }
 0x617   :  { %v4894_v21 = vpop.permute.xlu1 %2737 }
 0x61c   :  { %v4898_v9 = vpop.permute.xlu1 %2789 }
 0x621   :  { %v4902_v4 = vpop.permute.xlu1 %2836 }
 0x626   :  { %v4912_v55 = vpop.permute.xlu1 %2888 }
 0x62a   :  { %v4915_v18 = vpop.permute.xlu1 %2893 }
 0x62f   :  { %v2484_v11 = vpop.permute.xlu1 %2483 }
 0x679   :  { %v3410_v59 = vpop.f32.mrf.mxu1 }
 0x67a   :  { %v2433_v42 = vmul.f32 %v3410_v59, %v3234_v49 }
 0x67b   :  { %v2407_v62 = vpop.f32.mrf.mxu1 }
 0x67c   :  { %v2443_v51 = vadd.f32 %v3235_v37, %v2433_v42  ;;  %v2432_v52 = vmul.f32 %v3234_v49, %v2407_v62 }
 0x67e   :  { %v2447_v28 = vmax.f32 %v2443_v51, 0.0  ;;  %v2442_v43 = vadd.f32 %v3235_v37, %v2432_v52 }
 0x680   :  { %2465 = vst.msk [vmem:[#allocation2 + $0xd] sm:$0xff] %vm41_vm0, %v2447_v28  ;;  %v2446_v6 = vmax.f32 %v2442_v43, 0.0 }
 0x682   :  { %2464 = vst.msk [vmem:[#allocation2 + $0x5] sm:$0xff] %vm41_vm0, %v2446_v6 }
 0x687   :  { %v2661_v57 = vld [vmem:[#allocation2 + $0xd] sm:$0xff] }
 0x688   :  { %v3413_v7 = vpop.f32.mrf.mxu1  ;;  %v2689_v5 = vmul.f32 %v2676_v53, %v2661_v57 }
 0x689   :  { %v2435_v22 = vmul.f32 %v3413_v7, %v3234_v49  ;;  %v2469_v56 = vld [vmem:[#allocation2 + $0x8] sm:$0xff]  ;;  %v2468_v25 = vld [vmem:[#allocation2] sm:$0xff] }
 0x68a   :  { %v2505_v17 = vld [vmem:[#allocation2 + $0x9] sm:$0xff]  ;;  %v2497_v44 = vmul.f32 %v2484_v11, %v2469_v56  ;;  %v2496_v20 = vmul.f32 %v2479_v63, %v2468_v25  ;;  %v2417_v19 = vpop.f32.mrf.mxu1  ;;  %2698 = vrot.lane.b32.xlu1 %v2689_v5, %s3610_s13  ;;  %v2504_v36 = vld [vmem:[#allocation2 + $0x1] sm:$0xff]  ;;  %v2489_v11 = vpop.permute.xlu1 %2488 }
 0x68b   :  { %v2533_v33 = vmul.f32 %v2520_v41, %v2505_v17  ;;  %v2445_v40 = vadd.f32 %v3235_v37, %v2435_v22  ;;  %v2434_v15 = vmul.f32 %v3234_v49, %v2417_v19  ;;  %v2557_v59 = vld [vmem:[#allocation2 + $0xa] sm:$0xff]  ;;  %v2532_v53 = vmul.f32 %v4852_v58, %v2504_v36  ;;  %v2556_v51 = vld [vmem:[#allocation2 + $0x2] sm:$0xff]  ;;  %v2494_v63 = vpop.permute.xlu0 %2493 }
 0x68c   :  { %2501 = vst.msk [vmem:[#allocation3 + $0x8] sm:$0xff] %vm41_vm0, %v2497_v44  ;;  %2500 = vst.msk [vmem:[#allocation3] sm:$0xff] %vm41_vm0, %v2496_v20  ;;  %v2585_v52 = vmul.f32 %v4856_v23, %v2557_v59  ;;  %v2609_v49 = vld [vmem:[#allocation2 + $0xc] sm:$0xff]  ;;  %v2584_v28 = vmul.f32 %v4854_v8, %v2556_v51  ;;  %v2608_v43 = vld [vmem:[#allocation2 + $0x4] sm:$0xff] }
 0x68d   :  { %2542 = vrot.lane.b32.xlu0 %v2533_v33, %s3604_s19  ;;  %v2449_v42 = vmax.f32 %v2445_v40, 0.0  ;;  %v2444_v62 = vadd.f32 %v3235_v37, %v2434_v15  ;;  %v2637_v58 = vmul.f32 %v4858_v29, %v2609_v49  ;;  %v2712_v37 = vld [vmem:[#allocation2 + $0x6] sm:$0xff]  ;;  %v2636_v23 = vmul.f32 %v4880_v3, %v2608_v43  ;;  %v3243_v36 = vld [vmem:[%s5114_s5 + $0x110] sm:$0xff]  ;;  %v3236_v49 = vld [vmem:[%s5114_s5 + $0xd8] sm:$0xff] }
 0x68e   :  { %2540 = vrot.lane.b32.xlu1 %v2532_v53, %s3604_s19  ;;  %v2660_v6 = vld [vmem:[#allocation2 + $0x5] sm:$0xff]  ;;  %v2740_v57 = vmul.f32 %v4862_v30, %v2712_v37  ;;  %v2792_v3 = vmul.f32 %v4866_v38, %v2469_v56  ;;  %v2896_v56 = vmul.f32 %v4882_v26, %v2557_v59  ;;  %v3240_v59 = vld [vmem:[%s5114_s5 + $0xf8] sm:$0xff] }
 0x68f   :  { %2467 = vst.msk [vmem:[#allocation2 + $0x1d] sm:$0xff] %vm41_vm0, %v2449_v42  ;;  %v2448_v41 = vmax.f32 %v2444_v62, 0.0  ;;  %v2688_v5 = vmul.f32 %v4860_v16, %v2660_v6  ;;  %v2844_v16 = vmul.f32 %v4874_v54, %v2505_v17  ;;  %v3239_v42 = vld [vmem:[%s5114_s5 + $0xf0] sm:$0xff]  ;;  %v3238_v51 = vld [vmem:[%s5114_s5 + $0xe8] sm:$0xff] }
 0x691   :  { %2594 = vrot.lane.b32.xlu0 %v2585_v52, %s3606_s21  ;;  %2466 = vst.msk [vmem:[#allocation2 + $0x15] sm:$0xff] %vm41_vm0, %v2448_v41  ;;  %v3237_v52 = vld [vmem:[%s5114_s5 + $0xe0] sm:$0xff] }
 0x692   :  { %2592 = vrot.lane.b32.xlu1 %v2584_v28, %s3606_s21 }
 0x695   :  { %2646 = vrot.lane.b32.xlu0 %v2637_v58, %s3608_s23 }
 0x696   :  { %2644 = vrot.lane.b32.xlu1 %v2636_v23, %s3608_s23  ;;  %v2663_v25 = vld [vmem:[#allocation2 + $0x1d] sm:$0xff] }
 0x697   :  { %v2691_v30 = vmul.f32 %v4886_v27, %v2663_v25  ;;  %v3244_v27 = vld [vmem:[%s5114_s5 + $0x118] sm:$0xff]  ;;  %v2767_v33 = vld [vmem:[#allocation2 + $0x20] sm:$0xff] }
 0x698   :  { %v2470_v8 = vld [vmem:[#allocation2 + $0x10] sm:$0xff]  ;;  %v4937_v7 = vld [vmem:[#allocation2 + $0x18] sm:$0xff]  ;;  %3414 = vmatprep.subr.mxu0 %v3244_v27  ;;  %v2795_v40 = vmul.f32 %v4898_v9, %v2767_v33  ;;  %v2819_v15 = vld [vmem:[#allocation2 + $0x21] sm:$0xff] }
 0x699   :  { %2748 = vrot.lane.b32.xlu0 %v2740_v57, %s3611_s3  ;;  %v2498_v29 = vmul.f32 %v2489_v11, %v2470_v8  ;;  %v2499_v22 = vmul.f32 %v2494_v63, %v4937_v7  ;;  %v4948_v44 = vld [vmem:[#allocation2 + $0x19] sm:$0xff]  ;;  %v2713_v38 = vld [vmem:[#allocation2 + $0xe] sm:$0xff]  ;;  %3415 = vmatpush3.msra.mxu0 %v3244_v27  ;;  %v2847_v9 = vmul.f32 %v4917_v46, %v2819_v15  ;;  %v2871_v6 = vld [vmem:[#allocation2 + $0x22] sm:$0xff] }
 0x69a   :  { %2696 = vrot.lane.b32.xlu1 %v2688_v5, %s3610_s13  ;;  %v2535_v20 = vmul.f32 %v4876_v61, %v4948_v44  ;;  %v2715_v19 = vld [vmem:[#allocation2 + $0x1e] sm:$0xff]  ;;  %v2741_v54 = vmul.f32 %v4892_v10, %v2713_v38  ;;  %3416 = vmatprep.subr.mxu0 %v3243_v36  ;;  %v3242_v10 = vld [vmem:[%s5114_s5 + $0x108] sm:$0xff]  ;;  %v2506_v62 = vld [vmem:[#allocation2 + $0x11] sm:$0xff]  ;;  %v2794_v37 = vmul.f32 %v4900_v47, %v4937_v7 }
 0x69b   :  { %2502 = vst.msk [vmem:[#allocation3 + $0x10] sm:$0xff] %vm41_vm0, %v2498_v29  ;;  %2503 = vst.msk [vmem:[#allocation3 + $0x18] sm:$0xff] %vm41_vm0, %v2499_v22  ;;  %v4962_v17 = vld [vmem:[#allocation2 + $0x1a] sm:$0xff]  ;;  %v2743_v61 = vmul.f32 %v4894_v21, %v2715_v19  ;;  %3417 = vmatpush3.msra.mxu0 %v3243_v36  ;;  %v2534_v46 = vmul.f32 %v4872_v45, %v2506_v62  ;;  %v2558_v41 = vld [vmem:[#allocation2 + $0x12] sm:$0xff] }
 0x69c   :  { %v2587_v26 = vmul.f32 %v4868_v13, %v4962_v17  ;;  %v3241_v21 = vld [vmem:[%s5114_s5 + $0x100] sm:$0xff]  ;;  %3418 = vmatprep.subr.mxu0 %v3242_v10  ;;  %v2793_v13 = vmul.f32 %v4870_v32, %v2470_v8  ;;  %v2586_v45 = vmul.f32 %v4864_v39, %v2558_v41  ;;  %v2610_v28 = vld [vmem:[#allocation2 + $0x14] sm:$0xff]  ;;  %v2897_v43 = vmul.f32 %v4890_v60, %v2558_v41 }
 0x69d   :  { %2800 = vrot.lane.b32.xlu0 %v2792_v3, %s3612_s4  ;;  %3419 = vmatpush3.msra.mxu0 %v3242_v10  ;;  %v2611_v53 = vld [vmem:[#allocation2 + $0x1c] sm:$0xff]  ;;  %v2846_v60 = vmul.f32 %v4902_v4, %v4948_v44  ;;  %v2898_v47 = vmul.f32 %v4912_v55, %v4962_v17 }
 0x69e   :  { %2702 = vrot.lane.b32.xlu1 %v2691_v30, %s3610_s13  ;;  %3420 = vmatprep.subr.mxu0 %v3241_v21  ;;  %v2639_v32 = vmul.f32 %v4888_v48, %v2611_v53  ;;  %v2845_v48 = vmul.f32 %v4910_v31, %v2506_v62  ;;  %v2638_v31 = vmul.f32 %v4884_v34, %v2610_v28  ;;  %v2662_v58 = vld [vmem:[#allocation2 + $0x15] sm:$0xff]  ;;  %v3251_v62 = vld [vmem:[%s5115_s6 + $0x3] ss:$0 sm:$0xff] }
 0x69f   :  { %3421 = vmatpush3.msra.mxu0 %v3241_v21  ;;  %v2690_v39 = vmul.f32 %v4878_v14, %v2662_v58  ;;  %v2714_v23 = vld [vmem:[#allocation2 + $0x16] sm:$0xff]  ;;  %v2899_v14 = vmul.f32 %v4915_v18, %v2871_v6 }
 0x6a0   :  { %3422 = vmatprep.subr.mxu0 %v3240_v59  ;;  %v2742_v34 = vmul.f32 %v4896_v0, %v2714_v23 }
 0x6a1   :  { %2852 = vrot.lane.b32.xlu0 %v2844_v16, %s3613_s22  ;;  %3423 = vmatpush3.msra.mxu0 %v3240_v59 }
 0x6a2   :  { %2546 = vrot.lane.b32.xlu1 %v2535_v20, %s3604_s19  ;;  %3424 = vmatprep.subr.mxu0 %v3239_v42 }
 0x6a3   :  { %3425 = vmatpush3.msra.mxu0 %v3239_v42  ;;  %v3049_v42 = vld [vmem:[%s5117_s8] sm:$0xff] }
 0x6a4   :  { %3426 = vmatprep.subr.mxu0 %v3238_v51  ;;  %3438 = vmatprep.subr.mxu1 %v3049_v42 }
 0x6a5   :  { %2904 = vrot.lane.b32.xlu0 %v2896_v56, %s3614_s24  ;;  %3427 = vmatpush3.msra.mxu0 %v3238_v51 }
 0x6a6   :  { %2750 = vrot.lane.b32.xlu1 %v2741_v54, %s3611_s3  ;;  %3428 = vmatprep.subr.mxu0 %v3237_v52 }
 0x6a7   :  { %3429 = vmatpush3.msra.mxu0 %v3237_v52  ;;  %3439 = vmatpush3.msra.mxu1 %v3049_v42 }
 0x6a8   :  { %3430 = vmatprep.subr.mxu0 %v3236_v49 }
 0x6a9   :  { %2754 = vrot.lane.b32.xlu0 %v2743_v61, %s3611_s3  ;;  %3431 = vmatpush3.msra.mxu0 %v3236_v49 }
 0x6aa   :  { %2598 = vrot.lane.b32.xlu1 %v2587_v26, %s3606_s21 }
 0x6ad   :  { %2806 = vrot.lane.b32.xlu0 %v2795_v40, %s3612_s4 }
 0x6ae   :  { %2802 = vrot.lane.b32.xlu1 %v2793_v13, %s3612_s4 }
 0x6b1   :  { %2858 = vrot.lane.b32.xlu0 %v2847_v9, %s3613_s22 }
 0x6b2   :  { %2650 = vrot.lane.b32.xlu1 %v2639_v32, %s3608_s23  ;;  %v3252_v32 = vld [vmem:[%s5116_s7 + $0x3] ss:$0 sm:$0xff] }
 0x6b5   :  { %2544 = vrot.lane.b32.xlu0 %v2534_v46, %s3604_s19 }
 0x6b6   :  { %2854 = vrot.lane.b32.xlu1 %v2845_v48, %s3613_s22 }
 0x6b9   :  { %2596 = vrot.lane.b32.xlu0 %v2586_v45, %s3606_s21  ;;  %v5153_v45 = vmax.f32 %v4608_v35, 0.0 }
 0x6ba   :  { %2906 = vrot.lane.b32.xlu1 %v2897_v43, %s3614_s24  ;;  %v5154_v43 = vmax.f32 %v4613_v50, 0.0 }
 0x6bd   :  { %2648 = vrot.lane.b32.xlu0 %v2638_v31, %s3608_s23 }
 0x6be   :  { %2804 = vrot.lane.b32.xlu1 %v2794_v37, %s3612_s4 }
 0x6c1   :  { %2700 = vrot.lane.b32.xlu0 %v2690_v39, %s3610_s13 }
 0x6c2   :  { %2856 = vrot.lane.b32.xlu1 %v2846_v60, %s3613_s22 }
 0x6c5   :  { %2752 = vrot.lane.b32.xlu0 %v2742_v34, %s3611_s3 }
 0x6c6   :  { %2908 = vrot.lane.b32.xlu1 %v2898_v47, %s3614_s24 }
 0x6c9   :  { %2910 = vrot.lane.b32.xlu0 %v2899_v14, %s3614_s24 }
 0x6fc   :  { %v2699_v11 = vpop.permute.xlu1 %2698 }
 0x6ff   :  { %v2543_v63 = vpop.permute.xlu0 %2542 }
 0x700   :  { %2553 = vst.msk [vmem:[#allocation3 + $0x8] sm:$0xff] %vm754_vm13, %v2543_v63  ;;  %v2541_v4 = vpop.permute.xlu1 %2540  ;;  %v3253_v63 = vld [vmem:[%s5118_s9] ss:$0 sm:$0xff] }
 0x701   :  { %2552 = vst.msk [vmem:[#allocation3] sm:$0xff] %vm754_vm13, %v2541_v4 }
 0x703   :  { %v2595_v0 = vpop.permute.xlu0 %2594 }
 0x704   :  { %2605 = vst.msk [vmem:[#allocation3 + $0x8] sm:$0xff] %vm807_vm14, %v2595_v0  ;;  %v2593_v57 = vpop.permute.xlu1 %2592  ;;  %v3258_v0 = vld [vmem:[%s5119_s10] ss:$0 sm:$0xff] }
 0x705   :  { %2604 = vst.msk [vmem:[#allocation3] sm:$0xff] %vm807_vm14, %v2593_v57 }
 0x707   :  { %v2647_v55 = vpop.permute.xlu0 %2646 }
 0x708   :  { %2657 = vst.msk [vmem:[#allocation3 + $0x8] sm:$0xff] %vm860_vm15, %v2647_v55  ;;  %v2645_v18 = vpop.permute.xlu1 %2644 }
 0x709   :  { %2709 = vst.msk [vmem:[#allocation3 + $0x8] sm:$0xff] %vm913_vm1, %v2699_v11 }
 0x70a   :  { %2656 = vst.msk [vmem:[#allocation3] sm:$0xff] %vm860_vm15, %v2645_v18 }
 0x70b   :  { %v2749_v8 = vpop.permute.xlu0 %2748 }
 0x70c   :  { %v2697_v7 = vpop.permute.xlu1 %2696 }
 0x70d   :  { %2708 = vst.msk [vmem:[#allocation3] sm:$0xff] %vm913_vm1, %v2697_v7 }
 0x70e   :  { %2760 = vst.msk [vmem:[#allocation3] sm:$0xff] %vm966_vm2, %v2749_v8 }
 0x70f   :  { %v2801_v5 = vpop.permute.xlu0 %2800 }
 0x710   :  { %2812 = vst.msk [vmem:[#allocation3] sm:$0xff] %vm1019_vm3, %v2801_v5  ;;  %v2703_v29 = vpop.permute.xlu1 %2702 }
 0x713   :  { %v2853_v22 = vpop.permute.xlu0 %2852 }
 0x714   :  { %2864 = vst.msk [vmem:[#allocation3] sm:$0xff] %vm1072_vm4, %v2853_v22  ;;  %v2547_v25 = vpop.permute.xlu1 %2546 }
 0x715   :  { %2555 = vst.msk [vmem:[#allocation3 + $0x18] sm:$0xff] %vm754_vm13, %v2547_v25 }
 0x717   :  { %v2905_v3 = vpop.permute.xlu0 %2904 }
 0x718   :  { %2916 = vst.msk [vmem:[#allocation3] sm:$0xff] %vm1125_vm5, %v2905_v3  ;;  %v2751_v30 = vpop.permute.xlu1 %2750 }
 0x719   :  { %2761 = vst.msk [vmem:[#allocation3 + $0x8] sm:$0xff] %vm966_vm2, %v2751_v30 }
 0x71b   :  { %v2755_v44 = vpop.permute.xlu0 %2754 }
 0x71c   :  { %v2599_v16 = vpop.permute.xlu1 %2598 }
 0x71d   :  { %2607 = vst.msk [vmem:[#allocation3 + $0x18] sm:$0xff] %vm807_vm14, %v2599_v16 }
 0x71f   :  { %v2807_v20 = vpop.permute.xlu0 %2806  ;;  %v2920_v38 = vld [vmem:[#allocation3] sm:$0xff] }
 0x720   :  { %3432 = vmatprep.mubr.msk.f32.mxu0 %vm1134_vm6, %v2920_v38  ;;  %v2803_v56 = vpop.permute.xlu1 %2802 }
 0x721   :  { %2813 = vst.msk [vmem:[#allocation3 + $0x8] sm:$0xff] %vm1019_vm3, %v2803_v56 }
 0x723   :  { %v2859_v27 = vpop.permute.xlu0 %2858 }
 0x724   :  { %v2651_v19 = vpop.permute.xlu1 %2650 }
 0x725   :  { %2659 = vst.msk [vmem:[#allocation3 + $0x18] sm:$0xff] %vm860_vm15, %v2651_v19 }
 0x726   :  { %2711 = vst.msk [vmem:[#allocation3 + $0x18] sm:$0xff] %vm913_vm1, %v2703_v29 }
 0x727   :  { %v2545_v54 = vpop.permute.xlu0 %2544  ;;  %2763 = vst.msk [vmem:[#allocation3 + $0x18] sm:$0xff] %vm966_vm2, %v2755_v44 }
 0x728   :  { %2554 = vst.msk [vmem:[#allocation3 + $0x10] sm:$0xff] %vm754_vm13, %v2545_v54  ;;  %v2855_v17 = vpop.permute.xlu1 %2854 }
 0x729   :  { %2815 = vst.msk [vmem:[#allocation3 + $0x18] sm:$0xff] %vm1019_vm3, %v2807_v20 }
 0x72a   :  { %2867 = vst.msk [vmem:[#allocation3 + $0x18] sm:$0xff] %vm1072_vm4, %v2859_v27  ;;  %2865 = vst.msk [vmem:[#allocation3 + $0x8] sm:$0xff] %vm1072_vm4, %v2855_v17 }
 0x72b   :  { %v2597_v61 = vpop.permute.xlu0 %2596 }
 0x72c   :  { %2606 = vst.msk [vmem:[#allocation3 + $0x10] sm:$0xff] %vm807_vm14, %v2597_v61  ;;  %v2907_v33 = vpop.permute.xlu1 %2906 }
 0x72d   :  { %2917 = vst.msk [vmem:[#allocation3 + $0x8] sm:$0xff] %vm1125_vm5, %v2907_v33 }
 0x72f   :  { %v2649_v26 = vpop.permute.xlu0 %2648 }
 0x730   :  { %2658 = vst.msk [vmem:[#allocation3 + $0x10] sm:$0xff] %vm860_vm15, %v2649_v26  ;;  %v2805_v36 = vpop.permute.xlu1 %2804 }
 0x733   :  { %v2701_v10 = vpop.permute.xlu0 %2700 }
 0x734   :  { %2710 = vst.msk [vmem:[#allocation3 + $0x10] sm:$0xff] %vm913_vm1, %v2701_v10  ;;  %v2857_v40 = vpop.permute.xlu1 %2856  ;;  %v2921_v21 = vld [vmem:[#allocation3 + $0x8] sm:$0xff] }
 0x735   :  { %3433 = vmatmul.mubr.msk.f32.vlgmr.msra.gmra.mxu0 %vm1134_vm6, %v2921_v21 }
 0x737   :  { %v2753_v15 = vpop.permute.xlu0 %2752 }
 0x738   :  { %2762 = vst.msk [vmem:[#allocation3 + $0x10] sm:$0xff] %vm966_vm2, %v2753_v15  ;;  %v2909_v13 = vpop.permute.xlu1 %2908 }
 0x739   :  { %2814 = vst.msk [vmem:[#allocation3 + $0x10] sm:$0xff] %vm1019_vm3, %v2805_v36 }
 0x73a   :  { %2866 = vst.msk [vmem:[#allocation3 + $0x10] sm:$0xff] %vm1072_vm4, %v2857_v40 }
 0x73b   :  { %2918 = vst.msk [vmem:[#allocation3 + $0x10] sm:$0xff] %vm1125_vm5, %v2909_v13  ;;  %v2911_v59 = vpop.permute.xlu0 %2910 }
 0x73c   :  { %2919 = vst.msk [vmem:[#allocation3 + $0x18] sm:$0xff] %vm1125_vm5, %v2911_v59 }
 0x742   :  { %v2922_v53 = vld [vmem:[#allocation3 + $0x10] sm:$0xff] }
 0x743   :  { %3435 = vmatprep.mubr.msk.f32.mxu0 %vm1134_vm6, %v2922_v53  ;;  %v2923_v9 = vld [vmem:[#allocation3 + $0x18] sm:$0xff] }
 0x744   :  { %3436 = vmatmul.mubr.msk.f32.gmra.mxu0 %vm1134_vm6, %v2923_v9 }
 0x7f5   :  { %v3434_v51 = vpop.f32.mrf.mxu0 }
 0x7f6   :  { %v3028_v46 = vmul.f32 %v3434_v51, %v3251_v62 }
 0x7f7   :  { %v3002_v52 = vpop.f32.mrf.mxu0 }
 0x7f8   :  { %v3038_v41 = vadd.f32 %v3252_v32, %v3028_v46  ;;  %v3027_v48 = vmul.f32 %v3251_v62, %v3002_v52 }
 0x7fa   :  { %v3037_v49 = vadd.f32 %v3252_v32, %v3027_v48  ;;  %v3042_v28 = vadd.f32 %v3038_v41, %v5153_v45 }
 0x7fc   :  { %v3041_v31 = vadd.f32 %v3037_v49, %v5154_v43  ;;  %v3046_v37 = vmax.f32 %v3042_v28, 0.0 }
 0x7fe   :  { %v3045_v58 = vmax.f32 %v3041_v31, 0.0 }
 0x800   :  { %3440 = vmatprep.mubr.msk.f32.mxu1 %vm41_vm0, %v3045_v58 }
 0x801   :  { %3441 = vmatmul.mubr.msk.f32.vlgmr.msra.gmra.mxu1 %vm41_vm0, %v3046_v37 }
 0x804   :  { %v3437_v39 = vpop.f32.mrf.mxu0 }
 0x805   :  { %v3030_v23 = vmul.f32 %v3437_v39, %v3251_v62 }
 0x806   :  { %v3012_v60 = vpop.f32.mrf.mxu0 }
 0x807   :  { %v3040_v34 = vadd.f32 %v3252_v32, %v3030_v23  ;;  %v3029_v6 = vmul.f32 %v3251_v62, %v3012_v60 }
 0x809   :  { %v3039_v47 = vadd.f32 %v3252_v32, %v3029_v6  ;;  %v3044_v14 = vadd.f32 %v3040_v34, %v1854_v12  ;;  %v3259_v12 = vld [vmem:[%s5120_s11] ss:$0 sm:$0xff] }
 0x80b   :  { %v3043_v35 = vadd.f32 %v3039_v47, %v1853_v24  ;;  %v3048_v11 = vmax.f32 %v3044_v14, 0.0 }
 0x80d   :  { %v3047_v50 = vmax.f32 %v3043_v35, 0.0 }
 0x80f   :  { %3443 = vmatprep.mubr.msk.f32.mxu1 %vm41_vm0, %v3047_v50 }
 0x810   :  { %3444 = vmatmul.mubr.msk.f32.gmra.mxu1 %vm41_vm0, %v3048_v11  ;;  %vm3180_vm0 = vcmask 23552  }
 0x8c1   :  { %v3442_v4 = vpop.f32.mrf.mxu1 }
 0x8c2   :  { %v3141_v2 = vadd.f32 %v3442_v4, %v3253_v63 }
 0x8c3   :  { %v3135_v1 = vpop.f32.mrf.mxu1 }
 0x8c4   :  { %v3162_v24 = vmul.f32 %v3258_v0, %v3141_v2  ;;  %v3136_v57 = vadd.f32 %v3253_v63, %v3135_v1 }
 0x8c6   :  { %v3173_v55 = vadd.f32 %v3259_v12, %v3162_v24  ;;  %v3161_v18 = vmul.f32 %v3258_v0, %v3136_v57 }
 0x8c8   :  { %v3177_v8 = vmax.f32 %v3173_v55, 0.0  ;;  %v3172_v7 = vadd.f32 %v3259_v12, %v3161_v18 }
 0x8ca   :  { %3182 = vst.msk [vmem:[%s5121_s12 + $0x8] sm:$0xff] %vm3180_vm0, %v3177_v8  ;;  %v3176_v5 = vmax.f32 %v3172_v7, 0.0 }
 0x8cc   :  { %3181 = vst.msk [vmem:[%s5121_s12] sm:$0xff] %vm3180_vm0, %v3176_v5 }
 0x8d0   :  { %v3445_v29 = vpop.f32.mrf.mxu1 }
 0x8d1   :  { %v3151_v22 = vadd.f32 %v3445_v29, %v3253_v63 }
 0x8d2   :  { %v3145_v25 = vpop.f32.mrf.mxu1 }
 0x8d3   :  { %v3164_v3 = vmul.f32 %v3258_v0, %v3151_v22  ;;  %v3146_v30 = vadd.f32 %v3253_v63, %v3145_v25 }
 0x8d5   :  { %v3175_v44 = vadd.f32 %v3259_v12, %v3164_v3  ;;  %v3163_v16 = vmul.f32 %v3258_v0, %v3146_v30 }
 0x8d7   :  { %v3179_v20 = vmax.f32 %v3175_v44, 0.0  ;;  %v3174_v38 = vadd.f32 %v3259_v12, %v3163_v16 }
 0x8d9   :  { %3184 = vst.msk [vmem:[%s5121_s12 + $0x18] sm:$0xff] %vm3180_vm0, %v3179_v20  ;;  %v3178_v56 = vmax.f32 %v3174_v38, 0.0 }
 0x8db   :  { %3183 = vst.msk [vmem:[%s5121_s12 + $0x10] sm:$0xff] %vm3180_vm0, %v3178_v56 }

</bundles_post_ra>
